<compile_context>
chip_gen: v6e
topology: v6e:2x2x1
jax: 0.10.0
libtpu: 0.0.40
codegen_flags: <defaults>
</compile_context>

<pallas_src>
import numpy as np
import jax
import jax.numpy as jnp
from jax import lax
from jax.experimental import pallas as pl
from jax.experimental.pallas import tpu as pltpu

BN_EPS = 1e-5
MARGIN = 128   # lane margin on both sides of every padded-flat activation slab

# Conv layer plan: (cin, cout, ksize), matching Model_Final.__init__.
CONV_PLAN = [(1, 8, 3), (8, 8, 3),      # conv1 block
             (8, 16, 3), (16, 16, 3),   # conv2 block
             (16, 16, 3), (16, 10, 1)]  # conv3 block


def stage_geom(h, w, n):
    hp, wp = h + 2, w + 2
    p = n * hp * wp
    return dict(H=h, W=w, Hp=hp, Wp=wp, P=p, m=MARGIN, Pm=p + 2 * MARGIN)


# ----------------------------------------------------------------------------
# Host-side constants: interior masks and pooling/GAP selection matrices.
# ----------------------------------------------------------------------------
def build_interior_mask(g, n):
    m = np.zeros((n, g["Hp"], g["Wp"]), np.float32)
    m[:, 1:g["H"] + 1, 1:g["W"] + 1] = 1.0
    return jnp.asarray(m.reshape(1, g["P"]))


def build_pool_select(g_in, g_out, n):
    """0/1 matrix (P_in, P_out): 2x2-window anchor (2v+1, 2u+1) of the input
    stage -> interior (v+1, u+1) of the next stage (pad columns stay 0)."""
    sel = np.zeros((g_in["P"], g_out["P"]), np.float32)
    for b in range(n):
        for v in range(g_out["H"]):
            for u in range(g_out["W"]):
                j = b * g_in["Hp"] * g_in["Wp"] + (2 * v + 1) * g_in["Wp"] + (2 * u + 1)
                q = b * g_out["Hp"] * g_out["Wp"] + (v + 1) * g_out["Wp"] + (u + 1)
                sel[j, q] = 1.0
    return jnp.asarray(sel)


def build_pool_gap_select(g_in, n):
    """(P_in, N): fused MaxPool2d(2,2) anchor decimation + global average."""
    ho, wo = g_in["H"] // 2, g_in["W"] // 2
    sel = np.zeros((g_in["P"], n), np.float32)
    for b in range(n):
        for v in range(ho):
            for u in range(wo):
                j = b * g_in["Hp"] * g_in["Wp"] + (2 * v + 1) * g_in["Wp"] + (2 * u + 1)
                sel[j, b] = 1.0 / (ho * wo)
    return jnp.asarray(sel)


# ----------------------------------------------------------------------------
# The single fused Pallas kernel
# ----------------------------------------------------------------------------
def make_fused_kernel(g1, g2, g3):

    def conv3x3(src_ref, cin, cout, g, w_ref, p_ref, mask_ref, dst_ref):
        """3x3 'same' conv as 9 shifted matmuls + bias + ReLU + BN affine."""
        m, wp, p = g["m"], g["Wp"], g["P"]
        acc = None
        for t in range(9):
            dy, dx = divmod(t, 3)
            off = (dy - 1) * wp + (dx - 1)
            xs = src_ref[0:cin, m + off:m + off + p]            # (cin, P)
            wt = w_ref[t]                                        # (cout, cin)
            part = wt * xs if cin == 1 else jnp.dot(
                wt, xs, preferred_element_type=jnp.float32)
            acc = part if acc is None else acc + part
        y = jnp.maximum(acc + p_ref[:, 0:1], 0.0)                # conv bias + ReLU
        y = y * p_ref[:, 1:2] + p_ref[:, 2:3]                    # BatchNorm (eval)
        dst_ref[0:cout, m:m + p] = y * mask_ref[...]             # re-zero pad ring

    def window_max(src_ref, c, g):
        """max over each 2x2 window anchored at every padded-flat position."""
        m, wp, p = g["m"], g["Wp"], g["P"]
        a = src_ref[0:c, m:m + p]
        b = src_ref[0:c, m + 1:m + 1 + p]
        cc = src_ref[0:c, m + wp:m + wp + p]
        d = src_ref[0:c, m + wp + 1:m + wp + 1 + p]
        return jnp.maximum(jnp.maximum(a, b), jnp.maximum(cc, d))

    def kernel(x_ref,
               w1a_ref, p1a_ref, w1b_ref, p1b_ref,
               w2a_ref, p2a_ref, w2b_ref, p2b_ref,
               w3a_ref, p3a_ref, w3b_ref, p3b_ref,
               mask1_ref, mask2_ref, mask3_ref,
               pool1_ref, pool2_ref, gapsel_ref,
               out_ref,
               b1a, b1b, b2a, b2b, b3a, b3b):
        # Zero the VMEM scratch so margins and pad columns start at 0.
        for buf in (b1a, b1b, b2a, b2b, b3a, b3b):
            buf[...] = jnp.zeros(buf.shape, jnp.float32)

        # ---- block 1: 16x16 -------------------------------------------------
        conv3x3(x_ref, 1, 8, g1, w1a_ref, p1a_ref, mask1_ref, b1a)
        conv3x3(b1a, 8, 8, g1, w1b_ref, p1b_ref, mask1_ref, b1b)
        win = window_max(b1b, 8, g1)                                    # (8, P1)
        b2a[0:8, g2["m"]:g2["m"] + g2["P"]] = jnp.dot(
            win, pool1_ref[...], preferred_element_type=jnp.float32)    # (8, P2)
        # Dropout(0.1): identity in eval mode.

        # ---- block 2: 8x8 ---------------------------------------------------
        conv3x3(b2a, 8, 16, g2, w2a_ref, p2a_ref, mask2_ref, b2b)
        conv3x3(b2b, 16, 16, g2, w2b_ref, p2b_ref, mask2_ref, b2a)
        win = window_max(b2a, 16, g2)                                   # (16, P2)
        b3a[0:16, g3["m"]:g3["m"] + g3["P"]] = jnp.dot(
            win, pool2_ref[...], preferred_element_type=jnp.float32)    # (16, P3)

        # ---- block 3: 4x4 ---------------------------------------------------
        conv3x3(b3a, 16, 16, g3, w3a_ref, p3a_ref, mask3_ref, b3b)
        # 1x1 conv 16 -> 10 (+ ReLU + BN): a single matmul on the interior.
        x3 = b3b[0:16, g3["m"]:g3["m"] + g3["P"]]                       # (16, P3)
        y = jnp.dot(w3b_ref[...], x3, preferred_element_type=jnp.float32)
        y = jnp.maximum(y + p3b_ref[:, 0:1], 0.0)
        y = (y * p3b_ref[:, 1:2] + p3b_ref[:, 2:3]) * mask3_ref[...]
        b3a[0:10, g3["m"]:g3["m"] + g3["P"]] = y                        # (10, P3)

        # ---- MaxPool(2,2) + GAP + log_softmax --------------------------------
        win = window_max(b3a, 10, g3)                                   # (10, P3)
        gap = jnp.dot(win, gapsel_ref[...],
                      preferred_element_type=jnp.float32)               # (10, N)
        z = gap - jnp.max(gap, axis=0, keepdims=True)
        lse = jnp.log(jnp.sum(jnp.exp(z), axis=0, keepdims=True))
        out_ref[...] = z - lse                                          # (10, N)

    return kernel


# ----------------------------------------------------------------------------
# Wrapper: builds constants, the pallas_call, and the host-side input prep.
# ----------------------------------------------------------------------------
def build_model(params, n_batch):
    g1 = stage_geom(16, 16, n_batch)
    g2 = stage_geom(8, 8, n_batch)
    g3 = stage_geom(4, 4, n_batch)

    consts = [
        build_interior_mask(g1, n_batch),
        build_interior_mask(g2, n_batch),
        build_interior_mask(g3, n_batch),
        build_pool_select(g1, g2, n_batch),
        build_pool_select(g2, g3, n_batch),
        build_pool_gap_select(g3, n_batch),
    ]
    flat_w = []
    for lp in params:
        flat_w.extend([lp["w"], lp["p"]])

    n_inputs = 1 + len(flat_w) + len(consts)
    fused = pl.pallas_call(
        make_fused_kernel(g1, g2, g3),
        out_shape=jax.ShapeDtypeStruct((10, n_batch), jnp.float32),
        in_specs=[pl.BlockSpec(memory_space=pltpu.MemorySpace.VMEM)] * n_inputs,
        out_specs=pl.BlockSpec(memory_space=pltpu.MemorySpace.VMEM),
        scratch_shapes=[
            pltpu.VMEM((8, g1["Pm"]), jnp.float32),
            pltpu.VMEM((8, g1["Pm"]), jnp.float32),
            pltpu.VMEM((16, g2["Pm"]), jnp.float32),
            pltpu.VMEM((16, g2["Pm"]), jnp.float32),
            pltpu.VMEM((16, g3["Pm"]), jnp.float32),
            pltpu.VMEM((16, g3["Pm"]), jnp.float32),
        ],
        cost_estimate=pl.CostEstimate(flops=5_200_000, transcendentals=32,
                                      bytes_accessed=650_000),
    )

    def forward(x_nchw):
        # One-time input formatting: NCHW -> zero-padded flat (1, Pm1) slab.
        x = x_nchw.astype(jnp.float32)
        xp = jnp.pad(x, ((0, 0), (0, 0), (1, 1), (1, 1)))
        x_flat = jnp.transpose(xp, (1, 0, 2, 3)).reshape(1, g1["P"])
        x_flat = jnp.pad(x_flat, ((0, 0), (g1["m"], g1["m"])))
        logits = fused(x_flat, *flat_w, *consts)                 # (10, N)
        return logits.T                                          # (N, 10)

    return forward


# ----------------------------------------------------------------------------
# Deterministic parameters (eval-mode BN folded into scale/shift)
# ----------------------------------------------------------------------------
def init_params(key):
    params = []
    for cin, cout, k in CONV_PLAN:
        key, k1, k2, k3, k4, k5, k6 = jax.random.split(key, 7)
        fan_in = cin * k * k
        w = jax.random.normal(k1, (cout, cin, k, k), jnp.float32) / np.sqrt(fan_in)
        b = 0.1 * jax.random.normal(k2, (cout,), jnp.float32)
        gamma = 1.0 + 0.1 * jax.random.normal(k3, (cout,), jnp.float32)
        beta = 0.1 * jax.random.normal(k4, (cout,), jnp.float32)
        mu = 0.1 * jax.random.normal(k5, (cout,), jnp.float32)
        var = 1.0 + 0.1 * jnp.abs(jax.random.normal(k6, (cout,), jnp.float32))
        scale = gamma / jnp.sqrt(var + BN_EPS)   # fold eval BN: y = x*scale + shift
        shift = beta - mu * scale
        if k == 3:
            w_taps = jnp.transpose(w, (2, 3, 0, 1)).reshape(9, cout, cin)
        else:
            w_taps = w.reshape(cout, cin)
        params.append(dict(
            w=w_taps,                                   # kernel layout
            p=jnp.stack([b, scale, shift], axis=1),     # (cout, 3)
            w_conv=w, b=b, scale=scale, shift=shift,    # for the pure-JAX reference
        ))
    return params


# ----------------------------------------------------------------------------
# Pure-JAX reference (same folded parameters) for a correctness check
# ----------------------------------------------------------------------------
def reference_forward(x, params):
    def conv_relu_bn(x, lp):
        w = lp["w_conv"]
        pad = (w.shape[2] - 1) // 2
        y = lax.conv_general_dilated(
            x, w, window_strides=(1, 1), padding=((pad, pad), (pad, pad)),
            dimension_numbers=("NCHW", "OIHW", "NCHW"),
            precision=lax.Precision.HIGHEST)
        y = jnp.maximum(y + lp["b"][None, :, None, None], 0.0)
        return y * lp["scale"][None, :, None, None] + lp["shift"][None, :, None, None]

    def maxpool(x):
        return lax.reduce_window(x, -jnp.inf, lax.max,
                                 (1, 1, 2, 2), (1, 1, 2, 2), "VALID")

    x = x.astype(jnp.float32)
    x = maxpool(conv_relu_bn(conv_relu_bn(x, params[0]), params[1]))
    x = maxpool(conv_relu_bn(conv_relu_bn(x, params[2]), params[3]))
    x = maxpool(conv_relu_bn(conv_relu_bn(x, params[4]), params[5]))
    g = jnp.mean(x, axis=(2, 3))
    return jax.nn.log_softmax(g, axis=-1)


# ----------------------------------------------------------------------------
if __name__ == "__main__":
    key = jax.random.PRNGKey(0)
    pkey, xkey = jax.random.split(key)
    params = init_params(pkey)

    # NCHW input like the PyTorch module: batch=2, 1 channel, 16x16 spatial.
    x = jax.random.normal(xkey, (2, 1, 16, 16), jnp.float32)

    forward = jax.jit(build_model(params, n_batch=x.shape[0]))
    out = jax.block_until_ready(forward(x))

    assert out.shape == (2, 10), out.shape
    # log_softmax sanity: probabilities sum to 1 per row.
    assert jnp.allclose(jnp.sum(jnp.exp(out), axis=1), 1.0, atol=1e-4)
    # Full numerical check against a pure-JAX reference of the same network.
    ref = reference_forward(x, params)
    assert jnp.allclose(out, ref, atol=2e-3, rtol=2e-3), \
        float(jnp.max(jnp.abs(out - ref)))

    print("KERNEL_OK")
</pallas_src>

<mosaic_0001>
module attributes {stable_mosaic.version = 11 : i64} {
  func.func @kernel(%arg0: memref<1x904xf32, #tpu.memory_space<vmem>>, %arg1: memref<9x8x1xf32, #tpu.memory_space<vmem>>, %arg2: memref<8x3xf32, #tpu.memory_space<vmem>>, %arg3: memref<9x8x8xf32, #tpu.memory_space<vmem>>, %arg4: memref<8x3xf32, #tpu.memory_space<vmem>>, %arg5: memref<9x16x8xf32, #tpu.memory_space<vmem>>, %arg6: memref<16x3xf32, #tpu.memory_space<vmem>>, %arg7: memref<9x16x16xf32, #tpu.memory_space<vmem>>, %arg8: memref<16x3xf32, #tpu.memory_space<vmem>>, %arg9: memref<9x16x16xf32, #tpu.memory_space<vmem>>, %arg10: memref<16x3xf32, #tpu.memory_space<vmem>>, %arg11: memref<10x16xf32, #tpu.memory_space<vmem>>, %arg12: memref<10x3xf32, #tpu.memory_space<vmem>>, %arg13: memref<1x648xf32, #tpu.memory_space<vmem>>, %arg14: memref<1x200xf32, #tpu.memory_space<vmem>>, %arg15: memref<1x72xf32, #tpu.memory_space<vmem>>, %arg16: memref<648x200xf32, #tpu.memory_space<vmem>>, %arg17: memref<200x72xf32, #tpu.memory_space<vmem>>, %arg18: memref<72x2xf32, #tpu.memory_space<vmem>>, %arg19: memref<10x2xf32, #tpu.memory_space<vmem>>, %arg20: memref<8x904xf32, #tpu.memory_space<vmem>>, %arg21: memref<8x904xf32, #tpu.memory_space<vmem>>, %arg22: memref<16x456xf32, #tpu.memory_space<vmem>>, %arg23: memref<16x456xf32, #tpu.memory_space<vmem>>, %arg24: memref<16x328xf32, #tpu.memory_space<vmem>>, %arg25: memref<16x328xf32, #tpu.memory_space<vmem>>) attributes {dimension_semantics = [], scalar_prefetch = 0 : i64, scratch_operands = 6 : i64, tpu.core_type = #tpu.core_type<tc>} {
    %cst = arith.constant 0.000000e+00 : f32
    %0 = vector.broadcast %cst : f32 to vector<8x904xf32>
    %c0 = arith.constant 0 : index
    %c0_0 = arith.constant 0 : index
    %1 = vector.load %arg20[%c0, %c0_0] : memref<8x904xf32, #tpu.memory_space<vmem>>, vector<8x904xf32>
    tpu.vector_store %arg20[%c0, %c0_0], %0 {strides = array<i32>} : memref<8x904xf32, #tpu.memory_space<vmem>>, vector<8x904xf32>,
    %cst_1 = arith.constant 0.000000e+00 : f32
    %2 = vector.broadcast %cst_1 : f32 to vector<8x904xf32>
    %c0_2 = arith.constant 0 : index
    %c0_3 = arith.constant 0 : index
    %3 = vector.load %arg21[%c0_2, %c0_3] : memref<8x904xf32, #tpu.memory_space<vmem>>, vector<8x904xf32>
    tpu.vector_store %arg21[%c0_2, %c0_3], %2 {strides = array<i32>} : memref<8x904xf32, #tpu.memory_space<vmem>>, vector<8x904xf32>,
    %cst_4 = arith.constant 0.000000e+00 : f32
    %4 = vector.broadcast %cst_4 : f32 to vector<16x456xf32>
    %c0_5 = arith.constant 0 : index
    %c0_6 = arith.constant 0 : index
    %5 = vector.load %arg22[%c0_5, %c0_6] : memref<16x456xf32, #tpu.memory_space<vmem>>, vector<16x456xf32>
    tpu.vector_store %arg22[%c0_5, %c0_6], %4 {strides = array<i32>} : memref<16x456xf32, #tpu.memory_space<vmem>>, vector<16x456xf32>,
    %cst_7 = arith.constant 0.000000e+00 : f32
    %6 = vector.broadcast %cst_7 : f32 to vector<16x456xf32>
    %c0_8 = arith.constant 0 : index
    %c0_9 = arith.constant 0 : index
    %7 = vector.load %arg23[%c0_8, %c0_9] : memref<16x456xf32, #tpu.memory_space<vmem>>, vector<16x456xf32>
    tpu.vector_store %arg23[%c0_8, %c0_9], %6 {strides = array<i32>} : memref<16x456xf32, #tpu.memory_space<vmem>>, vector<16x456xf32>,
    %cst_10 = arith.constant 0.000000e+00 : f32
    %8 = vector.broadcast %cst_10 : f32 to vector<16x328xf32>
    %c0_11 = arith.constant 0 : index
    %c0_12 = arith.constant 0 : index
    %9 = vector.load %arg24[%c0_11, %c0_12] : memref<16x328xf32, #tpu.memory_space<vmem>>, vector<16x328xf32>
    tpu.vector_store %arg24[%c0_11, %c0_12], %8 {strides = array<i32>} : memref<16x328xf32, #tpu.memory_space<vmem>>, vector<16x328xf32>,
    %cst_13 = arith.constant 0.000000e+00 : f32
    %10 = vector.broadcast %cst_13 : f32 to vector<16x328xf32>
    %c0_14 = arith.constant 0 : index
    %c0_15 = arith.constant 0 : index
    %11 = vector.load %arg25[%c0_14, %c0_15] : memref<16x328xf32, #tpu.memory_space<vmem>>, vector<16x328xf32>
    tpu.vector_store %arg25[%c0_14, %c0_15], %10 {strides = array<i32>} : memref<16x328xf32, #tpu.memory_space<vmem>>, vector<16x328xf32>,
    %c0_16 = arith.constant 0 : index
    %c109 = arith.constant 109 : index
    %12 = vector.load %arg0[%c0_16, %c109] : memref<1x904xf32, #tpu.memory_space<vmem>>, vector<1x648xf32>
    %c0_17 = arith.constant 0 : index
    %c0_18 = arith.constant 0 : index
    %c0_19 = arith.constant 0 : index
    %13 = vector.load %arg1[%c0_17, %c0_18, %c0_19] : memref<9x8x1xf32, #tpu.memory_space<vmem>>, vector<1x8x1xf32>
    %14 = vector.shape_cast %13 : vector<1x8x1xf32> to vector<8x1xf32>
    %15 = vector.broadcast %14 : vector<8x1xf32> to vector<8x648xf32>
    %16 = vector.broadcast %12 : vector<1x648xf32> to vector<8x648xf32>
    %17 = arith.mulf %15, %16 : vector<8x648xf32>
    %c0_20 = arith.constant 0 : index
    %c110 = arith.constant 110 : index
    %18 = vector.load %arg0[%c0_20, %c110] : memref<1x904xf32, #tpu.memory_space<vmem>>, vector<1x648xf32>
    %c1 = arith.constant 1 : index
    %c0_21 = arith.constant 0 : index
    %c0_22 = arith.constant 0 : index
    %19 = vector.load %arg1[%c1, %c0_21, %c0_22] : memref<9x8x1xf32, #tpu.memory_space<vmem>>, vector<1x8x1xf32>
    %20 = vector.shape_cast %19 : vector<1x8x1xf32> to vector<8x1xf32>
    %21 = vector.broadcast %20 : vector<8x1xf32> to vector<8x648xf32>
    %22 = vector.broadcast %18 : vector<1x648xf32> to vector<8x648xf32>
    %23 = arith.mulf %21, %22 : vector<8x648xf32>
    %24 = arith.addf %17, %23 : vector<8x648xf32>
    %c0_23 = arith.constant 0 : index
    %c111 = arith.constant 111 : index
    %25 = vector.load %arg0[%c0_23, %c111] : memref<1x904xf32, #tpu.memory_space<vmem>>, vector<1x648xf32>
    %c2 = arith.constant 2 : index
    %c0_24 = arith.constant 0 : index
    %c0_25 = arith.constant 0 : index
    %26 = vector.load %arg1[%c2, %c0_24, %c0_25] : memref<9x8x1xf32, #tpu.memory_space<vmem>>, vector<1x8x1xf32>
    %27 = vector.shape_cast %26 : vector<1x8x1xf32> to vector<8x1xf32>
    %28 = vector.broadcast %27 : vector<8x1xf32> to vector<8x648xf32>
    %29 = vector.broadcast %25 : vector<1x648xf32> to vector<8x648xf32>
    %30 = arith.mulf %28, %29 : vector<8x648xf32>
    %31 = arith.addf %24, %30 : vector<8x648xf32>
    %c0_26 = arith.constant 0 : index
    %c127 = arith.constant 127 : index
    %32 = vector.load %arg0[%c0_26, %c127] : memref<1x904xf32, #tpu.memory_space<vmem>>, vector<1x648xf32>
    %c3 = arith.constant 3 : index
    %c0_27 = arith.constant 0 : index
    %c0_28 = arith.constant 0 : index
    %33 = vector.load %arg1[%c3, %c0_27, %c0_28] : memref<9x8x1xf32, #tpu.memory_space<vmem>>, vector<1x8x1xf32>
    %34 = vector.shape_cast %33 : vector<1x8x1xf32> to vector<8x1xf32>
    %35 = vector.broadcast %34 : vector<8x1xf32> to vector<8x648xf32>
    %36 = vector.broadcast %32 : vector<1x648xf32> to vector<8x648xf32>
    %37 = arith.mulf %35, %36 : vector<8x648xf32>
    %38 = arith.addf %31, %37 : vector<8x648xf32>
    %c0_29 = arith.constant 0 : index
    %c128 = arith.constant 128 : index
    %39 = vector.load %arg0[%c0_29, %c128] : memref<1x904xf32, #tpu.memory_space<vmem>>, vector<1x648xf32>
    %c4 = arith.constant 4 : index
    %c0_30 = arith.constant 0 : index
    %c0_31 = arith.constant 0 : index
    %40 = vector.load %arg1[%c4, %c0_30, %c0_31] : memref<9x8x1xf32, #tpu.memory_space<vmem>>, vector<1x8x1xf32>
    %41 = vector.shape_cast %40 : vector<1x8x1xf32> to vector<8x1xf32>
    %42 = vector.broadcast %41 : vector<8x1xf32> to vector<8x648xf32>
    %43 = vector.broadcast %39 : vector<1x648xf32> to vector<8x648xf32>
    %44 = arith.mulf %42, %43 : vector<8x648xf32>
    %45 = arith.addf %38, %44 : vector<8x648xf32>
    %c0_32 = arith.constant 0 : index
    %c129 = arith.constant 129 : index
    %46 = vector.load %arg0[%c0_32, %c129] : memref<1x904xf32, #tpu.memory_space<vmem>>, vector<1x648xf32>
    %c5 = arith.constant 5 : index
    %c0_33 = arith.constant 0 : index
    %c0_34 = arith.constant 0 : index
    %47 = vector.load %arg1[%c5, %c0_33, %c0_34] : memref<9x8x1xf32, #tpu.memory_space<vmem>>, vector<1x8x1xf32>
    %48 = vector.shape_cast %47 : vector<1x8x1xf32> to vector<8x1xf32>
    %49 = vector.broadcast %48 : vector<8x1xf32> to vector<8x648xf32>
    %50 = vector.broadcast %46 : vector<1x648xf32> to vector<8x648xf32>
    %51 = arith.mulf %49, %50 : vector<8x648xf32>
    %52 = arith.addf %45, %51 : vector<8x648xf32>
    %c0_35 = arith.constant 0 : index
    %c145 = arith.constant 145 : index
    %53 = vector.load %arg0[%c0_35, %c145] : memref<1x904xf32, #tpu.memory_space<vmem>>, vector<1x648xf32>
    %c6 = arith.constant 6 : index
    %c0_36 = arith.constant 0 : index
    %c0_37 = arith.constant 0 : index
    %54 = vector.load %arg1[%c6, %c0_36, %c0_37] : memref<9x8x1xf32, #tpu.memory_space<vmem>>, vector<1x8x1xf32>
    %55 = vector.shape_cast %54 : vector<1x8x1xf32> to vector<8x1xf32>
    %56 = vector.broadcast %55 : vector<8x1xf32> to vector<8x648xf32>
    %57 = vector.broadcast %53 : vector<1x648xf32> to vector<8x648xf32>
    %58 = arith.mulf %56, %57 : vector<8x648xf32>
    %59 = arith.addf %52, %58 : vector<8x648xf32>
    %c0_38 = arith.constant 0 : index
    %c146 = arith.constant 146 : index
    %60 = vector.load %arg0[%c0_38, %c146] : memref<1x904xf32, #tpu.memory_space<vmem>>, vector<1x648xf32>
    %c7 = arith.constant 7 : index
    %c0_39 = arith.constant 0 : index
    %c0_40 = arith.constant 0 : index
    %61 = vector.load %arg1[%c7, %c0_39, %c0_40] : memref<9x8x1xf32, #tpu.memory_space<vmem>>, vector<1x8x1xf32>
    %62 = vector.shape_cast %61 : vector<1x8x1xf32> to vector<8x1xf32>
    %63 = vector.broadcast %62 : vector<8x1xf32> to vector<8x648xf32>
    %64 = vector.broadcast %60 : vector<1x648xf32> to vector<8x648xf32>
    %65 = arith.mulf %63, %64 : vector<8x648xf32>
    %66 = arith.addf %59, %65 : vector<8x648xf32>
    %c0_41 = arith.constant 0 : index
    %c147 = arith.constant 147 : index
    %67 = vector.load %arg0[%c0_41, %c147] : memref<1x904xf32, #tpu.memory_space<vmem>>, vector<1x648xf32>
    %c8 = arith.constant 8 : index
    %c0_42 = arith.constant 0 : index
    %c0_43 = arith.constant 0 : index
    %68 = vector.load %arg1[%c8, %c0_42, %c0_43] : memref<9x8x1xf32, #tpu.memory_space<vmem>>, vector<1x8x1xf32>
    %69 = vector.shape_cast %68 : vector<1x8x1xf32> to vector<8x1xf32>
    %70 = vector.broadcast %69 : vector<8x1xf32> to vector<8x648xf32>
    %71 = vector.broadcast %67 : vector<1x648xf32> to vector<8x648xf32>
    %72 = arith.mulf %70, %71 : vector<8x648xf32>
    %73 = arith.addf %66, %72 : vector<8x648xf32>
    %c0_44 = arith.constant 0 : index
    %c0_45 = arith.constant 0 : index
    %74 = vector.load %arg2[%c0_44, %c0_45] : memref<8x3xf32, #tpu.memory_space<vmem>>, vector<8x1xf32>
    %75 = vector.broadcast %74 : vector<8x1xf32> to vector<8x648xf32>
    %76 = arith.addf %73, %75 : vector<8x648xf32>
    %cst_46 = arith.constant 0.000000e+00 : f32
    %77 = vector.broadcast %cst_46 : f32 to vector<8x648xf32>
    %78 = arith.maximumf %76, %77 : vector<8x648xf32>
    %c0_47 = arith.constant 0 : index
    %c1_48 = arith.constant 1 : index
    %79 = vector.load %arg2[%c0_47, %c1_48] : memref<8x3xf32, #tpu.memory_space<vmem>>, vector<8x1xf32>
    %80 = vector.broadcast %79 : vector<8x1xf32> to vector<8x648xf32>
    %81 = arith.mulf %78, %80 : vector<8x648xf32>
    %c0_49 = arith.constant 0 : index
    %c2_50 = arith.constant 2 : index
    %82 = vector.load %arg2[%c0_49, %c2_50] : memref<8x3xf32, #tpu.memory_space<vmem>>, vector<8x1xf32>
    %83 = vector.broadcast %82 : vector<8x1xf32> to vector<8x648xf32>
    %84 = arith.addf %81, %83 : vector<8x648xf32>
    %c0_51 = arith.constant 0 : index
    %c0_52 = arith.constant 0 : index
    %85 = vector.load %arg13[%c0_51, %c0_52] : memref<1x648xf32, #tpu.memory_space<vmem>>, vector<1x648xf32>
    %86 = vector.broadcast %85 : vector<1x648xf32> to vector<8x648xf32>
    %87 = arith.mulf %84, %86 : vector<8x648xf32>
    %c0_53 = arith.constant 0 : index
    %c128_54 = arith.constant 128 : index
    %88 = vector.load %arg20[%c0_53, %c128_54] : memref<8x904xf32, #tpu.memory_space<vmem>>, vector<8x648xf32>
    tpu.vector_store %arg20[%c0_53, %c128_54], %87 {strides = array<i32>} : memref<8x904xf32, #tpu.memory_space<vmem>>, vector<8x648xf32>,
    %c0_55 = arith.constant 0 : index
    %c109_56 = arith.constant 109 : index
    %89 = vector.load %arg20[%c0_55, %c109_56] : memref<8x904xf32, #tpu.memory_space<vmem>>, vector<8x648xf32>
    %c0_57 = arith.constant 0 : index
    %c0_58 = arith.constant 0 : index
    %c0_59 = arith.constant 0 : index
    %90 = vector.load %arg3[%c0_57, %c0_58, %c0_59] : memref<9x8x8xf32, #tpu.memory_space<vmem>>, vector<1x8x8xf32>
    %91 = vector.shape_cast %90 : vector<1x8x8xf32> to vector<8x8xf32>
    %cst_60 = arith.constant dense<0.000000e+00> : vector<8x648xf32>
    %92 = tpu.matmul %91, %89, %cst_60 {dimension_numbers = #tpu.dot_dimension_numbers<[1], [0], [0], [1], [0, 0, 1, 1], [], []>} : vector<8x8xf32>, vector<8x648xf32>, vector<8x648xf32> -> vector<8x648xf32>
    %c0_61 = arith.constant 0 : index
    %c110_62 = arith.constant 110 : index
    %93 = vector.load %arg20[%c0_61, %c110_62] : memref<8x904xf32, #tpu.memory_space<vmem>>, vector<8x648xf32>
    %c1_63 = arith.constant 1 : index
    %c0_64 = arith.constant 0 : index
    %c0_65 = arith.constant 0 : index
    %94 = vector.load %arg3[%c1_63, %c0_64, %c0_65] : memref<9x8x8xf32, #tpu.memory_space<vmem>>, vector<1x8x8xf32>
    %95 = vector.shape_cast %94 : vector<1x8x8xf32> to vector<8x8xf32>
    %cst_66 = arith.constant dense<0.000000e+00> : vector<8x648xf32>
    %96 = tpu.matmul %95, %93, %cst_66 {dimension_numbers = #tpu.dot_dimension_numbers<[1], [0], [0], [1], [0, 0, 1, 1], [], []>} : vector<8x8xf32>, vector<8x648xf32>, vector<8x648xf32> -> vector<8x648xf32>
    %97 = arith.addf %92, %96 : vector<8x648xf32>
    %c0_67 = arith.constant 0 : index
    %c111_68 = arith.constant 111 : index
    %98 = vector.load %arg20[%c0_67, %c111_68] : memref<8x904xf32, #tpu.memory_space<vmem>>, vector<8x648xf32>
    %c2_69 = arith.constant 2 : index
    %c0_70 = arith.constant 0 : index
    %c0_71 = arith.constant 0 : index
    %99 = vector.load %arg3[%c2_69, %c0_70, %c0_71] : memref<9x8x8xf32, #tpu.memory_space<vmem>>, vector<1x8x8xf32>
    %100 = vector.shape_cast %99 : vector<1x8x8xf32> to vector<8x8xf32>
    %cst_72 = arith.constant dense<0.000000e+00> : vector<8x648xf32>
    %101 = tpu.matmul %100, %98, %cst_72 {dimension_numbers = #tpu.dot_dimension_numbers<[1], [0], [0], [1], [0, 0, 1, 1], [], []>} : vector<8x8xf32>, vector<8x648xf32>, vector<8x648xf32> -> vector<8x648xf32>
    %102 = arith.addf %97, %101 : vector<8x648xf32>
    %c0_73 = arith.constant 0 : index
    %c127_74 = arith.constant 127 : index
    %103 = vector.load %arg20[%c0_73, %c127_74] : memref<8x904xf32, #tpu.memory_space<vmem>>, vector<8x648xf32>
    %c3_75 = arith.constant 3 : index
    %c0_76 = arith.constant 0 : index
    %c0_77 = arith.constant 0 : index
    %104 = vector.load %arg3[%c3_75, %c0_76, %c0_77] : memref<9x8x8xf32, #tpu.memory_space<vmem>>, vector<1x8x8xf32>
    %105 = vector.shape_cast %104 : vector<1x8x8xf32> to vector<8x8xf32>
    %cst_78 = arith.constant dense<0.000000e+00> : vector<8x648xf32>
    %106 = tpu.matmul %105, %103, %cst_78 {dimension_numbers = #tpu.dot_dimension_numbers<[1], [0], [0], [1], [0, 0, 1, 1], [], []>} : vector<8x8xf32>, vector<8x648xf32>, vector<8x648xf32> -> vector<8x648xf32>
    %107 = arith.addf %102, %106 : vector<8x648xf32>
    %c0_79 = arith.constant 0 : index
    %c128_80 = arith.constant 128 : index
    %108 = vector.load %arg20[%c0_79, %c128_80] : memref<8x904xf32, #tpu.memory_space<vmem>>, vector<8x648xf32>
    %c4_81 = arith.constant 4 : index
    %c0_82 = arith.constant 0 : index
    %c0_83 = arith.constant 0 : index
    %109 = vector.load %arg3[%c4_81, %c0_82, %c0_83] : memref<9x8x8xf32, #tpu.memory_space<vmem>>, vector<1x8x8xf32>
    %110 = vector.shape_cast %109 : vector<1x8x8xf32> to vector<8x8xf32>
    %cst_84 = arith.constant dense<0.000000e+00> : vector<8x648xf32>
    %111 = tpu.matmul %110, %108, %cst_84 {dimension_numbers = #tpu.dot_dimension_numbers<[1], [0], [0], [1], [0, 0, 1, 1], [], []>} : vector<8x8xf32>, vector<8x648xf32>, vector<8x648xf32> -> vector<8x648xf32>
    %112 = arith.addf %107, %111 : vector<8x648xf32>
    %c0_85 = arith.constant 0 : index
    %c129_86 = arith.constant 129 : index
    %113 = vector.load %arg20[%c0_85, %c129_86] : memref<8x904xf32, #tpu.memory_space<vmem>>, vector<8x648xf32>
    %c5_87 = arith.constant 5 : index
    %c0_88 = arith.constant 0 : index
    %c0_89 = arith.constant 0 : index
    %114 = vector.load %arg3[%c5_87, %c0_88, %c0_89] : memref<9x8x8xf32, #tpu.memory_space<vmem>>, vector<1x8x8xf32>
    %115 = vector.shape_cast %114 : vector<1x8x8xf32> to vector<8x8xf32>
    %cst_90 = arith.constant dense<0.000000e+00> : vector<8x648xf32>
    %116 = tpu.matmul %115, %113, %cst_90 {dimension_numbers = #tpu.dot_dimension_numbers<[1], [0], [0], [1], [0, 0, 1, 1], [], []>} : vector<8x8xf32>, vector<8x648xf32>, vector<8x648xf32> -> vector<8x648xf32>
    %117 = arith.addf %112, %116 : vector<8x648xf32>
    %c0_91 = arith.constant 0 : index
    %c145_92 = arith.constant 145 : index
    %118 = vector.load %arg20[%c0_91, %c145_92] : memref<8x904xf32, #tpu.memory_space<vmem>>, vector<8x648xf32>
    %c6_93 = arith.constant 6 : index
    %c0_94 = arith.constant 0 : index
    %c0_95 = arith.constant 0 : index
    %119 = vector.load %arg3[%c6_93, %c0_94, %c0_95] : memref<9x8x8xf32, #tpu.memory_space<vmem>>, vector<1x8x8xf32>
    %120 = vector.shape_cast %119 : vector<1x8x8xf32> to vector<8x8xf32>
    %cst_96 = arith.constant dense<0.000000e+00> : vector<8x648xf32>
    %121 = tpu.matmul %120, %118, %cst_96 {dimension_numbers = #tpu.dot_dimension_numbers<[1], [0], [0], [1], [0, 0, 1, 1], [], []>} : vector<8x8xf32>, vector<8x648xf32>, vector<8x648xf32> -> vector<8x648xf32>
    %122 = arith.addf %117, %121 : vector<8x648xf32>
    %c0_97 = arith.constant 0 : index
    %c146_98 = arith.constant 146 : index
    %123 = vector.load %arg20[%c0_97, %c146_98] : memref<8x904xf32, #tpu.memory_space<vmem>>, vector<8x648xf32>
    %c7_99 = arith.constant 7 : index
    %c0_100 = arith.constant 0 : index
    %c0_101 = arith.constant 0 : index
    %124 = vector.load %arg3[%c7_99, %c0_100, %c0_101] : memref<9x8x8xf32, #tpu.memory_space<vmem>>, vector<1x8x8xf32>
    %125 = vector.shape_cast %124 : vector<1x8x8xf32> to vector<8x8xf32>
    %cst_102 = arith.constant dense<0.000000e+00> : vector<8x648xf32>
    %126 = tpu.matmul %125, %123, %cst_102 {dimension_numbers = #tpu.dot_dimension_numbers<[1], [0], [0], [1], [0, 0, 1, 1], [], []>} : vector<8x8xf32>, vector<8x648xf32>, vector<8x648xf32> -> vector<8x648xf32>
    %127 = arith.addf %122, %126 : vector<8x648xf32>
    %c0_103 = arith.constant 0 : index
    %c147_104 = arith.constant 147 : index
    %128 = vector.load %arg20[%c0_103, %c147_104] : memref<8x904xf32, #tpu.memory_space<vmem>>, vector<8x648xf32>
    %c8_105 = arith.constant 8 : index
    %c0_106 = arith.constant 0 : index
    %c0_107 = arith.constant 0 : index
    %129 = vector.load %arg3[%c8_105, %c0_106, %c0_107] : memref<9x8x8xf32, #tpu.memory_space<vmem>>, vector<1x8x8xf32>
    %130 = vector.shape_cast %129 : vector<1x8x8xf32> to vector<8x8xf32>
    %cst_108 = arith.constant dense<0.000000e+00> : vector<8x648xf32>
    %131 = tpu.matmul %130, %128, %cst_108 {dimension_numbers = #tpu.dot_dimension_numbers<[1], [0], [0], [1], [0, 0, 1, 1], [], []>} : vector<8x8xf32>, vector<8x648xf32>, vector<8x648xf32> -> vector<8x648xf32>
    %132 = arith.addf %127, %131 : vector<8x648xf32>
    %c0_109 = arith.constant 0 : index
    %c0_110 = arith.constant 0 : index
    %133 = vector.load %arg4[%c0_109, %c0_110] : memref<8x3xf32, #tpu.memory_space<vmem>>, vector<8x1xf32>
    %134 = vector.broadcast %133 : vector<8x1xf32> to vector<8x648xf32>
    %135 = arith.addf %132, %134 : vector<8x648xf32>
    %cst_111 = arith.constant 0.000000e+00 : f32
    %136 = vector.broadcast %cst_111 : f32 to vector<8x648xf32>
    %137 = arith.maximumf %135, %136 : vector<8x648xf32>
    %c0_112 = arith.constant 0 : index
    %c1_113 = arith.constant 1 : index
    %138 = vector.load %arg4[%c0_112, %c1_113] : memref<8x3xf32, #tpu.memory_space<vmem>>, vector<8x1xf32>
    %139 = vector.broadcast %138 : vector<8x1xf32> to vector<8x648xf32>
    %140 = arith.mulf %137, %139 : vector<8x648xf32>
    %c0_114 = arith.constant 0 : index
    %c2_115 = arith.constant 2 : index
    %141 = vector.load %arg4[%c0_114, %c2_115] : memref<8x3xf32, #tpu.memory_space<vmem>>, vector<8x1xf32>
    %142 = vector.broadcast %141 : vector<8x1xf32> to vector<8x648xf32>
    %143 = arith.addf %140, %142 : vector<8x648xf32>
    %c0_116 = arith.constant 0 : index
    %c0_117 = arith.constant 0 : index
    %144 = vector.load %arg13[%c0_116, %c0_117] : memref<1x648xf32, #tpu.memory_space<vmem>>, vector<1x648xf32>
    %145 = vector.broadcast %144 : vector<1x648xf32> to vector<8x648xf32>
    %146 = arith.mulf %143, %145 : vector<8x648xf32>
    %c0_118 = arith.constant 0 : index
    %c128_119 = arith.constant 128 : index
    %147 = vector.load %arg21[%c0_118, %c128_119] : memref<8x904xf32, #tpu.memory_space<vmem>>, vector<8x648xf32>
    tpu.vector_store %arg21[%c0_118, %c128_119], %146 {strides = array<i32>} : memref<8x904xf32, #tpu.memory_space<vmem>>, vector<8x648xf32>,
    %c0_120 = arith.constant 0 : index
    %c128_121 = arith.constant 128 : index
    %148 = vector.load %arg21[%c0_120, %c128_121] : memref<8x904xf32, #tpu.memory_space<vmem>>, vector<8x648xf32>
    %c0_122 = arith.constant 0 : index
    %c129_123 = arith.constant 129 : index
    %149 = vector.load %arg21[%c0_122, %c129_123] : memref<8x904xf32, #tpu.memory_space<vmem>>, vector<8x648xf32>
    %c0_124 = arith.constant 0 : index
    %c146_125 = arith.constant 146 : index
    %150 = vector.load %arg21[%c0_124, %c146_125] : memref<8x904xf32, #tpu.memory_space<vmem>>, vector<8x648xf32>
    %c0_126 = arith.constant 0 : index
    %c147_127 = arith.constant 147 : index
    %151 = vector.load %arg21[%c0_126, %c147_127] : memref<8x904xf32, #tpu.memory_space<vmem>>, vector<8x648xf32>
    %152 = arith.maximumf %148, %149 : vector<8x648xf32>
    %153 = arith.maximumf %150, %151 : vector<8x648xf32>
    %154 = arith.maximumf %152, %153 : vector<8x648xf32>
    %c0_128 = arith.constant 0 : index
    %c0_129 = arith.constant 0 : index
    %155 = vector.load %arg16[%c0_128, %c0_129] : memref<648x200xf32, #tpu.memory_space<vmem>>, vector<648x200xf32>
    %cst_130 = arith.constant dense<0.000000e+00> : vector<8x200xf32>
    %156 = tpu.matmul %154, %155, %cst_130 {dimension_numbers = #tpu.dot_dimension_numbers<[1], [0], [0], [1], [0, 0, 1, 1], [], []>} : vector<8x648xf32>, vector<648x200xf32>, vector<8x200xf32> -> vector<8x200xf32>
    %c0_131 = arith.constant 0 : index
    %c128_132 = arith.constant 128 : index
    %157 = vector.load %arg22[%c0_131, %c128_132] : memref<16x456xf32, #tpu.memory_space<vmem>>, vector<8x200xf32>
    tpu.vector_store %arg22[%c0_131, %c128_132], %156 {strides = array<i32>} : memref<16x456xf32, #tpu.memory_space<vmem>>, vector<8x200xf32>,
    %c0_133 = arith.constant 0 : index
    %c117 = arith.constant 117 : index
    %158 = vector.load %arg22[%c0_133, %c117] : memref<16x456xf32, #tpu.memory_space<vmem>>, vector<8x200xf32>
    %c0_134 = arith.constant 0 : index
    %c0_135 = arith.constant 0 : index
    %c0_136 = arith.constant 0 : index
    %159 = vector.load %arg5[%c0_134, %c0_135, %c0_136] : memref<9x16x8xf32, #tpu.memory_space<vmem>>, vector<1x16x8xf32>
    %160 = vector.shape_cast %159 : vector<1x16x8xf32> to vector<16x8xf32>
    %cst_137 = arith.constant dense<0.000000e+00> : vector<16x200xf32>
    %161 = tpu.matmul %160, %158, %cst_137 {dimension_numbers = #tpu.dot_dimension_numbers<[1], [0], [0], [1], [0, 0, 1, 1], [], []>} : vector<16x8xf32>, vector<8x200xf32>, vector<16x200xf32> -> vector<16x200xf32>
    %c0_138 = arith.constant 0 : index
    %c118 = arith.constant 118 : index
    %162 = vector.load %arg22[%c0_138, %c118] : memref<16x456xf32, #tpu.memory_space<vmem>>, vector<8x200xf32>
    %c1_139 = arith.constant 1 : index
    %c0_140 = arith.constant 0 : index
    %c0_141 = arith.constant 0 : index
    %163 = vector.load %arg5[%c1_139, %c0_140, %c0_141] : memref<9x16x8xf32, #tpu.memory_space<vmem>>, vector<1x16x8xf32>
    %164 = vector.shape_cast %163 : vector<1x16x8xf32> to vector<16x8xf32>
    %cst_142 = arith.constant dense<0.000000e+00> : vector<16x200xf32>
    %165 = tpu.matmul %164, %162, %cst_142 {dimension_numbers = #tpu.dot_dimension_numbers<[1], [0], [0], [1], [0, 0, 1, 1], [], []>} : vector<16x8xf32>, vector<8x200xf32>, vector<16x200xf32> -> vector<16x200xf32>
    %166 = arith.addf %161, %165 : vector<16x200xf32>
    %c0_143 = arith.constant 0 : index
    %c119 = arith.constant 119 : index
    %167 = vector.load %arg22[%c0_143, %c119] : memref<16x456xf32, #tpu.memory_space<vmem>>, vector<8x200xf32>
    %c2_144 = arith.constant 2 : index
    %c0_145 = arith.constant 0 : index
    %c0_146 = arith.constant 0 : index
    %168 = vector.load %arg5[%c2_144, %c0_145, %c0_146] : memref<9x16x8xf32, #tpu.memory_space<vmem>>, vector<1x16x8xf32>
    %169 = vector.shape_cast %168 : vector<1x16x8xf32> to vector<16x8xf32>
    %cst_147 = arith.constant dense<0.000000e+00> : vector<16x200xf32>
    %170 = tpu.matmul %169, %167, %cst_147 {dimension_numbers = #tpu.dot_dimension_numbers<[1], [0], [0], [1], [0, 0, 1, 1], [], []>} : vector<16x8xf32>, vector<8x200xf32>, vector<16x200xf32> -> vector<16x200xf32>
    %171 = arith.addf %166, %170 : vector<16x200xf32>
    %c0_148 = arith.constant 0 : index
    %c127_149 = arith.constant 127 : index
    %172 = vector.load %arg22[%c0_148, %c127_149] : memref<16x456xf32, #tpu.memory_space<vmem>>, vector<8x200xf32>
    %c3_150 = arith.constant 3 : index
    %c0_151 = arith.constant 0 : index
    %c0_152 = arith.constant 0 : index
    %173 = vector.load %arg5[%c3_150, %c0_151, %c0_152] : memref<9x16x8xf32, #tpu.memory_space<vmem>>, vector<1x16x8xf32>
    %174 = vector.shape_cast %173 : vector<1x16x8xf32> to vector<16x8xf32>
    %cst_153 = arith.constant dense<0.000000e+00> : vector<16x200xf32>
    %175 = tpu.matmul %174, %172, %cst_153 {dimension_numbers = #tpu.dot_dimension_numbers<[1], [0], [0], [1], [0, 0, 1, 1], [], []>} : vector<16x8xf32>, vector<8x200xf32>, vector<16x200xf32> -> vector<16x200xf32>
    %176 = arith.addf %171, %175 : vector<16x200xf32>
    %c0_154 = arith.constant 0 : index
    %c128_155 = arith.constant 128 : index
    %177 = vector.load %arg22[%c0_154, %c128_155] : memref<16x456xf32, #tpu.memory_space<vmem>>, vector<8x200xf32>
    %c4_156 = arith.constant 4 : index
    %c0_157 = arith.constant 0 : index
    %c0_158 = arith.constant 0 : index
    %178 = vector.load %arg5[%c4_156, %c0_157, %c0_158] : memref<9x16x8xf32, #tpu.memory_space<vmem>>, vector<1x16x8xf32>
    %179 = vector.shape_cast %178 : vector<1x16x8xf32> to vector<16x8xf32>
    %cst_159 = arith.constant dense<0.000000e+00> : vector<16x200xf32>
    %180 = tpu.matmul %179, %177, %cst_159 {dimension_numbers = #tpu.dot_dimension_numbers<[1], [0], [0], [1], [0, 0, 1, 1], [], []>} : vector<16x8xf32>, vector<8x200xf32>, vector<16x200xf32> -> vector<16x200xf32>
    %181 = arith.addf %176, %180 : vector<16x200xf32>
    %c0_160 = arith.constant 0 : index
    %c129_161 = arith.constant 129 : index
    %182 = vector.load %arg22[%c0_160, %c129_161] : memref<16x456xf32, #tpu.memory_space<vmem>>, vector<8x200xf32>
    %c5_162 = arith.constant 5 : index
    %c0_163 = arith.constant 0 : index
    %c0_164 = arith.constant 0 : index
    %183 = vector.load %arg5[%c5_162, %c0_163, %c0_164] : memref<9x16x8xf32, #tpu.memory_space<vmem>>, vector<1x16x8xf32>
    %184 = vector.shape_cast %183 : vector<1x16x8xf32> to vector<16x8xf32>
    %cst_165 = arith.constant dense<0.000000e+00> : vector<16x200xf32>
    %185 = tpu.matmul %184, %182, %cst_165 {dimension_numbers = #tpu.dot_dimension_numbers<[1], [0], [0], [1], [0, 0, 1, 1], [], []>} : vector<16x8xf32>, vector<8x200xf32>, vector<16x200xf32> -> vector<16x200xf32>
    %186 = arith.addf %181, %185 : vector<16x200xf32>
    %c0_166 = arith.constant 0 : index
    %c137 = arith.constant 137 : index
    %187 = vector.load %arg22[%c0_166, %c137] : memref<16x456xf32, #tpu.memory_space<vmem>>, vector<8x200xf32>
    %c6_167 = arith.constant 6 : index
    %c0_168 = arith.constant 0 : index
    %c0_169 = arith.constant 0 : index
    %188 = vector.load %arg5[%c6_167, %c0_168, %c0_169] : memref<9x16x8xf32, #tpu.memory_space<vmem>>, vector<1x16x8xf32>
    %189 = vector.shape_cast %188 : vector<1x16x8xf32> to vector<16x8xf32>
    %cst_170 = arith.constant dense<0.000000e+00> : vector<16x200xf32>
    %190 = tpu.matmul %189, %187, %cst_170 {dimension_numbers = #tpu.dot_dimension_numbers<[1], [0], [0], [1], [0, 0, 1, 1], [], []>} : vector<16x8xf32>, vector<8x200xf32>, vector<16x200xf32> -> vector<16x200xf32>
    %191 = arith.addf %186, %190 : vector<16x200xf32>
    %c0_171 = arith.constant 0 : index
    %c138 = arith.constant 138 : index
    %192 = vector.load %arg22[%c0_171, %c138] : memref<16x456xf32, #tpu.memory_space<vmem>>, vector<8x200xf32>
    %c7_172 = arith.constant 7 : index
    %c0_173 = arith.constant 0 : index
    %c0_174 = arith.constant 0 : index
    %193 = vector.load %arg5[%c7_172, %c0_173, %c0_174] : memref<9x16x8xf32, #tpu.memory_space<vmem>>, vector<1x16x8xf32>
    %194 = vector.shape_cast %193 : vector<1x16x8xf32> to vector<16x8xf32>
    %cst_175 = arith.constant dense<0.000000e+00> : vector<16x200xf32>
    %195 = tpu.matmul %194, %192, %cst_175 {dimension_numbers = #tpu.dot_dimension_numbers<[1], [0], [0], [1], [0, 0, 1, 1], [], []>} : vector<16x8xf32>, vector<8x200xf32>, vector<16x200xf32> -> vector<16x200xf32>
    %196 = arith.addf %191, %195 : vector<16x200xf32>
    %c0_176 = arith.constant 0 : index
    %c139 = arith.constant 139 : index
    %197 = vector.load %arg22[%c0_176, %c139] : memref<16x456xf32, #tpu.memory_space<vmem>>, vector<8x200xf32>
    %c8_177 = arith.constant 8 : index
    %c0_178 = arith.constant 0 : index
    %c0_179 = arith.constant 0 : index
    %198 = vector.load %arg5[%c8_177, %c0_178, %c0_179] : memref<9x16x8xf32, #tpu.memory_space<vmem>>, vector<1x16x8xf32>
    %199 = vector.shape_cast %198 : vector<1x16x8xf32> to vector<16x8xf32>
    %cst_180 = arith.constant dense<0.000000e+00> : vector<16x200xf32>
    %200 = tpu.matmul %199, %197, %cst_180 {dimension_numbers = #tpu.dot_dimension_numbers<[1], [0], [0], [1], [0, 0, 1, 1], [], []>} : vector<16x8xf32>, vector<8x200xf32>, vector<16x200xf32> -> vector<16x200xf32>
    %201 = arith.addf %196, %200 : vector<16x200xf32>
    %c0_181 = arith.constant 0 : index
    %c0_182 = arith.constant 0 : index
    %202 = vector.load %arg6[%c0_181, %c0_182] : memref<16x3xf32, #tpu.memory_space<vmem>>, vector<16x1xf32>
    %203 = vector.broadcast %202 : vector<16x1xf32> to vector<16x200xf32>
    %204 = arith.addf %201, %203 : vector<16x200xf32>
    %cst_183 = arith.constant 0.000000e+00 : f32
    %205 = vector.broadcast %cst_183 : f32 to vector<16x200xf32>
    %206 = arith.maximumf %204, %205 : vector<16x200xf32>
    %c0_184 = arith.constant 0 : index
    %c1_185 = arith.constant 1 : index
    %207 = vector.load %arg6[%c0_184, %c1_185] : memref<16x3xf32, #tpu.memory_space<vmem>>, vector<16x1xf32>
    %208 = vector.broadcast %207 : vector<16x1xf32> to vector<16x200xf32>
    %209 = arith.mulf %206, %208 : vector<16x200xf32>
    %c0_186 = arith.constant 0 : index
    %c2_187 = arith.constant 2 : index
    %210 = vector.load %arg6[%c0_186, %c2_187] : memref<16x3xf32, #tpu.memory_space<vmem>>, vector<16x1xf32>
    %211 = vector.broadcast %210 : vector<16x1xf32> to vector<16x200xf32>
    %212 = arith.addf %209, %211 : vector<16x200xf32>
    %c0_188 = arith.constant 0 : index
    %c0_189 = arith.constant 0 : index
    %213 = vector.load %arg14[%c0_188, %c0_189] : memref<1x200xf32, #tpu.memory_space<vmem>>, vector<1x200xf32>
    %214 = vector.broadcast %213 : vector<1x200xf32> to vector<16x200xf32>
    %215 = arith.mulf %212, %214 : vector<16x200xf32>
    %c0_190 = arith.constant 0 : index
    %c128_191 = arith.constant 128 : index
    %216 = vector.load %arg23[%c0_190, %c128_191] : memref<16x456xf32, #tpu.memory_space<vmem>>, vector<16x200xf32>
    tpu.vector_store %arg23[%c0_190, %c128_191], %215 {strides = array<i32>} : memref<16x456xf32, #tpu.memory_space<vmem>>, vector<16x200xf32>,
    %c0_192 = arith.constant 0 : index
    %c117_193 = arith.constant 117 : index
    %217 = vector.load %arg23[%c0_192, %c117_193] : memref<16x456xf32, #tpu.memory_space<vmem>>, vector<16x200xf32>
    %c0_194 = arith.constant 0 : index
    %c0_195 = arith.constant 0 : index
    %c0_196 = arith.constant 0 : index
    %218 = vector.load %arg7[%c0_194, %c0_195, %c0_196] : memref<9x16x16xf32, #tpu.memory_space<vmem>>, vector<1x16x16xf32>
    %219 = vector.shape_cast %218 : vector<1x16x16xf32> to vector<16x16xf32>
    %cst_197 = arith.constant dense<0.000000e+00> : vector<16x200xf32>
    %220 = tpu.matmul %219, %217, %cst_197 {dimension_numbers = #tpu.dot_dimension_numbers<[1], [0], [0], [1], [0, 0, 1, 1], [], []>} : vector<16x16xf32>, vector<16x200xf32>, vector<16x200xf32> -> vector<16x200xf32>
    %c0_198 = arith.constant 0 : index
    %c118_199 = arith.constant 118 : index
    %221 = vector.load %arg23[%c0_198, %c118_199] : memref<16x456xf32, #tpu.memory_space<vmem>>, vector<16x200xf32>
    %c1_200 = arith.constant 1 : index
    %c0_201 = arith.constant 0 : index
    %c0_202 = arith.constant 0 : index
    %222 = vector.load %arg7[%c1_200, %c0_201, %c0_202] : memref<9x16x16xf32, #tpu.memory_space<vmem>>, vector<1x16x16xf32>
    %223 = vector.shape_cast %222 : vector<1x16x16xf32> to vector<16x16xf32>
    %cst_203 = arith.constant dense<0.000000e+00> : vector<16x200xf32>
    %224 = tpu.matmul %223, %221, %cst_203 {dimension_numbers = #tpu.dot_dimension_numbers<[1], [0], [0], [1], [0, 0, 1, 1], [], []>} : vector<16x16xf32>, vector<16x200xf32>, vector<16x200xf32> -> vector<16x200xf32>
    %225 = arith.addf %220, %224 : vector<16x200xf32>
    %c0_204 = arith.constant 0 : index
    %c119_205 = arith.constant 119 : index
    %226 = vector.load %arg23[%c0_204, %c119_205] : memref<16x456xf32, #tpu.memory_space<vmem>>, vector<16x200xf32>
    %c2_206 = arith.constant 2 : index
    %c0_207 = arith.constant 0 : index
    %c0_208 = arith.constant 0 : index
    %227 = vector.load %arg7[%c2_206, %c0_207, %c0_208] : memref<9x16x16xf32, #tpu.memory_space<vmem>>, vector<1x16x16xf32>
    %228 = vector.shape_cast %227 : vector<1x16x16xf32> to vector<16x16xf32>
    %cst_209 = arith.constant dense<0.000000e+00> : vector<16x200xf32>
    %229 = tpu.matmul %228, %226, %cst_209 {dimension_numbers = #tpu.dot_dimension_numbers<[1], [0], [0], [1], [0, 0, 1, 1], [], []>} : vector<16x16xf32>, vector<16x200xf32>, vector<16x200xf32> -> vector<16x200xf32>
    %230 = arith.addf %225, %229 : vector<16x200xf32>
    %c0_210 = arith.constant 0 : index
    %c127_211 = arith.constant 127 : index
    %231 = vector.load %arg23[%c0_210, %c127_211] : memref<16x456xf32, #tpu.memory_space<vmem>>, vector<16x200xf32>
    %c3_212 = arith.constant 3 : index
    %c0_213 = arith.constant 0 : index
    %c0_214 = arith.constant 0 : index
    %232 = vector.load %arg7[%c3_212, %c0_213, %c0_214] : memref<9x16x16xf32, #tpu.memory_space<vmem>>, vector<1x16x16xf32>
    %233 = vector.shape_cast %232 : vector<1x16x16xf32> to vector<16x16xf32>
    %cst_215 = arith.constant dense<0.000000e+00> : vector<16x200xf32>
    %234 = tpu.matmul %233, %231, %cst_215 {dimension_numbers = #tpu.dot_dimension_numbers<[1], [0], [0], [1], [0, 0, 1, 1], [], []>} : vector<16x16xf32>, vector<16x200xf32>, vector<16x200xf32> -> vector<16x200xf32>
    %235 = arith.addf %230, %234 : vector<16x200xf32>
    %c0_216 = arith.constant 0 : index
    %c128_217 = arith.constant 128 : index
    %236 = vector.load %arg23[%c0_216, %c128_217] : memref<16x456xf32, #tpu.memory_space<vmem>>, vector<16x200xf32>
    %c4_218 = arith.constant 4 : index
    %c0_219 = arith.constant 0 : index
    %c0_220 = arith.constant 0 : index
    %237 = vector.load %arg7[%c4_218, %c0_219, %c0_220] : memref<9x16x16xf32, #tpu.memory_space<vmem>>, vector<1x16x16xf32>
    %238 = vector.shape_cast %237 : vector<1x16x16xf32> to vector<16x16xf32>
    %cst_221 = arith.constant dense<0.000000e+00> : vector<16x200xf32>
    %239 = tpu.matmul %238, %236, %cst_221 {dimension_numbers = #tpu.dot_dimension_numbers<[1], [0], [0], [1], [0, 0, 1, 1], [], []>} : vector<16x16xf32>, vector<16x200xf32>, vector<16x200xf32> -> vector<16x200xf32>
    %240 = arith.addf %235, %239 : vector<16x200xf32>
    %c0_222 = arith.constant 0 : index
    %c129_223 = arith.constant 129 : index
    %241 = vector.load %arg23[%c0_222, %c129_223] : memref<16x456xf32, #tpu.memory_space<vmem>>, vector<16x200xf32>
    %c5_224 = arith.constant 5 : index
    %c0_225 = arith.constant 0 : index
    %c0_226 = arith.constant 0 : index
    %242 = vector.load %arg7[%c5_224, %c0_225, %c0_226] : memref<9x16x16xf32, #tpu.memory_space<vmem>>, vector<1x16x16xf32>
    %243 = vector.shape_cast %242 : vector<1x16x16xf32> to vector<16x16xf32>
    %cst_227 = arith.constant dense<0.000000e+00> : vector<16x200xf32>
    %244 = tpu.matmul %243, %241, %cst_227 {dimension_numbers = #tpu.dot_dimension_numbers<[1], [0], [0], [1], [0, 0, 1, 1], [], []>} : vector<16x16xf32>, vector<16x200xf32>, vector<16x200xf32> -> vector<16x200xf32>
    %245 = arith.addf %240, %244 : vector<16x200xf32>
    %c0_228 = arith.constant 0 : index
    %c137_229 = arith.constant 137 : index
    %246 = vector.load %arg23[%c0_228, %c137_229] : memref<16x456xf32, #tpu.memory_space<vmem>>, vector<16x200xf32>
    %c6_230 = arith.constant 6 : index
    %c0_231 = arith.constant 0 : index
    %c0_232 = arith.constant 0 : index
    %247 = vector.load %arg7[%c6_230, %c0_231, %c0_232] : memref<9x16x16xf32, #tpu.memory_space<vmem>>, vector<1x16x16xf32>
    %248 = vector.shape_cast %247 : vector<1x16x16xf32> to vector<16x16xf32>
    %cst_233 = arith.constant dense<0.000000e+00> : vector<16x200xf32>
    %249 = tpu.matmul %248, %246, %cst_233 {dimension_numbers = #tpu.dot_dimension_numbers<[1], [0], [0], [1], [0, 0, 1, 1], [], []>} : vector<16x16xf32>, vector<16x200xf32>, vector<16x200xf32> -> vector<16x200xf32>
    %250 = arith.addf %245, %249 : vector<16x200xf32>
    %c0_234 = arith.constant 0 : index
    %c138_235 = arith.constant 138 : index
    %251 = vector.load %arg23[%c0_234, %c138_235] : memref<16x456xf32, #tpu.memory_space<vmem>>, vector<16x200xf32>
    %c7_236 = arith.constant 7 : index
    %c0_237 = arith.constant 0 : index
    %c0_238 = arith.constant 0 : index
    %252 = vector.load %arg7[%c7_236, %c0_237, %c0_238] : memref<9x16x16xf32, #tpu.memory_space<vmem>>, vector<1x16x16xf32>
    %253 = vector.shape_cast %252 : vector<1x16x16xf32> to vector<16x16xf32>
    %cst_239 = arith.constant dense<0.000000e+00> : vector<16x200xf32>
    %254 = tpu.matmul %253, %251, %cst_239 {dimension_numbers = #tpu.dot_dimension_numbers<[1], [0], [0], [1], [0, 0, 1, 1], [], []>} : vector<16x16xf32>, vector<16x200xf32>, vector<16x200xf32> -> vector<16x200xf32>
    %255 = arith.addf %250, %254 : vector<16x200xf32>
    %c0_240 = arith.constant 0 : index
    %c139_241 = arith.constant 139 : index
    %256 = vector.load %arg23[%c0_240, %c139_241] : memref<16x456xf32, #tpu.memory_space<vmem>>, vector<16x200xf32>
    %c8_242 = arith.constant 8 : index
    %c0_243 = arith.constant 0 : index
    %c0_244 = arith.constant 0 : index
    %257 = vector.load %arg7[%c8_242, %c0_243, %c0_244] : memref<9x16x16xf32, #tpu.memory_space<vmem>>, vector<1x16x16xf32>
    %258 = vector.shape_cast %257 : vector<1x16x16xf32> to vector<16x16xf32>
    %cst_245 = arith.constant dense<0.000000e+00> : vector<16x200xf32>
    %259 = tpu.matmul %258, %256, %cst_245 {dimension_numbers = #tpu.dot_dimension_numbers<[1], [0], [0], [1], [0, 0, 1, 1], [], []>} : vector<16x16xf32>, vector<16x200xf32>, vector<16x200xf32> -> vector<16x200xf32>
    %260 = arith.addf %255, %259 : vector<16x200xf32>
    %c0_246 = arith.constant 0 : index
    %c0_247 = arith.constant 0 : index
    %261 = vector.load %arg8[%c0_246, %c0_247] : memref<16x3xf32, #tpu.memory_space<vmem>>, vector<16x1xf32>
    %262 = vector.broadcast %261 : vector<16x1xf32> to vector<16x200xf32>
    %263 = arith.addf %260, %262 : vector<16x200xf32>
    %cst_248 = arith.constant 0.000000e+00 : f32
    %264 = vector.broadcast %cst_248 : f32 to vector<16x200xf32>
    %265 = arith.maximumf %263, %264 : vector<16x200xf32>
    %c0_249 = arith.constant 0 : index
    %c1_250 = arith.constant 1 : index
    %266 = vector.load %arg8[%c0_249, %c1_250] : memref<16x3xf32, #tpu.memory_space<vmem>>, vector<16x1xf32>
    %267 = vector.broadcast %266 : vector<16x1xf32> to vector<16x200xf32>
    %268 = arith.mulf %265, %267 : vector<16x200xf32>
    %c0_251 = arith.constant 0 : index
    %c2_252 = arith.constant 2 : index
    %269 = vector.load %arg8[%c0_251, %c2_252] : memref<16x3xf32, #tpu.memory_space<vmem>>, vector<16x1xf32>
    %270 = vector.broadcast %269 : vector<16x1xf32> to vector<16x200xf32>
    %271 = arith.addf %268, %270 : vector<16x200xf32>
    %c0_253 = arith.constant 0 : index
    %c0_254 = arith.constant 0 : index
    %272 = vector.load %arg14[%c0_253, %c0_254] : memref<1x200xf32, #tpu.memory_space<vmem>>, vector<1x200xf32>
    %273 = vector.broadcast %272 : vector<1x200xf32> to vector<16x200xf32>
    %274 = arith.mulf %271, %273 : vector<16x200xf32>
    %c0_255 = arith.constant 0 : index
    %c128_256 = arith.constant 128 : index
    %275 = vector.load %arg22[%c0_255, %c128_256] : memref<16x456xf32, #tpu.memory_space<vmem>>, vector<16x200xf32>
    tpu.vector_store %arg22[%c0_255, %c128_256], %274 {strides = array<i32>} : memref<16x456xf32, #tpu.memory_space<vmem>>, vector<16x200xf32>,
    %c0_257 = arith.constant 0 : index
    %c128_258 = arith.constant 128 : index
    %276 = vector.load %arg22[%c0_257, %c128_258] : memref<16x456xf32, #tpu.memory_space<vmem>>, vector<16x200xf32>
    %c0_259 = arith.constant 0 : index
    %c129_260 = arith.constant 129 : index
    %277 = vector.load %arg22[%c0_259, %c129_260] : memref<16x456xf32, #tpu.memory_space<vmem>>, vector<16x200xf32>
    %c0_261 = arith.constant 0 : index
    %c138_262 = arith.constant 138 : index
    %278 = vector.load %arg22[%c0_261, %c138_262] : memref<16x456xf32, #tpu.memory_space<vmem>>, vector<16x200xf32>
    %c0_263 = arith.constant 0 : index
    %c139_264 = arith.constant 139 : index
    %279 = vector.load %arg22[%c0_263, %c139_264] : memref<16x456xf32, #tpu.memory_space<vmem>>, vector<16x200xf32>
    %280 = arith.maximumf %276, %277 : vector<16x200xf32>
    %281 = arith.maximumf %278, %279 : vector<16x200xf32>
    %282 = arith.maximumf %280, %281 : vector<16x200xf32>
    %c0_265 = arith.constant 0 : index
    %c0_266 = arith.constant 0 : index
    %283 = vector.load %arg17[%c0_265, %c0_266] : memref<200x72xf32, #tpu.memory_space<vmem>>, vector<200x72xf32>
    %cst_267 = arith.constant dense<0.000000e+00> : vector<16x72xf32>
    %284 = tpu.matmul %282, %283, %cst_267 {dimension_numbers = #tpu.dot_dimension_numbers<[1], [0], [0], [1], [0, 0, 1, 1], [], []>} : vector<16x200xf32>, vector<200x72xf32>, vector<16x72xf32> -> vector<16x72xf32>
    %c0_268 = arith.constant 0 : index
    %c128_269 = arith.constant 128 : index
    %285 = vector.load %arg24[%c0_268, %c128_269] : memref<16x328xf32, #tpu.memory_space<vmem>>, vector<16x72xf32>
    tpu.vector_store %arg24[%c0_268, %c128_269], %284 {strides = array<i32>} : memref<16x328xf32, #tpu.memory_space<vmem>>, vector<16x72xf32>,
    %c0_270 = arith.constant 0 : index
    %c121 = arith.constant 121 : index
    %286 = vector.load %arg24[%c0_270, %c121] : memref<16x328xf32, #tpu.memory_space<vmem>>, vector<16x72xf32>
    %c0_271 = arith.constant 0 : index
    %c0_272 = arith.constant 0 : index
    %c0_273 = arith.constant 0 : index
    %287 = vector.load %arg9[%c0_271, %c0_272, %c0_273] : memref<9x16x16xf32, #tpu.memory_space<vmem>>, vector<1x16x16xf32>
    %288 = vector.shape_cast %287 : vector<1x16x16xf32> to vector<16x16xf32>
    %cst_274 = arith.constant dense<0.000000e+00> : vector<16x72xf32>
    %289 = tpu.matmul %288, %286, %cst_274 {dimension_numbers = #tpu.dot_dimension_numbers<[1], [0], [0], [1], [0, 0, 1, 1], [], []>} : vector<16x16xf32>, vector<16x72xf32>, vector<16x72xf32> -> vector<16x72xf32>
    %c0_275 = arith.constant 0 : index
    %c122 = arith.constant 122 : index
    %290 = vector.load %arg24[%c0_275, %c122] : memref<16x328xf32, #tpu.memory_space<vmem>>, vector<16x72xf32>
    %c1_276 = arith.constant 1 : index
    %c0_277 = arith.constant 0 : index
    %c0_278 = arith.constant 0 : index
    %291 = vector.load %arg9[%c1_276, %c0_277, %c0_278] : memref<9x16x16xf32, #tpu.memory_space<vmem>>, vector<1x16x16xf32>
    %292 = vector.shape_cast %291 : vector<1x16x16xf32> to vector<16x16xf32>
    %cst_279 = arith.constant dense<0.000000e+00> : vector<16x72xf32>
    %293 = tpu.matmul %292, %290, %cst_279 {dimension_numbers = #tpu.dot_dimension_numbers<[1], [0], [0], [1], [0, 0, 1, 1], [], []>} : vector<16x16xf32>, vector<16x72xf32>, vector<16x72xf32> -> vector<16x72xf32>
    %294 = arith.addf %289, %293 : vector<16x72xf32>
    %c0_280 = arith.constant 0 : index
    %c123 = arith.constant 123 : index
    %295 = vector.load %arg24[%c0_280, %c123] : memref<16x328xf32, #tpu.memory_space<vmem>>, vector<16x72xf32>
    %c2_281 = arith.constant 2 : index
    %c0_282 = arith.constant 0 : index
    %c0_283 = arith.constant 0 : index
    %296 = vector.load %arg9[%c2_281, %c0_282, %c0_283] : memref<9x16x16xf32, #tpu.memory_space<vmem>>, vector<1x16x16xf32>
    %297 = vector.shape_cast %296 : vector<1x16x16xf32> to vector<16x16xf32>
    %cst_284 = arith.constant dense<0.000000e+00> : vector<16x72xf32>
    %298 = tpu.matmul %297, %295, %cst_284 {dimension_numbers = #tpu.dot_dimension_numbers<[1], [0], [0], [1], [0, 0, 1, 1], [], []>} : vector<16x16xf32>, vector<16x72xf32>, vector<16x72xf32> -> vector<16x72xf32>
    %299 = arith.addf %294, %298 : vector<16x72xf32>
    %c0_285 = arith.constant 0 : index
    %c127_286 = arith.constant 127 : index
    %300 = vector.load %arg24[%c0_285, %c127_286] : memref<16x328xf32, #tpu.memory_space<vmem>>, vector<16x72xf32>
    %c3_287 = arith.constant 3 : index
    %c0_288 = arith.constant 0 : index
    %c0_289 = arith.constant 0 : index
    %301 = vector.load %arg9[%c3_287, %c0_288, %c0_289] : memref<9x16x16xf32, #tpu.memory_space<vmem>>, vector<1x16x16xf32>
    %302 = vector.shape_cast %301 : vector<1x16x16xf32> to vector<16x16xf32>
    %cst_290 = arith.constant dense<0.000000e+00> : vector<16x72xf32>
    %303 = tpu.matmul %302, %300, %cst_290 {dimension_numbers = #tpu.dot_dimension_numbers<[1], [0], [0], [1], [0, 0, 1, 1], [], []>} : vector<16x16xf32>, vector<16x72xf32>, vector<16x72xf32> -> vector<16x72xf32>
    %304 = arith.addf %299, %303 : vector<16x72xf32>
    %c0_291 = arith.constant 0 : index
    %c128_292 = arith.constant 128 : index
    %305 = vector.load %arg24[%c0_291, %c128_292] : memref<16x328xf32, #tpu.memory_space<vmem>>, vector<16x72xf32>
    %c4_293 = arith.constant 4 : index
    %c0_294 = arith.constant 0 : index
    %c0_295 = arith.constant 0 : index
    %306 = vector.load %arg9[%c4_293, %c0_294, %c0_295] : memref<9x16x16xf32, #tpu.memory_space<vmem>>, vector<1x16x16xf32>
    %307 = vector.shape_cast %306 : vector<1x16x16xf32> to vector<16x16xf32>
    %cst_296 = arith.constant dense<0.000000e+00> : vector<16x72xf32>
    %308 = tpu.matmul %307, %305, %cst_296 {dimension_numbers = #tpu.dot_dimension_numbers<[1], [0], [0], [1], [0, 0, 1, 1], [], []>} : vector<16x16xf32>, vector<16x72xf32>, vector<16x72xf32> -> vector<16x72xf32>
    %309 = arith.addf %304, %308 : vector<16x72xf32>
    %c0_297 = arith.constant 0 : index
    %c129_298 = arith.constant 129 : index
    %310 = vector.load %arg24[%c0_297, %c129_298] : memref<16x328xf32, #tpu.memory_space<vmem>>, vector<16x72xf32>
    %c5_299 = arith.constant 5 : index
    %c0_300 = arith.constant 0 : index
    %c0_301 = arith.constant 0 : index
    %311 = vector.load %arg9[%c5_299, %c0_300, %c0_301] : memref<9x16x16xf32, #tpu.memory_space<vmem>>, vector<1x16x16xf32>
    %312 = vector.shape_cast %311 : vector<1x16x16xf32> to vector<16x16xf32>
    %cst_302 = arith.constant dense<0.000000e+00> : vector<16x72xf32>
    %313 = tpu.matmul %312, %310, %cst_302 {dimension_numbers = #tpu.dot_dimension_numbers<[1], [0], [0], [1], [0, 0, 1, 1], [], []>} : vector<16x16xf32>, vector<16x72xf32>, vector<16x72xf32> -> vector<16x72xf32>
    %314 = arith.addf %309, %313 : vector<16x72xf32>
    %c0_303 = arith.constant 0 : index
    %c133 = arith.constant 133 : index
    %315 = vector.load %arg24[%c0_303, %c133] : memref<16x328xf32, #tpu.memory_space<vmem>>, vector<16x72xf32>
    %c6_304 = arith.constant 6 : index
    %c0_305 = arith.constant 0 : index
    %c0_306 = arith.constant 0 : index
    %316 = vector.load %arg9[%c6_304, %c0_305, %c0_306] : memref<9x16x16xf32, #tpu.memory_space<vmem>>, vector<1x16x16xf32>
    %317 = vector.shape_cast %316 : vector<1x16x16xf32> to vector<16x16xf32>
    %cst_307 = arith.constant dense<0.000000e+00> : vector<16x72xf32>
    %318 = tpu.matmul %317, %315, %cst_307 {dimension_numbers = #tpu.dot_dimension_numbers<[1], [0], [0], [1], [0, 0, 1, 1], [], []>} : vector<16x16xf32>, vector<16x72xf32>, vector<16x72xf32> -> vector<16x72xf32>
    %319 = arith.addf %314, %318 : vector<16x72xf32>
    %c0_308 = arith.constant 0 : index
    %c134 = arith.constant 134 : index
    %320 = vector.load %arg24[%c0_308, %c134] : memref<16x328xf32, #tpu.memory_space<vmem>>, vector<16x72xf32>
    %c7_309 = arith.constant 7 : index
    %c0_310 = arith.constant 0 : index
    %c0_311 = arith.constant 0 : index
    %321 = vector.load %arg9[%c7_309, %c0_310, %c0_311] : memref<9x16x16xf32, #tpu.memory_space<vmem>>, vector<1x16x16xf32>
    %322 = vector.shape_cast %321 : vector<1x16x16xf32> to vector<16x16xf32>
    %cst_312 = arith.constant dense<0.000000e+00> : vector<16x72xf32>
    %323 = tpu.matmul %322, %320, %cst_312 {dimension_numbers = #tpu.dot_dimension_numbers<[1], [0], [0], [1], [0, 0, 1, 1], [], []>} : vector<16x16xf32>, vector<16x72xf32>, vector<16x72xf32> -> vector<16x72xf32>
    %324 = arith.addf %319, %323 : vector<16x72xf32>
    %c0_313 = arith.constant 0 : index
    %c135 = arith.constant 135 : index
    %325 = vector.load %arg24[%c0_313, %c135] : memref<16x328xf32, #tpu.memory_space<vmem>>, vector<16x72xf32>
    %c8_314 = arith.constant 8 : index
    %c0_315 = arith.constant 0 : index
    %c0_316 = arith.constant 0 : index
    %326 = vector.load %arg9[%c8_314, %c0_315, %c0_316] : memref<9x16x16xf32, #tpu.memory_space<vmem>>, vector<1x16x16xf32>
    %327 = vector.shape_cast %326 : vector<1x16x16xf32> to vector<16x16xf32>
    %cst_317 = arith.constant dense<0.000000e+00> : vector<16x72xf32>
    %328 = tpu.matmul %327, %325, %cst_317 {dimension_numbers = #tpu.dot_dimension_numbers<[1], [0], [0], [1], [0, 0, 1, 1], [], []>} : vector<16x16xf32>, vector<16x72xf32>, vector<16x72xf32> -> vector<16x72xf32>
    %329 = arith.addf %324, %328 : vector<16x72xf32>
    %c0_318 = arith.constant 0 : index
    %c0_319 = arith.constant 0 : index
    %330 = vector.load %arg10[%c0_318, %c0_319] : memref<16x3xf32, #tpu.memory_space<vmem>>, vector<16x1xf32>
    %331 = vector.broadcast %330 : vector<16x1xf32> to vector<16x72xf32>
    %332 = arith.addf %329, %331 : vector<16x72xf32>
    %cst_320 = arith.constant 0.000000e+00 : f32
    %333 = vector.broadcast %cst_320 : f32 to vector<16x72xf32>
    %334 = arith.maximumf %332, %333 : vector<16x72xf32>
    %c0_321 = arith.constant 0 : index
    %c1_322 = arith.constant 1 : index
    %335 = vector.load %arg10[%c0_321, %c1_322] : memref<16x3xf32, #tpu.memory_space<vmem>>, vector<16x1xf32>
    %336 = vector.broadcast %335 : vector<16x1xf32> to vector<16x72xf32>
    %337 = arith.mulf %334, %336 : vector<16x72xf32>
    %c0_323 = arith.constant 0 : index
    %c2_324 = arith.constant 2 : index
    %338 = vector.load %arg10[%c0_323, %c2_324] : memref<16x3xf32, #tpu.memory_space<vmem>>, vector<16x1xf32>
    %339 = vector.broadcast %338 : vector<16x1xf32> to vector<16x72xf32>
    %340 = arith.addf %337, %339 : vector<16x72xf32>
    %c0_325 = arith.constant 0 : index
    %c0_326 = arith.constant 0 : index
    %341 = vector.load %arg15[%c0_325, %c0_326] : memref<1x72xf32, #tpu.memory_space<vmem>>, vector<1x72xf32>
    %342 = vector.broadcast %341 : vector<1x72xf32> to vector<16x72xf32>
    %343 = arith.mulf %340, %342 : vector<16x72xf32>
    %c0_327 = arith.constant 0 : index
    %c128_328 = arith.constant 128 : index
    %344 = vector.load %arg25[%c0_327, %c128_328] : memref<16x328xf32, #tpu.memory_space<vmem>>, vector<16x72xf32>
    tpu.vector_store %arg25[%c0_327, %c128_328], %343 {strides = array<i32>} : memref<16x328xf32, #tpu.memory_space<vmem>>, vector<16x72xf32>,
    %c0_329 = arith.constant 0 : index
    %c128_330 = arith.constant 128 : index
    %345 = vector.load %arg25[%c0_329, %c128_330] : memref<16x328xf32, #tpu.memory_space<vmem>>, vector<16x72xf32>
    %c0_331 = arith.constant 0 : index
    %c0_332 = arith.constant 0 : index
    %346 = vector.load %arg11[%c0_331, %c0_332] : memref<10x16xf32, #tpu.memory_space<vmem>>, vector<10x16xf32>
    %cst_333 = arith.constant dense<0.000000e+00> : vector<10x72xf32>
    %347 = tpu.matmul %346, %345, %cst_333 {dimension_numbers = #tpu.dot_dimension_numbers<[1], [0], [0], [1], [0, 0, 1, 1], [], []>} : vector<10x16xf32>, vector<16x72xf32>, vector<10x72xf32> -> vector<10x72xf32>
    %c0_334 = arith.constant 0 : index
    %c0_335 = arith.constant 0 : index
    %348 = vector.load %arg12[%c0_334, %c0_335] : memref<10x3xf32, #tpu.memory_space<vmem>>, vector<10x1xf32>
    %349 = vector.broadcast %348 : vector<10x1xf32> to vector<10x72xf32>
    %350 = arith.addf %347, %349 : vector<10x72xf32>
    %cst_336 = arith.constant 0.000000e+00 : f32
    %351 = vector.broadcast %cst_336 : f32 to vector<10x72xf32>
    %352 = arith.maximumf %350, %351 : vector<10x72xf32>
    %c0_337 = arith.constant 0 : index
    %c1_338 = arith.constant 1 : index
    %353 = vector.load %arg12[%c0_337, %c1_338] : memref<10x3xf32, #tpu.memory_space<vmem>>, vector<10x1xf32>
    %354 = vector.broadcast %353 : vector<10x1xf32> to vector<10x72xf32>
    %355 = arith.mulf %352, %354 : vector<10x72xf32>
    %c0_339 = arith.constant 0 : index
    %c2_340 = arith.constant 2 : index
    %356 = vector.load %arg12[%c0_339, %c2_340] : memref<10x3xf32, #tpu.memory_space<vmem>>, vector<10x1xf32>
    %357 = vector.broadcast %356 : vector<10x1xf32> to vector<10x72xf32>
    %358 = arith.addf %355, %357 : vector<10x72xf32>
    %c0_341 = arith.constant 0 : index
    %c0_342 = arith.constant 0 : index
    %359 = vector.load %arg15[%c0_341, %c0_342] : memref<1x72xf32, #tpu.memory_space<vmem>>, vector<1x72xf32>
    %360 = vector.broadcast %359 : vector<1x72xf32> to vector<10x72xf32>
    %361 = arith.mulf %358, %360 : vector<10x72xf32>
    %c0_343 = arith.constant 0 : index
    %c128_344 = arith.constant 128 : index
    %362 = vector.load %arg24[%c0_343, %c128_344] : memref<16x328xf32, #tpu.memory_space<vmem>>, vector<10x72xf32>
    tpu.vector_store %arg24[%c0_343, %c128_344], %361 {strides = array<i32>} : memref<16x328xf32, #tpu.memory_space<vmem>>, vector<10x72xf32>,
    %c0_345 = arith.constant 0 : index
    %c128_346 = arith.constant 128 : index
    %363 = vector.load %arg24[%c0_345, %c128_346] : memref<16x328xf32, #tpu.memory_space<vmem>>, vector<10x72xf32>
    %c0_347 = arith.constant 0 : index
    %c129_348 = arith.constant 129 : index
    %364 = vector.load %arg24[%c0_347, %c129_348] : memref<16x328xf32, #tpu.memory_space<vmem>>, vector<10x72xf32>
    %c0_349 = arith.constant 0 : index
    %c134_350 = arith.constant 134 : index
    %365 = vector.load %arg24[%c0_349, %c134_350] : memref<16x328xf32, #tpu.memory_space<vmem>>, vector<10x72xf32>
    %c0_351 = arith.constant 0 : index
    %c135_352 = arith.constant 135 : index
    %366 = vector.load %arg24[%c0_351, %c135_352] : memref<16x328xf32, #tpu.memory_space<vmem>>, vector<10x72xf32>
    %367 = arith.maximumf %363, %364 : vector<10x72xf32>
    %368 = arith.maximumf %365, %366 : vector<10x72xf32>
    %369 = arith.maximumf %367, %368 : vector<10x72xf32>
    %c0_353 = arith.constant 0 : index
    %c0_354 = arith.constant 0 : index
    %370 = vector.load %arg18[%c0_353, %c0_354] : memref<72x2xf32, #tpu.memory_space<vmem>>, vector<72x2xf32>
    %cst_355 = arith.constant dense<0.000000e+00> : vector<10x2xf32>
    %371 = tpu.matmul %369, %370, %cst_355 {dimension_numbers = #tpu.dot_dimension_numbers<[1], [0], [0], [1], [0, 0, 1, 1], [], []>} : vector<10x72xf32>, vector<72x2xf32>, vector<10x2xf32> -> vector<10x2xf32>
    %cst_356 = arith.constant dense<0xFF800000> : vector<2xf32>
    %372 = vector.multi_reduction <maximumf>, %371, %cst_356 [0] : vector<10x2xf32> to vector<2xf32>
    %373 = vector.shape_cast %372 : vector<2xf32> to vector<1x2xf32>
    %374 = vector.broadcast %373 : vector<1x2xf32> to vector<10x2xf32>
    %375 = arith.subf %371, %374 : vector<10x2xf32>
    %376 = math.exp %375 : vector<10x2xf32>
    %cst_357 = arith.constant dense<0.000000e+00> : vector<2xf32>
    %377 = vector.multi_reduction <add>, %376, %cst_357 [0] : vector<10x2xf32> to vector<2xf32>
    %378 = vector.shape_cast %377 : vector<2xf32> to vector<1x2xf32>
    %379 = math.log %378 : vector<1x2xf32>
    %380 = vector.broadcast %379 : vector<1x2xf32> to vector<10x2xf32>
    %381 = arith.subf %375, %380 : vector<10x2xf32>
    %c0_358 = arith.constant 0 : index
    %c0_359 = arith.constant 0 : index
    %382 = vector.load %arg19[%c0_358, %c0_359] : memref<10x2xf32, #tpu.memory_space<vmem>>, vector<10x2xf32>
    tpu.vector_store %arg19[%c0_358, %c0_359], %381 {strides = array<i32>} : memref<10x2xf32, #tpu.memory_space<vmem>>, vector<10x2xf32>,
    return
  }
}

</mosaic_0001>

<bundles_post_ra>
// kernel: forward.1
= control target key start
LH: loop header
LB: loop body
LE: loop exit
PB: predicated region body
PF: predicated region fallthrough
CT: control target
= control target key end

     0   :  { %s9012_s0 = inlined_call_operand.vmem [shape: f32[1,904], index: 0, kind: input, shape index: {}]   ;;  %s9013_s1 = inlined_call_operand.hbm [shape: f32[9,8,1], index: 1, kind: input, shape index: {}]   ;;  %s9014_s2 = inlined_call_operand.hbm [shape: f32[8,3], index: 2, kind: input, shape index: {}]   ;;  %s9015_s3 = inlined_call_operand.hbm [shape: f32[9,8,8], index: 3, kind: input, shape index: {}]   ;;  %s9016_s4 = inlined_call_operand.hbm [shape: f32[8,3], index: 4, kind: input, shape index: {}]   ;;  %s9017_s5 = inlined_call_operand.hbm [shape: f32[9,16,8], index: 5, kind: input, shape index: {}]   ;;  %s9018_s6 = inlined_call_operand.hbm [shape: f32[16,3], index: 6, kind: input, shape index: {}]   ;;  %s9019_s7 = inlined_call_operand.hbm [shape: f32[9,16,16], index: 7, kind: input, shape index: {}]   ;;  %s9020_s8 = inlined_call_operand.hbm [shape: f32[16,3], index: 8, kind: input, shape index: {}]   ;;  %s9021_s9 = inlined_call_operand.vmem [shape: f32[9,16,16], index: 9, kind: input, shape index: {}]   ;;  %s9022_s10 = inlined_call_operand.hbm [shape: f32[16,3], index: 10, kind: input, shape index: {}]   ;;  %s9023_s11 = inlined_call_operand.hbm [shape: f32[10,16], index: 11, kind: input, shape index: {}]   ;;  %s9024_s12 = inlined_call_operand.vmem [shape: f32[10,3], index: 12, kind: input, shape index: {}]   ;;  %s9025_s13 = inlined_call_operand.vmem [shape: f32[1,648], index: 13, kind: input, shape index: {}]   ;;  %s9026_s14 = inlined_call_operand.vmem [shape: f32[1,200], index: 14, kind: input, shape index: {}]   ;;  %s9027_s15 = inlined_call_operand.vmem [shape: f32[1,72], index: 15, kind: input, shape index: {}]   ;;  %s9028_s16 = inlined_call_operand.hbm [shape: f32[648,200], index: 16, kind: input, shape index: {}]   ;;  %s9029_s17 = inlined_call_operand.hbm [shape: f32[200,72], index: 17, kind: input, shape index: {}]   ;;  %s9030_s18 = inlined_call_operand.hbm [shape: f32[72,2], index: 18, kind: input, shape index: {}]   ;;  %s9031_s19 = inlined_call_operand.vmem [shape: f32[10,2], index: 19, kind: output, shape index: {}]  }
   0x1   :  { %9040 = sst [smem:[#allocation36_spill]] %s9012_s0 }
   0x2   :  { %9041 = sst [smem:[#allocation37_spill]] %s9013_s1 }
   0x3   :  { %9042 = sst [smem:[#allocation38_spill]] %s9014_s2 }
   0x4   :  { %9043 = sst [smem:[#allocation39_spill]] %s9015_s3 }
   0x5   :  { %24 = vsyncpa [#allocation9], 0 }
   0x6   :  { %25 = vsyncpa [#allocation11], 0 }
   0x7   :  { %26 = vsyncpa [#allocation14], 0 }
   0x8   :  { %27 = vsyncpa [#allocation17], 0 }
   0x9   :  { %28 = vsyncpa [#allocation20], 0 }
   0xa   :  { %29 = vsyncpa [#allocation23], 0 }
   0xb   :  { %30 = vsyncpa [#allocation26], 0  ;;  %s7601_s0 = smov [#allocation10]   ;;  %s7602_s20 = smov [#allocation13]  }
   0xc   :  { %s51_s30 = sshll.u32 %s7601_s0, 4  ;;  %s73_s21 = sshll.u32 %s7602_s20, 4  ;;  %s52_s30 = int_to_ptr.vmem [resolvable:$true] %s51_s30  ;;  %s74_s21 = int_to_ptr.vmem [resolvable:$true] %s73_s21 }
   0xd   :  { %s7335_s1 = scalar_lea.vmem %s52_s30, 128  ;;  %p7340_p1 = scmp.lt.s32.totalorder %s52_s30, %s52_s30 }
   0xe   :  { %p7336_p0 = scmp.ne.s32.totalorder %s52_s30, %s7335_s1  ;;  %p7341_p2 = scmp.lt.s32.totalorder %s7335_s1, %s7335_s1 }
  0x10   :  { %p7342_p3 = por %p7341_p2, %p7340_p1 }
  0x12   :  { %p7343_p4 = pnand %p7342_p3, %p7336_p0 }
  0x14   :  { %7346 = shalt.err (!%p7343_p4)
}
  0x15   :  { %s9044_s23 = sld [smem:[#allocation38_spill]]  ;;  %s7355_s24 = scalar_lea.vmem %s74_s21, 128 }
  0x16   :  { %p7356_p5 = scmp.ne.s32.totalorder %s74_s21, %s7355_s24  ;;  %p7360_p6 = scmp.lt.s32.totalorder %s74_s21, %s74_s21 }
  0x17   :  { %p7361_p7 = scmp.lt.s32.totalorder %s7355_s24, %s7355_s24 }
  0x19   :  { %p7362_p8 = por %p7361_p7, %p7360_p6 }
  0x1b   :  { %54 = dma.hbm_to_vmem [thread:$0]  %s9044_s23, 128, %s52_s30, [#allocation11]  }
  0x1c   :  { %p7363_p9 = pnand %p7362_p8, %p7356_p5 }
  0x1e   :  { %7366 = shalt.err (!%p7363_p9)
}
  0x1f   :  { %76 = dma.hbm_to_vmem [thread:$0]  %s9016_s4, 128, %s74_s21, [#allocation14]  }
  0x20   :  { %s7603_s26 = smov [#allocation16]   ;;  %s7604_s28 = smov [#allocation19]  }
  0x21   :  { %s94_s27 = sshll.u32 %s7603_s26, 4  ;;  %s118_s29 = sshll.u32 %s7604_s28, 4  ;;  %s95_s27 = int_to_ptr.vmem [resolvable:$true] %s94_s27  ;;  %s119_s29 = int_to_ptr.vmem [resolvable:$true] %s118_s29 }
  0x22   :  { %s7375_s0 = scalar_lea.vmem %s95_s27, 256  ;;  %p7380_p11 = scmp.lt.s32.totalorder %s95_s27, %s95_s27 }
  0x23   :  { %p7376_p10 = scmp.ne.s32.totalorder %s95_s27, %s7375_s0  ;;  %p7381_p12 = scmp.lt.s32.totalorder %s7375_s0, %s7375_s0 }
  0x25   :  { %p7382_p13 = por %p7381_p12, %p7380_p11 }
  0x27   :  { %p7383_p0 = pnand %p7382_p13, %p7376_p10 }
  0x29   :  { %7386 = shalt.err (!%p7383_p0)
}
  0x2a   :  { %s7605_s30 = smov 128   ;;  %s7606_s20 = smov 8  }
  0x2b   :  { %100 = dma.hbm_to_vmem [thread:$0]  %s9018_s6, 256, %s95_s27, [#allocation17], %s7605_s30, %s7605_s30, %s7606_s20  }
  0x2c   :  { %s7395_s21 = scalar_lea.vmem %s119_s29, 256  ;;  %p7400_p2 = scmp.lt.s32.totalorder %s119_s29, %s119_s29 }
  0x2d   :  { %p7396_p1 = scmp.ne.s32.totalorder %s119_s29, %s7395_s21  ;;  %p7401_p3 = scmp.lt.s32.totalorder %s7395_s21, %s7395_s21 }
  0x2f   :  { %p7402_p4 = por %p7401_p3, %p7400_p2 }
  0x31   :  { %p7403_p5 = pnand %p7402_p4, %p7396_p1 }
  0x33   :  { %7406 = shalt.err (!%p7403_p5)
}
  0x34   :  { %124 = dma.hbm_to_vmem [thread:$0]  %s9020_s8, 256, %s119_s29, [#allocation20], %s7605_s30, %s7605_s30, %s7606_s20  }
  0x35   :  { %s7607_s23 = smov [#allocation22]   ;;  %s7608_s25 = smov [#allocation25]  }
  0x36   :  { %s144_s24 = sshll.u32 %s7607_s23, 4  ;;  %s176_s3 = sshll.u32 %s7608_s25, 4  ;;  %s145_s24 = int_to_ptr.vmem [resolvable:$true] %s144_s24  ;;  %s177_s3 = int_to_ptr.vmem [resolvable:$true] %s176_s3 }
  0x37   :  { %s7415_s6 = scalar_lea.vmem %s145_s24, 256  ;;  %p7420_p7 = scmp.lt.s32.totalorder %s145_s24, %s145_s24 }
  0x38   :  { %p7416_p6 = scmp.ne.s32.totalorder %s145_s24, %s7415_s6  ;;  %p7421_p8 = scmp.lt.s32.totalorder %s7415_s6, %s7415_s6 }
  0x3a   :  { %p7422_p9 = por %p7421_p8, %p7420_p7 }
  0x3c   :  { %p7423_p10 = pnand %p7422_p9, %p7416_p6 }
  0x3e   :  { %7426 = shalt.err (!%p7423_p10)
}
  0x3f   :  { %150 = dma.hbm_to_vmem [thread:$0]  %s9023_s11, 256, %s145_s24, [#allocation23], %s7605_s30, %s7605_s30, %s7606_s20  }
  0x40   :  { %s7435_s8 = scalar_lea.vmem %s177_s3, 3200  ;;  %p7440_p12 = scmp.lt.s32.totalorder %s177_s3, %s177_s3 }
  0x41   :  { %p7436_p11 = scmp.ne.s32.totalorder %s177_s3, %s7435_s8  ;;  %p7441_p13 = scmp.lt.s32.totalorder %s7435_s8, %s7435_s8 }
  0x43   :  { %p7442_p0 = por %p7441_p13, %p7440_p12 }
  0x45   :  { %p7443_p1 = pnand %p7442_p0, %p7436_p11 }
  0x47   :  { %7446 = shalt.err (!%p7443_p1)
}
  0x48   :  { %182 = dma.hbm_to_vmem [thread:$0]  %s9029_s17, 3200, %s177_s3, [#allocation26], %s7605_s30, %s7605_s30, %s7606_s20  }
  0x49   :  { %s7609_s0 = smov [#allocation8]   ;;  %s7610_s4 = smov [#allocation12]  }
  0x4a   :  { %s38_s1 = sshll.u32 %s7609_s0, 4  ;;  %s60_s21 = sshll.u32 %s7610_s4, 4  ;;  %s39_s1 = int_to_ptr.vmem [resolvable:$true] %s38_s1  ;;  %s61_s21 = int_to_ptr.vmem [resolvable:$true] %s60_s21 }
  0x4b   :  { %s7455_s11 = scalar_lea.vmem %s39_s1, 1152  ;;  %p7460_p3 = scmp.lt.s32.totalorder %s39_s1, %s39_s1 }
  0x4c   :  { %p7456_p2 = scmp.ne.s32.totalorder %s39_s1, %s7455_s11  ;;  %p7461_p4 = scmp.lt.s32.totalorder %s7455_s11, %s7455_s11 }
  0x4e   :  { %p7462_p5 = por %p7461_p4, %p7460_p3 }
  0x50   :  { %p7463_p6 = pnand %p7462_p5, %p7456_p2 }
  0x52   :  { %7466 = shalt.err (!%p7463_p6)
}
  0x53   :  { %s9045_s23 = sld [smem:[#allocation37_spill]]  ;;  %s7475_s17 = scalar_lea.vmem %s61_s21, 1152 }
  0x54   :  { %p7476_p7 = scmp.ne.s32.totalorder %s61_s21, %s7475_s17  ;;  %p7480_p8 = scmp.lt.s32.totalorder %s61_s21, %s61_s21 }
  0x55   :  { %p7481_p9 = scmp.lt.s32.totalorder %s7475_s17, %s7475_s17 }
  0x57   :  { %p7482_p10 = por %p7481_p9, %p7480_p8 }
  0x59   :  { %44 = dma.hbm_to_vmem [thread:$0]  %s9045_s23, 1152, %s39_s1, [#allocation9], %s7605_s30, %s7605_s30, %s7606_s20  }
  0x5a   :  { %p7483_p11 = pnand %p7482_p10, %p7476_p7 }
  0x5c   :  { %7486 = shalt.err (!%p7483_p11)
}
  0x5d   :  { %s9046_s3 = sld [smem:[#allocation39_spill]]  ;;  %s7611_s6 = smov [#allocation15]  }
  0x5e   :  { %s82_s26 = sshll.u32 %s7611_s6, 4  ;;  %s7612_s27 = smov [#allocation18]   ;;  %s83_s26 = int_to_ptr.vmem [resolvable:$true] %s82_s26 }
  0x5f   :  { %s106_s8 = sshll.u32 %s7612_s27, 4  ;;  %s7495_s28 = scalar_lea.vmem %s83_s26, 2304  ;;  %s107_s8 = int_to_ptr.vmem [resolvable:$true] %s106_s8 }
  0x60   :  { %p7496_p12 = scmp.ne.s32.totalorder %s83_s26, %s7495_s28  ;;  %p7500_p13 = scmp.lt.s32.totalorder %s83_s26, %s83_s26 }
  0x61   :  { %p7501_p0 = scmp.lt.s32.totalorder %s7495_s28, %s7495_s28 }
  0x63   :  { %66 = dma.hbm_to_vmem [thread:$0]  %s9046_s3, 1152, %s61_s21, [#allocation11], %s7605_s30, %s7605_s30, %s7606_s20  }
  0x64   :  { %p7502_p1 = por %p7501_p0, %p7500_p13 }
  0x66   :  { %p7503_p2 = pnand %p7502_p1, %p7496_p12 }
  0x68   :  { %7506 = shalt.err (!%p7503_p2)
}
  0x69   :  { %88 = dma.hbm_to_vmem [thread:$0]  %s9017_s5, 2304, %s83_s26, [#allocation14], %s7605_s30, %s7605_s30, %s7606_s20  }
  0x6a   :  { %s7515_s1 = scalar_lea.vmem %s107_s8, 2304  ;;  %p7520_p4 = scmp.lt.s32.totalorder %s107_s8, %s107_s8 }
  0x6b   :  { %p7516_p3 = scmp.ne.s32.totalorder %s107_s8, %s7515_s1  ;;  %p7521_p5 = scmp.lt.s32.totalorder %s7515_s1, %s7515_s1 }
  0x6d   :  { %p7522_p6 = por %p7521_p5, %p7520_p4 }
  0x6f   :  { %p7523_p7 = pnand %p7522_p6, %p7516_p3 }
  0x71   :  { %7526 = shalt.err (!%p7523_p7)
}
  0x72   :  { %112 = dma.hbm_to_vmem [thread:$0]  %s9019_s7, 2304, %s107_s8, [#allocation17], %s7605_s30, %s7605_s30, %s7606_s20  }
  0x73   :  { %s7613_s11 = smov [#allocation21]   ;;  %s7614_s2 = smov [#allocation24]  }
  0x74   :  { %s132_s22 = sshll.u32 %s7613_s11, 4  ;;  %s164_s23 = sshll.u32 %s7614_s2, 4  ;;  %s133_s22 = int_to_ptr.vmem [resolvable:$true] %s132_s22  ;;  %s165_s23 = int_to_ptr.vmem [resolvable:$true] %s164_s23 }
  0x75   :  { %s7535_s5 = scalar_lea.vmem %s133_s22, 256  ;;  %p7540_p9 = scmp.lt.s32.totalorder %s133_s22, %s133_s22 }
  0x76   :  { %p7536_p8 = scmp.ne.s32.totalorder %s133_s22, %s7535_s5  ;;  %p7541_p10 = scmp.lt.s32.totalorder %s7535_s5, %s7535_s5 }
  0x78   :  { %p7542_p11 = por %p7541_p10, %p7540_p9 }
  0x7a   :  { %p7543_p12 = pnand %p7542_p11, %p7536_p8 }
  0x7c   :  { %7546 = shalt.err (!%p7543_p12)
}
  0x7d   :  { %138 = dma.hbm_to_vmem [thread:$0]  %s9022_s10, 256, %s133_s22, [#allocation20], %s7605_s30, %s7605_s30, %s7606_s20  }
  0x7e   :  { %s7555_s7 = scalar_lea.vmem %s165_s23, 20736  ;;  %p7560_p0 = scmp.lt.s32.totalorder %s165_s23, %s165_s23 }
  0x7f   :  { %p7556_p13 = scmp.ne.s32.totalorder %s165_s23, %s7555_s7  ;;  %p7561_p1 = scmp.lt.s32.totalorder %s7555_s7, %s7555_s7 }
  0x81   :  { %p7562_p2 = por %p7561_p1, %p7560_p0 }
  0x83   :  { %p7563_p3 = pnand %p7562_p2, %p7556_p13 }
  0x85   :  { %7566 = shalt.err (!%p7563_p3)
}
  0x86   :  { %s7615_s25 = smov 256   ;;  %s7616_s3 = smov 16  }
  0x87   :  { %170 = dma.hbm_to_vmem [thread:$0]  %s9028_s16, 20736, %s165_s23, [#allocation23], %s7615_s25, %s7615_s25, %s7616_s3  }
  0x88   :  { %s7617_s27 = smov [#allocation27]  }
  0x89   :  { %s188_s8 = sshll.u32 %s7617_s27, 4  ;;  %s189_s8 = int_to_ptr.vmem [resolvable:$true] %s188_s8 }
  0x8a   :  { %s7575_s28 = scalar_lea.vmem %s189_s8, 1152  ;;  %p7580_p5 = scmp.lt.s32.totalorder %s189_s8, %s189_s8 }
  0x8b   :  { %p7576_p4 = scmp.ne.s32.totalorder %s189_s8, %s7575_s28  ;;  %p7581_p6 = scmp.lt.s32.totalorder %s7575_s28, %s7575_s28 }
  0x8d   :  { %p7582_p7 = por %p7581_p6, %p7580_p5 }
  0x8f   :  { %p7583_p8 = pnand %p7582_p7, %p7576_p4 }
  0x91   :  { %7586 = shalt.err (!%p7583_p8)
}
  0x92   :  { %194 = dma.hbm_to_vmem [thread:$0]  %s9030_s18, 1152, %s189_s8, [#allocation26], %s7605_s30, %s7605_s30, %s7606_s20  }
  0x93   :  { %7587 = dma.done.wait [#allocation9], 1152  }
  0x94   :  { %7588 = vsyncadd [#allocation9], 4294966144 }
  0x95   :  { %7589 = dma.done.wait [#allocation11], 1280  }
  0x96   :  { %7590 = vsyncadd [#allocation11], 4294966016 }
  0x97   :  { %7591 = dma.done.wait [#allocation14], 2432  }
  0x98   :  { %7592 = vsyncadd [#allocation14], 4294964864 }
  0x99   :  { %7593 = dma.done.wait [#allocation17], 2560  }
  0x9a   :  { %7594 = vsyncadd [#allocation17], 4294964736 }
  0x9b   :  { %7595 = dma.done.wait [#allocation20], 512  }
  0x9c   :  { %7596 = vsyncadd [#allocation20], 4294966784 }
  0x9d   :  { %7597 = dma.done.wait [#allocation23], 20992  }
  0x9e   :  { %7598 = vsyncadd [#allocation23], 4294946304 }
  0x9f   :  { %7599 = dma.done.wait [#allocation26], 4352  }
  0xa0   :  { %7600 = vsyncadd [#allocation26], 4294962944  ;;  %vm241_vm0 = vcmask 64512   ;;  %v7618_v0 = vmov 0.0   ;;  %v9037_v1 = vmov 0   ;;  %v325_v2 = vld [vmem:[#allocation8 + $0x8] sm:$0xff]  ;;  %v288_v12 = vlaneseq }
  0xa1   :  { %243 = vst [vmem:[#allocation3] sm:$0xff] %v7618_v0  ;;  %240 = vst [vmem:[#allocation2 + $0x30] sm:$0xff] %v7618_v0  ;;  %7271 = vset.pattern.permute.xlu0 %v9037_v1  ;;  %7272 = vset.pattern.permute.xlu1 %v9037_v1  ;;  %v424_v3 = vld [vmem:[#allocation8 + $0x18] sm:$0xff]  ;;  %v374_v4 = vld [vmem:[#allocation8 + $0x10] sm:$0xff]  ;;  %v9033_v14 = vmov 1   ;;  %v9035_v17 = vmov 2  }
  0xa2   :  { %249 = vst [vmem:[#allocation3 + $0x30] sm:$0xff] %v7618_v0  ;;  %253 = vst [vmem:[#allocation4 + $0x10] sm:$0xff] %v7618_v0  ;;  %1025 = vmatprep.mubr.f32.mxu1 %v7618_v0  ;;  %1167 = vmatprep.mubr.f32.mxu0 %v7618_v0  ;;  %v515_v5 = vld [vmem:[#allocation8 + $0x20] sm:$0xff]  ;;  %v595_v6 = vld [vmem:[#allocation8 + $0x28] sm:$0xff]  ;;  %v7831_v13 = vshrl.u32 %v288_v12, 7  ;;  %s7622_s30 = smov 109  }
  0xa3   :  { %258 = vst [vmem:[#allocation4 + $0x30] sm:$0xff] %v7618_v0  ;;  %262 = vst [vmem:[#allocation5 + $0x10] sm:$0xff] %v7618_v0  ;;  %328 = vperm.xlu0 %7271, %v325_v2   ;;  %427 = vperm.xlu1 %7272, %v424_v3   ;;  %v644_v7 = vld [vmem:[#allocation8 + $0x30] sm:$0xff]  ;;  %v693_v8 = vld [vmem:[#allocation8 + $0x38] sm:$0xff]  ;;  %s9047_s1 = sld [smem:[#allocation36_spill]]  ;;  %s7623_s4 = smov 127  }
  0xa4   :  { %266 = vst [vmem:[#allocation5 + $0x30] sm:$0xff] %v7618_v0  ;;  %269 = vst [vmem:[#allocation6 + $0x8] sm:$0xff] %v7618_v0  ;;  %v742_v9 = vld [vmem:[#allocation8 + $0x40] sm:$0xff]  ;;  %v790_v11 = vld [vmem:[#allocation10] sm:$0xff]  ;;  %v7835_v15 = vsub.s32 0, %v7831_v13  ;;  %v7848_v19 = vsub.s32 1, %v7831_v13 }
  0xa5   :  { %272 = vst [vmem:[#allocation6 + $0x20] sm:$0xff] %v7618_v0  ;;  %275 = vst [vmem:[#allocation7 + $0x8] sm:$0xff] %v7618_v0  ;;  %v281_v10 = vld [vmem:[#allocation8] sm:$0xff]  ;;  %v7860_v23 = vsub.s32 3, %v7831_v13  ;;  %v7863_v24 = vsub.s32 2, %v7831_v13  ;;  %v7882_v35 = vsub.s32 5, %v7831_v13 }
  0xa6   :  { %278 = vst [vmem:[#allocation7 + $0x20] sm:$0xff] %v7618_v0  ;;  %v7840_v16 = vld [vmem:[%s9025_s13] sm:$0x3f]  ;;  %v7885_v36 = vsub.s32 4, %v7831_v13  ;;  %s7624_s21 = smov 126   ;;  %s7625_s2 = smov 110  }
  0xa7   :  { %377 = vperm.xlu0 %7271, %v374_v4   ;;  %518 = vperm.xlu1 %7272, %v515_v5   ;;  %v833_v18 = vrot.slane %v7840_v16, %v7835_v15  ;;  %9048 = vst [vmem:[#allocation35_spill] sm:$0xff] %v7882_v35  ;;  %s7626_s17 = smov 108   ;;  %s7627_s24 = smov 92   ;;  %vm355_vm1 = vcmask 1039360   ;;  %vm404_vm2 = vcmask 1031168   ;;  %vm494_vm3 = vcmask 900096  }
  0xa8   :  { %s7628_s7 = smov 91   ;;  %s7629_s25 = smov 90   ;;  %vm576_vm4 = vcmask 891904   ;;  %vm625_vm5 = vcmask 883712   ;;  %vm674_vm6 = vcmask 752640   ;;  %vm723_vm7 = vcmask 744448  }
  0xa9   :  { %v280_v20 = vld [vmem:[%s9047_s1] sm:$0x3f]  ;;  %vm772_vm8 = vcmask 736256   ;;  %s7630_s3 = smov 19   ;;  %s7631_s6 = smov 18   ;;  %vm901_vm9 = vcmask 154624  }
  0xaa   :  { %v7854_v21 = vrot.slane %v280_v20, %v7848_v19  ;;  %v7857_v22 = vrot.slane %v280_v20, %v7835_v15  ;;  %v7868_v28 = vrot.slane %v280_v20, %v7860_v23  ;;  %v7871_v29 = vrot.slane %v280_v20, %v7863_v24  ;;  %v7892_v37 = vld [vmem:[%s9047_s1] sm:$0x7f]  ;;  %s7632_s26 = smov 17   ;;  %s7633_s27 = smov 1  }
  0xab   :  { %598 = vperm.xlu0 %7271, %v595_v6   ;;  %647 = vperm.xlu1 %7272, %v644_v7   ;;  %v7897_v40 = vrot.slane %v280_v20, %v7882_v35  ;;  %v7900_v41 = vrot.slane %v280_v20, %v7885_v36  ;;  %v438_v42 = vrot.slane %v7892_v37, %v7848_v19  ;;  %v7929_v53 = vld [vmem:[%s9047_s1 + $0x1] sm:$0x3f]  ;;  %s7634_s8 = smov 111   ;;  %vm946_vm10 = vcmask 146432   ;;  %s7636_s29 = smov 11  }
  0xac   :  { %v434_v43 = vrot.slane %v7892_v37, %v7835_v15  ;;  %v446_v49 = vrot.slane %v7892_v37, %v7860_v23  ;;  %v442_v50 = vrot.slane %v7892_v37, %v7863_v24  ;;  %v529_v56 = vrot.slane %v7929_v53, %v7848_v19  ;;  %s7637_s16 = smov 9   ;;  %s7638_s18 = smov 119  }
  0xad   :  { %v525_v57 = vrot.slane %v7929_v53, %v7835_v15  ;;  %v450_v61 = vrot.slane %v7892_v37, %v7885_v36  ;;  %v533_v62 = vrot.slane %v7929_v53, %v7863_v24  ;;  %v454_v3 = vrot.slane %v7892_v37, %v7882_v35  ;;  %s7640_s20 = smov 117   ;;  %s7642_s22 = smov 7  }
  0xae   :  { %vm1427_vm11 = vcmask 138240   ;;  %vm1691_vm12 = vcmask 7168   ;;  %vm2411_vm13 = vcmask 908288   ;;  %vm254_vm14 = vcmask 588800  }
  0xaf   :  { %696 = vperm.xlu0 %7271, %v693_v8   ;;  %745 = vperm.xlu1 %7272, %v742_v9   ;;  %v541_v9 = vrot.slane %v7929_v53, %v7885_v36  ;;  %vm3694_vm15 = vcmask 80896  }
  0xb3   :  { %284 = vperm.xlu0 %7271, %v281_v10   ;;  %793 = vperm.xlu1 %7272, %v790_v11   ;;  %v537_v10 = vrot.slane %v7929_v53, %v7860_v23 }
  0xb7   :  { %7273 = vset.pattern.permute.xlu1 %v9033_v14 }
  0xb8   :  { %809 = vperm.xlu1 %7273, %v790_v11  }
  0xbc   :  { %7274 = vset.pattern.permute.xlu1 %v9035_v17 }
  0xbd   :  { %819 = vperm.xlu1 %7274, %v790_v11  }
  0xc1   :  { %854 = vrot.lane.b32.xlu1 %v833_v18, %s7622_s30 }
  0xc2   :  { %7275 = vset.pattern.permute.xlu1 %v9033_v14 }
 0x11e   :  { %v329_v25 = vpop.permute.xlu0 %328  ;;  %v7910_v46 = vpop.permute.xlu1 %427 }
 0x11f   :  { %v332_v26 = vmul.f32 %v329_v25, %v7854_v21  ;;  %v331_v27 = vmul.f32 %v329_v25, %v7857_v22  ;;  %v334_v30 = vmul.f32 %v329_v25, %v7868_v28  ;;  %v333_v31 = vmul.f32 %v329_v25, %v7871_v29 }
 0x120   :  { %v336_v44 = vmul.f32 %v329_v25, %v7897_v40  ;;  %v335_v45 = vmul.f32 %v329_v25, %v7900_v41  ;;  %v467_v47 = vmul.f32 %v438_v42, %v7910_v46  ;;  %v466_v48 = vmul.f32 %v434_v43, %v7910_v46 }
 0x121   :  { %345 = vrot.lane.b32.xlu0 %v332_v26, %s7623_s4  ;;  %343 = vrot.lane.b32.xlu1 %v331_v27, %s7623_s4  ;;  %v469_v51 = vmul.f32 %v446_v49, %v7910_v46  ;;  %v468_v52 = vmul.f32 %v442_v50, %v7910_v46  ;;  %v470_v63 = vmul.f32 %v450_v61, %v7910_v46 }
 0x122   :  { %v378_v32 = vpop.permute.xlu0 %377  ;;  %v7939_v58 = vpop.permute.xlu1 %518  ;;  %v471_v6 = vmul.f32 %v454_v3, %v7910_v46  ;;  %v837_v61 = vrot.slane %v7840_v16, %v7848_v19  ;;  %v853_v3 = vrot.slane %v7840_v16, %v7882_v35 }
 0x123   :  { %v381_v33 = vmul.f32 %v378_v32, %v7854_v21  ;;  %v380_v34 = vmul.f32 %v378_v32, %v7857_v22  ;;  %v383_v38 = vmul.f32 %v378_v32, %v7868_v28  ;;  %v382_v39 = vmul.f32 %v378_v32, %v7871_v29 }
 0x124   :  { %v385_v54 = vmul.f32 %v378_v32, %v7897_v40  ;;  %v384_v55 = vmul.f32 %v378_v32, %v7900_v41  ;;  %v553_v59 = vmul.f32 %v529_v56, %v7939_v58  ;;  %v552_v60 = vmul.f32 %v525_v57, %v7939_v58 }
 0x125   :  { %349 = vrot.lane.b32.xlu0 %v334_v30, %s7623_s4  ;;  %347 = vrot.lane.b32.xlu1 %v333_v31, %s7623_s4  ;;  %v554_v2 = vmul.f32 %v533_v62, %v7939_v58  ;;  %v556_v11 = vmul.f32 %v541_v9, %v7939_v58  ;;  %v555_v12 = vmul.f32 %v537_v10, %v7939_v58 }
 0x126   :  { %v7953_v4 = vpop.permute.xlu0 %598  ;;  %v648_v18 = vpop.permute.xlu1 %647 }
 0x127   :  { %v601_v5 = vmul.f32 %v7953_v4, %v525_v57  ;;  %v603_v7 = vmul.f32 %v7953_v4, %v533_v62  ;;  %v602_v8 = vmul.f32 %v7953_v4, %v529_v56  ;;  %v651_v20 = vmul.f32 %v648_v18, %v529_v56 }
 0x128   :  { %v650_v25 = vmul.f32 %v648_v18, %v525_v57  ;;  %v604_v26 = vmul.f32 %v7953_v4, %v537_v10  ;;  %v652_v27 = vmul.f32 %v648_v18, %v533_v62  ;;  %v605_v32 = vmul.f32 %v7953_v4, %v541_v9 }
 0x129   :  { %394 = vrot.lane.b32.xlu0 %v381_v33, %s7624_s21  ;;  %392 = vrot.lane.b32.xlu1 %v380_v34, %s7624_s21  ;;  %v457_v33 = vsub.s32 6, %v7831_v13  ;;  %v653_v43 = vmul.f32 %v648_v18, %v537_v10 }
 0x12a   :  { %v697_v30 = vpop.permute.xlu0 %696  ;;  %v746_v13 = vpop.permute.xlu1 %745 }
 0x12b   :  { %v699_v31 = vmul.f32 %v697_v30, %v525_v57  ;;  %v701_v34 = vmul.f32 %v697_v30, %v533_v62  ;;  %v702_v49 = vmul.f32 %v697_v30, %v537_v10  ;;  %v703_v50 = vmul.f32 %v697_v30, %v541_v9 }
 0x12d   :  { %398 = vrot.lane.b32.xlu0 %v383_v38, %s7624_s21  ;;  %396 = vrot.lane.b32.xlu1 %v382_v39, %s7624_s21  ;;  %v700_v38 = vmul.f32 %v697_v30, %v529_v56  ;;  %v458_v39 = vrot.slane %v7892_v37, %v457_v33  ;;  %v750_v37 = vmul.f32 %v746_v13, %v533_v62 }
 0x12f   :  { %v472_v42 = vmul.f32 %v458_v39, %v7910_v46 }
 0x131   :  { %353 = vrot.lane.b32.xlu0 %v336_v44, %s7623_s4  ;;  %351 = vrot.lane.b32.xlu1 %v335_v45, %s7623_s4  ;;  %v654_v44 = vmul.f32 %v648_v18, %v541_v9  ;;  %v748_v45 = vmul.f32 %v746_v13, %v525_v57  ;;  %v849_v57 = vrot.slane %v7840_v16, %v7885_v36 }
 0x135   :  { %482 = vrot.lane.b32.xlu0 %v467_v47, %s7625_s2  ;;  %480 = vrot.lane.b32.xlu1 %v466_v48, %s7625_s2  ;;  %v749_v47 = vmul.f32 %v746_v13, %v529_v56  ;;  %v545_v48 = vrot.slane %v7929_v53, %v7882_v35  ;;  %v841_v53 = vrot.slane %v7840_v16, %v7863_v24  ;;  %v8000_v56 = vpop.permute.xlu1 %793 }
 0x137   :  { %v557_v46 = vmul.f32 %v545_v48, %v7939_v58  ;;  %v655_v58 = vmul.f32 %v648_v18, %v545_v48 }
 0x139   :  { %486 = vrot.lane.b32.xlu0 %v469_v51, %s7625_s2  ;;  %484 = vrot.lane.b32.xlu1 %v468_v52, %s7625_s2  ;;  %v751_v51 = vmul.f32 %v746_v13, %v537_v10  ;;  %v606_v52 = vmul.f32 %v7953_v4, %v545_v48  ;;  %v8021_v4 = vpop.permute.xlu0 %284 }
 0x13d   :  { %402 = vrot.lane.b32.xlu0 %v385_v54, %s7624_s21  ;;  %400 = vrot.lane.b32.xlu1 %v384_v55, %s7624_s21  ;;  %v704_v54 = vmul.f32 %v697_v30, %v545_v48  ;;  %v752_v55 = vmul.f32 %v746_v13, %v541_v9 }
 0x141   :  { %566 = vrot.lane.b32.xlu0 %v553_v59, %s7622_s30  ;;  %564 = vrot.lane.b32.xlu1 %v552_v60, %s7622_s30  ;;  %v8006_v59 = vpop.permute.xlu1 %809  ;;  %v753_v60 = vmul.f32 %v746_v13, %v545_v48 }
 0x145   :  { %488 = vrot.lane.b32.xlu0 %v470_v63, %s7625_s2  ;;  %568 = vrot.lane.b32.xlu1 %v554_v2, %s7622_s30  ;;  %v8011_v62 = vpop.permute.xlu1 %819  ;;  %v845_v63 = vrot.slane %v7840_v16, %v7860_v23 }
 0x149   :  { %613 = vrot.lane.b32.xlu0 %v601_v5, %s7626_s17  ;;  %490 = vrot.lane.b32.xlu1 %v471_v6, %s7625_s2  ;;  %v8017_v2 = vpop.permute.xlu1 %854 }
 0x14d   :  { %617 = vrot.lane.b32.xlu0 %v603_v7, %s7626_s17  ;;  %615 = vrot.lane.b32.xlu1 %v602_v8, %s7626_s17 }
 0x151   :  { %572 = vrot.lane.b32.xlu0 %v556_v11, %s7622_s30  ;;  %570 = vrot.lane.b32.xlu1 %v555_v12, %s7622_s30 }
 0x155   :  { %664 = vrot.lane.b32.xlu0 %v651_v20, %s7627_s24  ;;  %662 = vrot.lane.b32.xlu1 %v650_v25, %s7627_s24 }
 0x159   :  { %619 = vrot.lane.b32.xlu0 %v604_v26, %s7626_s17  ;;  %666 = vrot.lane.b32.xlu1 %v652_v27, %s7627_s24 }
 0x15d   :  { %711 = vrot.lane.b32.xlu0 %v699_v31, %s7628_s7  ;;  %621 = vrot.lane.b32.xlu1 %v605_v32, %s7626_s17 }
 0x161   :  { %715 = vrot.lane.b32.xlu0 %v701_v34, %s7628_s7  ;;  %713 = vrot.lane.b32.xlu1 %v700_v38, %s7628_s7 }
 0x165   :  { %492 = vrot.lane.b32.xlu0 %v472_v42, %s7625_s2  ;;  %668 = vrot.lane.b32.xlu1 %v653_v43, %s7627_s24 }
 0x169   :  { %670 = vrot.lane.b32.xlu0 %v654_v44, %s7627_s24  ;;  %760 = vrot.lane.b32.xlu1 %v748_v45, %s7629_s25 }
 0x16d   :  { %762 = vrot.lane.b32.xlu0 %v749_v47, %s7629_s25  ;;  %764 = vrot.lane.b32.xlu1 %v750_v37, %s7629_s25 }
 0x171   :  { %574 = vrot.lane.b32.xlu0 %v557_v46, %s7622_s30  ;;  %717 = vrot.lane.b32.xlu1 %v702_v49, %s7628_s7 }
 0x175   :  { %719 = vrot.lane.b32.xlu0 %v703_v50, %s7628_s7  ;;  %766 = vrot.lane.b32.xlu1 %v751_v51, %s7629_s25  ;;  %v318_v50 = vmul.f32 %v7857_v22, %v8021_v4 }
 0x179   :  { %623 = vrot.lane.b32.xlu0 %v606_v52, %s7626_s17  ;;  %721 = vrot.lane.b32.xlu1 %v704_v54, %s7628_s7  ;;  %s7644_s17 = smov 123   ;;  %s7646_s7 = smov 121  }
 0x17d   :  { %768 = vrot.lane.b32.xlu0 %v752_v55, %s7629_s25  ;;  %858 = vrot.lane.b32.xlu1 %v841_v53, %s7622_s30 }
 0x181   :  { %672 = vrot.lane.b32.xlu0 %v655_v58, %s7627_s24  ;;  %862 = vrot.lane.b32.xlu1 %v849_v57, %s7622_s30  ;;  %s7645_s24 = smov 122  }
 0x185   :  { %770 = vrot.lane.b32.xlu0 %v753_v60, %s7629_s25 }
 0x189   :  { %856 = vrot.lane.b32.xlu0 %v837_v61, %s7622_s30 }
 0x18d   :  { %860 = vrot.lane.b32.xlu0 %v845_v63, %s7622_s30 }
 0x191   :  { %864 = vrot.lane.b32.xlu0 %v853_v3, %s7622_s30 }
 0x193   :  { %v346_v5 = vpop.permute.xlu0 %345  ;;  %v344_v6 = vpop.permute.xlu1 %343 }
 0x194   :  { %v356_v48 = vsel %vm355_vm1, %v344_v6, %v346_v5 }
 0x195   :  { %v367_v52 = vadd.f32 %v356_v48, %v318_v50  ;;  %v319_v48 = vmul.f32 %v7854_v21, %v8021_v4  ;;  %v320_v50 = vmul.f32 %v7871_v29, %v8021_v4 }
 0x197   :  { %v350_v7 = vpop.permute.xlu0 %349  ;;  %v348_v8 = vpop.permute.xlu1 %347 }
 0x19b   :  { %v395_v9 = vpop.permute.xlu0 %394  ;;  %v393_v10 = vpop.permute.xlu1 %392 }
 0x19c   :  { %v405_v51 = vsel %vm404_vm2, %v393_v10, %v395_v9  ;;  %v357_v10 = vsel %vm355_vm1, %v346_v5, %v348_v8  ;;  %v322_v5 = vmul.f32 %v7900_v41, %v8021_v4 }
 0x19d   :  { %v416_v57 = vadd.f32 %v405_v51, %v367_v52  ;;  %v358_v51 = vsel %vm355_vm1, %v348_v8, %v350_v7 }
 0x19f   :  { %v8024_v11 = vpop.permute.xlu0 %398  ;;  %v397_v12 = vpop.permute.xlu1 %396 }
 0x1a0   :  { %v406_v52 = vsel %vm404_vm2, %v395_v9, %v397_v12  ;;  %v407_v29 = vsel %vm404_vm2, %v397_v12, %v8024_v11 }
 0x1a3   :  { %v8026_v18 = vpop.permute.xlu0 %353  ;;  %v352_v20 = vpop.permute.xlu1 %351 }
 0x1a4   :  { %v359_v8 = vsel %vm355_vm1, %v350_v7, %v352_v20  ;;  %v360_v41 = vsel %vm355_vm1, %v352_v20, %v8026_v18 }
 0x1a7   :  { %v483_v25 = vpop.permute.xlu0 %482  ;;  %v481_v26 = vpop.permute.xlu1 %480 }
 0x1a8   :  { %v495_v54 = vsel %vm494_vm3, %v481_v26, %v483_v25 }
 0x1a9   :  { %v507_v58 = vadd.f32 %v495_v54, %v416_v57  ;;  %v321_v54 = vmul.f32 %v7868_v28, %v8021_v4 }
 0x1ab   :  { %v8028_v27 = vpop.permute.xlu0 %486  ;;  %v485_v16 = vpop.permute.xlu1 %484  ;;  %v370_v14 = vadd.f32 %v359_v8, %v321_v54 }
 0x1af   :  { %v8030_v30 = vpop.permute.xlu0 %402  ;;  %v8032_v31 = vpop.permute.xlu1 %400 }
 0x1b0   :  { %v409_v20 = vsel %vm404_vm2, %v8032_v31, %v8030_v30 }
 0x1b3   :  { %v8034_v32 = vpop.permute.xlu0 %566  ;;  %v565_v33 = vpop.permute.xlu1 %564 }
 0x1b4   :  { %v588_v63 = vadd.f32 %v565_v33, %v507_v58  ;;  %v368_v58 = vadd.f32 %v357_v10, %v319_v48  ;;  %v497_v10 = vsel %vm494_vm3, %v485_v16, %v8028_v27  ;;  %v408_v48 = vsel %vm404_vm2, %v8024_v11, %v8032_v31 }
 0x1b5   :  { %vm3788_vm2 = vcmask 89088  }
 0x1b6   :  { %v417_v28 = vadd.f32 %v406_v52, %v368_v58 }
 0x1b7   :  { %v8036_v34 = vpop.permute.xlu0 %488  ;;  %v8038_v38 = vpop.permute.xlu1 %568 }
 0x1b8   :  { %v498_v8 = vsel %vm494_vm3, %v8028_v27, %v8036_v34 }
 0x1bb   :  { %v8040_v39 = vpop.permute.xlu0 %613  ;;  %v8042_v42 = vpop.permute.xlu1 %490 }
 0x1bc   :  { %v637_v3 = vadd.f32 %v8040_v39, %v588_v63 }
 0x1bf   :  { %v8044_v43 = vpop.permute.xlu0 %617  ;;  %v8046_v13 = vpop.permute.xlu1 %615 }
 0x1c0   :  { %v627_v31 = vsel %vm625_vm5, %v8046_v13, %v8044_v43 }
 0x1c3   :  { %v8048_v44 = vpop.permute.xlu0 %572  ;;  %v8050_v45 = vpop.permute.xlu1 %570 }
 0x1c4   :  { %v579_v27 = vsel %vm576_vm4, %v8038_v38, %v8050_v45 }
 0x1c7   :  { %v8052_v47 = vpop.permute.xlu0 %664  ;;  %v8054_v37 = vpop.permute.xlu1 %662 }
 0x1c8   :  { %v686_v26 = vadd.f32 %v8054_v37, %v637_v3  ;;  %v369_v3 = vadd.f32 %v358_v51, %v320_v50  ;;  %v577_v50 = vsel %vm576_vm4, %v565_v33, %v8034_v32  ;;  %v626_v33 = vsel %vm625_vm5, %v8040_v39, %v8046_v13 }
 0x1c9   :  { %v675_v39 = vsel %vm674_vm6, %v8054_v37, %v8052_v47 }
 0x1ca   :  { %v418_v7 = vadd.f32 %v407_v29, %v369_v3  ;;  %v419_v29 = vadd.f32 %v408_v48, %v370_v14  ;;  %v499_v14 = vsel %vm494_vm3, %v8036_v34, %v8042_v42  ;;  %v580_v34 = vsel %vm576_vm4, %v8050_v45, %v8048_v44 }
 0x1cb   :  { %v8057_v46 = vpop.permute.xlu0 %619  ;;  %v8059_v49 = vpop.permute.xlu1 %666 }
 0x1cc   :  { %v509_v58 = vadd.f32 %v497_v10, %v418_v7  ;;  %v676_v13 = vsel %vm674_vm6, %v8052_v47, %v8059_v49  ;;  %v510_v10 = vadd.f32 %v498_v8, %v419_v29 }
 0x1cf   :  { %v8065_v53 = vpop.permute.xlu0 %711  ;;  %v8067_v55 = vpop.permute.xlu1 %621 }
 0x1d0   :  { %v735_v57 = vadd.f32 %v8065_v53, %v686_v26  ;;  %v496_v26 = vsel %vm494_vm3, %v483_v25, %v485_v16  ;;  %v578_v16 = vsel %vm576_vm4, %v8034_v32, %v8038_v38  ;;  %v628_v38 = vsel %vm625_vm5, %v8044_v43, %v8057_v46 }
 0x1d1   :  { %v508_v52 = vadd.f32 %v496_v26, %v417_v28  ;;  %v590_v3 = vadd.f32 %v578_v16, %v509_v58 }
 0x1d3   :  { %v8069_v60 = vpop.permute.xlu0 %715  ;;  %v8071_v61 = vpop.permute.xlu1 %713  ;;  %v589_v54 = vadd.f32 %v577_v50, %v508_v52  ;;  %v639_v48 = vadd.f32 %v627_v31, %v590_v3  ;;  %v591_v52 = vadd.f32 %v579_v27, %v510_v10 }
 0x1d4   :  { %v724_v37 = vsel %vm723_vm7, %v8065_v53, %v8071_v61  ;;  %v725_v47 = vsel %vm723_vm7, %v8071_v61, %v8069_v60  ;;  %v629_v53 = vsel %vm625_vm5, %v8057_v46, %v8067_v55  ;;  %v323_v61 = vmul.f32 %v7897_v40, %v8021_v4 }
 0x1d5   :  { %v638_v26 = vadd.f32 %v626_v33, %v589_v54 }
 0x1d7   :  { %v8074_v22 = vpop.permute.xlu0 %492  ;;  %v8076_v6 = vpop.permute.xlu1 %668 }
 0x1d8   :  { %v677_v43 = vsel %vm674_vm6, %v8059_v49, %v8076_v6  ;;  %v500_v40 = vsel %vm494_vm3, %v8042_v42, %v8074_v22 }
 0x1db   :  { %v8091_v63 = vpop.permute.xlu0 %670  ;;  %v761_v21 = vpop.permute.xlu1 %760 }
 0x1dc   :  { %v784_v9 = vadd.f32 %v761_v21, %v735_v57  ;;  %v371_v57 = vadd.f32 %v360_v41, %v322_v5  ;;  %v678_v46 = vsel %vm674_vm6, %v8076_v6, %v8091_v63 }
 0x1de   :  { %v796_v12 = vadd.f32 %v8000_v56, %v784_v9  ;;  %v420_v32 = vadd.f32 %v409_v20, %v371_v57  ;;  %v688_v20 = vadd.f32 %v676_v13, %v639_v48 }
 0x1df   :  { %v763_v25 = vpop.permute.xlu0 %762  ;;  %v765_v51 = vpop.permute.xlu1 %764 }
 0x1e0   :  { %v802_v11 = vmax.f32 %v796_v12, 0.0  ;;  %v687_v12 = vadd.f32 %v675_v39, %v638_v26  ;;  %v511_v50 = vadd.f32 %v499_v14, %v420_v32  ;;  %v773_v45 = vsel %vm772_vm8, %v761_v21, %v763_v25 }
 0x1e1   :  { %v774_v57 = vsel %vm772_vm8, %v763_v25, %v765_v51  ;;  %v640_v21 = vadd.f32 %v628_v38, %v591_v52  ;;  %v737_v29 = vadd.f32 %v725_v47, %v688_v20  ;;  %v372_v25 = vadd.f32 %v8026_v18, %v323_v61 }
 0x1e2   :  { %v812_v9 = vmul.f32 %v8006_v59, %v802_v11  ;;  %v736_v11 = vadd.f32 %v724_v37, %v687_v12  ;;  %v592_v58 = vadd.f32 %v580_v34, %v511_v50 }
 0x1e3   :  { %v575_v5 = vpop.permute.xlu0 %574  ;;  %v718_v28 = vpop.permute.xlu1 %717  ;;  %v689_v31 = vadd.f32 %v677_v43, %v640_v21  ;;  %v421_v6 = vadd.f32 %v8030_v30, %v372_v25 }
 0x1e4   :  { %v822_v41 = vadd.f32 %v8011_v62, %v812_v9  ;;  %v785_v54 = vadd.f32 %v773_v45, %v736_v11  ;;  %v726_v49 = vsel %vm723_vm7, %v8069_v60, %v718_v28  ;;  %v641_v8 = vadd.f32 %v629_v53, %v592_v58 }
 0x1e5   :  { %v786_v9 = vadd.f32 %v774_v57, %v737_v29  ;;  %v738_v39 = vadd.f32 %v726_v49, %v689_v31  ;;  %v581_v18 = vsel %vm576_vm4, %v8048_v44, %v575_v5  ;;  %v512_v26 = vadd.f32 %v500_v40, %v421_v6 }
 0x1e6   :  { %v877_v7 = vmul.f32 %v8017_v2, %v822_v41  ;;  %v690_v14 = vadd.f32 %v678_v46, %v641_v8  ;;  %v797_v60 = vadd.f32 %v8000_v56, %v785_v54 }
 0x1e7   :  { %v720_v16 = vpop.permute.xlu0 %719  ;;  %v767_v33 = vpop.permute.xlu1 %766  ;;  %v798_v27 = vadd.f32 %v8000_v56, %v786_v9 }
 0x1e8   :  { %889 = vrot.lane.b32.xlu1 %v877_v7, %s7630_s3  ;;  %v727_v4 = vsel %vm723_vm7, %v718_v28, %v720_v16  ;;  %v775_v3 = vsel %vm772_vm8, %v765_v51, %v767_v33  ;;  %v593_v51 = vadd.f32 %v581_v18, %v512_v26  ;;  %v803_v28 = vmax.f32 %v797_v60, 0.0 }
 0x1e9   :  { %v739_v13 = vadd.f32 %v727_v4, %v690_v14  ;;  %v787_v41 = vadd.f32 %v775_v3, %v738_v39  ;;  %v804_v48 = vmax.f32 %v798_v27, 0.0 }
 0x1eb   :  { %v624_v32 = vpop.permute.xlu0 %623  ;;  %v799_v34 = vadd.f32 %v8000_v56, %v787_v41  ;;  %v722_v12 = vpop.permute.xlu1 %721  ;;  %v814_v11 = vmul.f32 %v8006_v59, %v804_v48 }
 0x1ec   :  { %v630_v42 = vsel %vm625_vm5, %v8067_v55, %v624_v32  ;;  %v728_v7 = vsel %vm723_vm7, %v720_v16, %v722_v12  ;;  %v813_v55 = vmul.f32 %v8006_v59, %v803_v28  ;;  %vm4369_vm5 = vcmask 965632  }
 0x1ed   :  { %v642_v37 = vadd.f32 %v630_v42, %v593_v51  ;;  %v805_v50 = vmax.f32 %v799_v34, 0.0  ;;  %v824_v21 = vadd.f32 %v8011_v62, %v814_v11  ;;  %vm5907_vm7 = vcmask 56320  }
 0x1ee   :  { %v823_v61 = vadd.f32 %v8011_v62, %v813_v55 }
 0x1ef   :  { %v769_v10 = vpop.permute.xlu0 %768  ;;  %v859_v53 = vpop.permute.xlu1 %858  ;;  %v815_v16 = vmul.f32 %v8006_v59, %v805_v50 }
 0x1f0   :  { %v776_v22 = vsel %vm772_vm8, %v767_v33, %v769_v10 }
 0x1f1   :  { %v788_v30 = vadd.f32 %v776_v22, %v739_v13  ;;  %v825_v9 = vadd.f32 %v8011_v62, %v815_v16 }
 0x1f3   :  { %v800_v44 = vadd.f32 %v8000_v56, %v788_v30  ;;  %v673_v5 = vpop.permute.xlu0 %672  ;;  %v863_v25 = vpop.permute.xlu1 %862  ;;  %v3139_v30 = vld [vmem:[#allocation13] sm:$0xff] }
 0x1f4   :  { %v679_v38 = vsel %vm674_vm6, %v8091_v63, %v673_v5  ;;  %vm4467_vm6 = vcmask 957440  }
 0x1f5   :  { %v691_v47 = vadd.f32 %v679_v38, %v642_v37  ;;  %v806_v52 = vmax.f32 %v800_v44, 0.0 }
 0x1f7   :  { %v771_v20 = vpop.permute.xlu0 %770  ;;  %v740_v45 = vadd.f32 %v728_v7, %v691_v47  ;;  %v816_v29 = vmul.f32 %v8006_v59, %v806_v52 }
 0x1f8   :  { %v777_v43 = vsel %vm772_vm8, %v769_v10, %v771_v20  ;;  %vm6004_vm8 = vcmask 39936  }
 0x1f9   :  { %v789_v57 = vadd.f32 %v777_v43, %v740_v45  ;;  %v826_v32 = vadd.f32 %v8011_v62, %v816_v29  ;;  %v8339_v29 = vld [vmem:[#allocation3] sm:$0xff] }
 0x1fb   :  { %v801_v58 = vadd.f32 %v8000_v56, %v789_v57  ;;  %v857_v63 = vpop.permute.xlu0 %856 }
 0x1fc   :  { %v866_v33 = vsel %vm576_vm4, %v8017_v2, %v857_v63  ;;  %v867_v46 = vsel %vm576_vm4, %v857_v63, %v859_v53 }
 0x1fd   :  { %v807_v54 = vmax.f32 %v801_v58, 0.0  ;;  %v878_v49 = vmul.f32 %v866_v33, %v823_v61  ;;  %v879_v8 = vmul.f32 %v867_v46, %v824_v21  ;;  %v927_v61 = vld [vmem:[#allocation12 + $0x8] sm:$0xff] }
 0x1ff   :  { %v861_v31 = vpop.permute.xlu0 %860  ;;  %891 = vrot.lane.b32.xlu0 %v878_v49, %s7630_s3  ;;  %893 = vrot.lane.b32.xlu1 %v879_v8, %s7630_s3  ;;  %v817_v56 = vmul.f32 %v8006_v59, %v807_v54 }
 0x200   :  { %v868_v40 = vsel %vm576_vm4, %v859_v53, %v861_v31  ;;  %v869_v2 = vsel %vm576_vm4, %v861_v31, %v863_v25 }
 0x201   :  { %v880_v4 = vmul.f32 %v868_v40, %v825_v9  ;;  %v881_v3 = vmul.f32 %v869_v2, %v826_v32  ;;  %v827_v14 = vadd.f32 %v8011_v62, %v817_v56 }
 0x203   :  { %v865_v6 = vpop.permute.xlu0 %864  ;;  %895 = vrot.lane.b32.xlu0 %v880_v4, %s7630_s3  ;;  %897 = vrot.lane.b32.xlu1 %v881_v3, %s7630_s3 }
 0x204   :  { %v870_v39 = vsel %vm576_vm4, %v863_v25, %v865_v6  ;;  %v925_v25 = vld [vmem:[#allocation12] sm:$0xff] }
 0x205   :  { %v882_v59 = vmul.f32 %v870_v39, %v827_v14  ;;  %v1414_v14 = vld [vmem:[#allocation12 + $0x10] sm:$0xff] }
 0x207   :  { %899 = vrot.lane.b32.xlu0 %v882_v59, %s7630_s3  ;;  %934 = vrot.lane.b32.xlu1 %v7618_v0, %s7631_s6 }
 0x20b   :  { %1174 = vrot.lane.b32.xlu1 %v7618_v0, %s7630_s3 }
 0x20f   :  { %1415 = vrot.lane.b32.xlu1 %v7618_v0, %s7632_s26 }
 0x213   :  { %1677 = vrot.lane.b32.xlu1 %v7618_v0, %s7633_s27 }
 0x25a   :  { %v890_v62 = vpop.permute.xlu1 %889 }
 0x271   :  { %v892_v60 = vpop.permute.xlu0 %891  ;;  %v894_v18 = vpop.permute.xlu1 %893 }
 0x272   :  { %v8216_v26 = vsel %vm901_vm9, %v890_v62, %v892_v60  ;;  %v8219_v27 = vsel %vm901_vm9, %v892_v60, %v894_v18 }
 0x273   :  { %938 = vrot.lane.b32.xlu0 %v8219_v27, %s7631_s6 }
 0x275   :  { %v896_v13 = vpop.permute.xlu0 %895  ;;  %v898_v41 = vpop.permute.xlu1 %897 }
 0x276   :  { %v8224_v10 = vsel %vm901_vm9, %v894_v18, %v896_v13  ;;  %v8227_v0 = vsel %vm901_vm9, %v896_v13, %v898_v41 }
 0x277   :  { %940 = vrot.lane.b32.xlu0 %v8224_v10, %s7631_s6 }
 0x279   :  { %v900_v42 = vpop.permute.xlu0 %899  ;;  %v935_v28 = vpop.permute.xlu1 %934 }
 0x27a   :  { %v8232_v22 = vsel %vm901_vm9, %v898_v41, %v900_v42  ;;  %918 = vst.msk [vmem:[#allocation2 + $0x30] sm:$0xff] %vm241_vm0, %v900_v42 }
 0x27b   :  { %1176 = vrot.lane.b32.xlu0 %v8216_v26, %s7630_s3 }
 0x27d   :  { %v1175_v48 = vpop.permute.xlu1 %1174 }
 0x27f   :  { %944 = vrot.lane.b32.xlu0 %v8232_v22, %s7631_s6 }
 0x281   :  { %v8239_v51 = vld [vmem:[#allocation2 + $0x30] sm:$0xff]  ;;  %v1416_v37 = vpop.permute.xlu1 %1415 }
 0x282   :  { %1689 = vrot.lane.b32.xlu1 %v8239_v51, %s7633_s27 }
 0x283   :  { %1180 = vrot.lane.b32.xlu0 %v8224_v10, %s7630_s3 }
 0x285   :  { %v8320_v5 = vpop.permute.xlu1 %1677 }
 0x286   :  { %2162 = vrot.lane.b32.xlu1 %v8239_v51, %s7623_s4 }
 0x287   :  { %1184 = vrot.lane.b32.xlu0 %v8232_v22, %s7630_s3 }
 0x28a   :  { %2409 = vrot.lane.b32.xlu1 %v8239_v51, %s7634_s8 }
 0x28b   :  { %1419 = vrot.lane.b32.xlu0 %v8219_v27, %s7632_s26 }
 0x28e   :  { %2657 = vrot.lane.b32.xlu1 %v8239_v51, %s7625_s2 }
 0x28f   :  { %1423 = vrot.lane.b32.xlu0 %v8227_v0, %s7632_s26 }
 0x292   :  { %936 = vrot.lane.b32.xlu1 %v8216_v26, %s7631_s6 }
 0x293   :  { %1679 = vrot.lane.b32.xlu0 %v8216_v26, %s7633_s27 }
 0x296   :  { %942 = vrot.lane.b32.xlu1 %v8227_v0, %s7631_s6 }
 0x297   :  { %1425 = vrot.lane.b32.xlu0 %v8232_v22, %s7632_s26 }
 0x29a   :  { %1178 = vrot.lane.b32.xlu1 %v8219_v27, %s7630_s3 }
 0x29b   :  { %1683 = vrot.lane.b32.xlu0 %v8224_v10, %s7633_s27 }
 0x29e   :  { %1182 = vrot.lane.b32.xlu1 %v8227_v0, %s7630_s3 }
 0x29f   :  { %1687 = vrot.lane.b32.xlu0 %v8232_v22, %s7633_s27 }
 0x2a2   :  { %1417 = vrot.lane.b32.xlu1 %v8216_v26, %s7632_s26 }
 0x2a3   :  { %2154 = vrot.lane.b32.xlu0 %v8219_v27, %s7623_s4 }
 0x2a6   :  { %1421 = vrot.lane.b32.xlu1 %v8224_v10, %s7632_s26 }
 0x2a7   :  { %2152 = vrot.lane.b32.xlu0 %v8216_v26, %s7623_s4 }
 0x2aa   :  { %1681 = vrot.lane.b32.xlu1 %v8219_v27, %s7633_s27 }
 0x2ab   :  { %2160 = vrot.lane.b32.xlu0 %v8232_v22, %s7623_s4 }
 0x2ae   :  { %1685 = vrot.lane.b32.xlu1 %v8227_v0, %s7633_s27 }
 0x2af   :  { %2401 = vrot.lane.b32.xlu0 %v8219_v27, %s7634_s8 }
 0x2b2   :  { %2156 = vrot.lane.b32.xlu1 %v8224_v10, %s7623_s4 }
 0x2b3   :  { %2405 = vrot.lane.b32.xlu0 %v8227_v0, %s7634_s8 }
 0x2b6   :  { %2158 = vrot.lane.b32.xlu1 %v8227_v0, %s7623_s4 }
 0x2b7   :  { %2399 = vrot.lane.b32.xlu0 %v8216_v26, %s7634_s8 }
 0x2ba   :  { %2403 = vrot.lane.b32.xlu1 %v8224_v10, %s7634_s8 }
 0x2bb   :  { %2651 = vrot.lane.b32.xlu0 %v8224_v10, %s7625_s2 }
 0x2be   :  { %2407 = vrot.lane.b32.xlu1 %v8232_v22, %s7634_s8 }
 0x2bf   :  { %2647 = vrot.lane.b32.xlu0 %v8216_v26, %s7625_s2 }
 0x2c2   :  { %2649 = vrot.lane.b32.xlu1 %v8219_v27, %s7625_s2 }
 0x2c3   :  { %2655 = vrot.lane.b32.xlu0 %v8232_v22, %s7625_s2 }
 0x2c6   :  { %2653 = vrot.lane.b32.xlu1 %v8227_v0, %s7625_s2 }
 0x2c7   :  { %2896 = vrot.lane.b32.xlu0 %v8219_v27, %s7622_s30 }
 0x2ca   :  { %2898 = vrot.lane.b32.xlu1 %v8224_v10, %s7622_s30 }
 0x2cb   :  { %2900 = vrot.lane.b32.xlu0 %v8227_v0, %s7622_s30 }
 0x2ce   :  { %2902 = vrot.lane.b32.xlu1 %v8232_v22, %s7622_s30 }
 0x2cf   :  { %2894 = vrot.lane.b32.xlu0 %v8216_v26, %s7622_s30 }
 0x2d2   :  { %2904 = vrot.lane.b32.xlu1 %v8239_v51, %s7622_s30  ;;  %s7639_s30 = smov 118  }
 0x2d3   :  { %3142 = vperm.xlu0 %7271, %v3139_v30  }
 0x2d6   :  { %3158 = vperm.xlu1 %7275, %v3139_v30  }
 0x2d7   :  { %7276 = vset.pattern.permute.xlu0 %v9035_v17 }
 0x2d8   :  { %3168 = vperm.xlu0 %7276, %v3139_v30   ;;  %v1669_v30 = vld [vmem:[#allocation12 + $0x18] sm:$0xff] }
 0x2da   :  { %7298 = vset.pattern.permute.xlu1 %v9037_v1 }
 0x2dc   :  { %7297 = vset.pattern.permute.xlu0 %v9037_v1 }
 0x2e5   :  { %v939_v34 = vpop.permute.xlu0 %938 }
 0x2e9   :  { %v941_v12 = vpop.permute.xlu0 %940 }
 0x2ea   :  { %v949_v46 = vsel %vm946_vm10, %v939_v34, %v941_v12 }
 0x2ed   :  { %v1177_v44 = vpop.permute.xlu0 %1176 }
 0x2ee   :  { %v1186_v31 = vsel %vm901_vm9, %v1175_v48, %v1177_v44 }
 0x2f1   :  { %v945_v38 = vpop.permute.xlu0 %944 }
 0x2f2   :  { %1133 = vmatprep.subr.mxu0 %v945_v38 }
 0x2f4   :  { %v8322_v47 = vpop.permute.xlu1 %1689 }
 0x2f5   :  { %v1181_v7 = vpop.permute.xlu0 %1180 }
 0x2f8   :  { %v8324_v55 = vpop.permute.xlu1 %2162 }
 0x2f9   :  { %v1185_v50 = vpop.permute.xlu0 %1184 }
 0x2fc   :  { %v8326_v52 = vpop.permute.xlu1 %2409 }
 0x2fd   :  { %v8328_v20 = vpop.permute.xlu0 %1419 }
 0x300   :  { %v8330_v45 = vpop.permute.xlu1 %2657 }
 0x301   :  { %v1424_v53 = vpop.permute.xlu0 %1423 }
 0x304   :  { %v937_v11 = vpop.permute.xlu1 %936 }
 0x305   :  { %v948_v43 = vsel %vm946_vm10, %v937_v11, %v939_v34  ;;  %v947_v57 = vsel %vm946_vm10, %v935_v28, %v937_v11  ;;  %v8334_v58 = vpop.permute.xlu0 %1679 }
 0x306   :  { %991 = vmatprep.subr.mxu1 %v948_v43  ;;  %v1692_v48 = vsel %vm1691_vm12, %v8320_v5, %v8334_v58 }
 0x307   :  { %992 = vmatpush1.msra.mxu1 %v947_v57 }
 0x308   :  { %v943_v63 = vpop.permute.xlu1 %942  ;;  %6977 = vmatmul.mubr.msk.f32.vlgmr.msra.gmra.mxu1 %vm241_vm0, %v927_v61 }
 0x309   :  { %v950_v21 = vsel %vm946_vm10, %v941_v12, %v943_v63  ;;  %v951_v16 = vsel %vm946_vm10, %v943_v63, %v945_v38  ;;  %1096 = vmatprep.mubr.f32.mxu1 %v8339_v29  ;;  %v1426_v33 = vpop.permute.xlu0 %1425  ;;  %vm6936_vm10 = vcmask 9216  }
 0x30a   :  { %1062 = vmatprep.subr.mxu1 %v950_v21  ;;  %1134 = vmatpush1.msra.mxu0 %v951_v16  ;;  %v1432_v62 = vsel %vm1427_vm11, %v1424_v53, %v1426_v33 }
 0x30b   :  { %1063 = vmatpush1.msra.mxu1 %v949_v46  ;;  %6979 = vmatmul.mubr.msk.f32.vlgmr.msra.gmra.mxu0 %vm241_vm0, %v927_v61 }
 0x30c   :  { %v1179_v54 = vpop.permute.xlu1 %1178  ;;  %6978 = vmatmul.mubr.msk.f32.vlgmr.msra.gmra.mxu1 %vm241_vm0, %v927_v61  ;;  %1335 = vmatprep.mubr.f32.mxu0 %v8339_v29 }
 0x30d   :  { %v1187_v49 = vsel %vm901_vm9, %v1177_v44, %v1179_v54  ;;  %1264 = vmatprep.mubr.f32.mxu1 %v8339_v29  ;;  %v1684_v8 = vpop.permute.xlu0 %1683  ;;  %v1188_v2 = vsel %vm901_vm9, %v1179_v54, %v1181_v7 }
 0x30e   :  { %1230 = vmatprep.subr.mxu1 %v1187_v49 }
 0x30f   :  { %1231 = vmatpush1.msra.mxu1 %v1186_v31 }
 0x310   :  { %1372 = vmatprep.subr.mxu1 %v1185_v50  ;;  %v1183_v56 = vpop.permute.xlu1 %1182  ;;  %6980 = vmatmul.mubr.msk.f32.vlgmr.msra.gmra.mxu1 %vm241_vm0, %v925_v25 }
 0x311   :  { %v1189_v9 = vsel %vm901_vm9, %v1181_v7, %v1183_v56  ;;  %v1190_v32 = vsel %vm901_vm9, %v1183_v56, %v1185_v50  ;;  %1406 = vmatprep.mubr.f32.mxu1 %v8339_v29  ;;  %v1688_v40 = vpop.permute.xlu0 %1687  ;;  %v1927_v50 = vld [vmem:[#allocation12 + $0x20] sm:$0xff]  ;;  %vm6820_vm9 = vcmask 582656  }
 0x312   :  { %1301 = vmatprep.subr.mxu0 %v1189_v9  ;;  %1373 = vmatpush1.msra.mxu1 %v1190_v32  ;;  %v1697_v34 = vsel %vm1691_vm12, %v1688_v40, %v8322_v47 }
 0x313   :  { %1302 = vmatpush1.msra.mxu0 %v1188_v2 }
 0x314   :  { %v1418_v4 = vpop.permute.xlu1 %1417  ;;  %6981 = vmatmul.mubr.msk.f32.vlgmr.msra.gmra.mxu0 %vm241_vm0, %v925_v25  ;;  %6982 = vmatmul.mubr.msk.f32.vlgmr.msra.gmra.mxu1 %vm241_vm0, %v925_v25 }
 0x315   :  { %v1429_v3 = vsel %vm1427_vm11, %v1418_v4, %v8328_v20  ;;  %v1428_v6 = vsel %vm1427_vm11, %v1416_v37, %v1418_v4  ;;  %1506 = vmatprep.mubr.f32.mxu0 %v8339_v29  ;;  %1577 = vmatprep.mubr.f32.mxu1 %v8339_v29  ;;  %v2155_v39 = vpop.permute.xlu0 %2154 }
 0x316   :  { %1472 = vmatprep.subr.mxu0 %v1429_v3 }
 0x317   :  { %1473 = vmatpush1.msra.mxu0 %v1428_v6 }
 0x318   :  { %1614 = vmatprep.subr.mxu0 %v1426_v33  ;;  %v1422_v59 = vpop.permute.xlu1 %1421  ;;  %6983 = vmatmul.mubr.msk.f32.vlgmr.msra.gmra.mxu0 %vm241_vm0, %v1414_v14 }
 0x319   :  { %1615 = vmatpush1.msra.mxu0 %v1432_v62  ;;  %v1431_v60 = vsel %vm1427_vm11, %v1422_v59, %v1424_v53  ;;  %v1430_v18 = vsel %vm1427_vm11, %v8328_v20, %v1422_v59  ;;  %1648 = vmatprep.mubr.f32.mxu0 %v8339_v29  ;;  %v2153_v13 = vpop.permute.xlu0 %2152  ;;  %vm6934_vm11 = vcmask 15360  }
 0x31a   :  { %1543 = vmatprep.subr.mxu1 %v1431_v60 }
 0x31b   :  { %1544 = vmatpush1.msra.mxu1 %v1430_v18 }
 0x31c   :  { %6984 = vmatmul.mubr.msk.f32.vlgmr.msra.gmra.mxu1 %vm241_vm0, %v1414_v14  ;;  %v1682_v41 = vpop.permute.xlu1 %1681  ;;  %6985 = vmatmul.mubr.msk.f32.vlgmr.msra.gmra.mxu0 %vm241_vm0, %v1414_v14  ;;  %v2893_v14 = vld [vmem:[#allocation12 + $0x40] sm:$0xff] }
 0x31d   :  { %v1693_v42 = vsel %vm1691_vm12, %v8334_v58, %v1682_v41  ;;  %1771 = vmatprep.mubr.f32.mxu1 %v8339_v29  ;;  %1842 = vmatprep.mubr.f32.mxu0 %v8339_v29  ;;  %v2161_v28 = vpop.permute.xlu0 %2160  ;;  %v1694_v7 = vsel %vm1691_vm12, %v1682_v41, %v1684_v8 }
 0x31e   :  { %1737 = vmatprep.subr.mxu1 %v1693_v42 }
 0x31f   :  { %1738 = vmatpush1.msra.mxu1 %v1692_v48 }
 0x320   :  { %6986 = vmatmul.mubr.msk.f32.vlgmr.msra.gmra.mxu1 %vm241_vm0, %v1669_v30  ;;  %1879 = vmatprep.subr.mxu1 %v1697_v34  ;;  %v1686_v37 = vpop.permute.xlu1 %1685 }
 0x321   :  { %v1695_v12 = vsel %vm1691_vm12, %v1684_v8, %v1686_v37  ;;  %v1696_v44 = vsel %vm1691_vm12, %v1686_v37, %v1688_v40  ;;  %1913 = vmatprep.mubr.f32.mxu1 %v8339_v29  ;;  %v2402_v38 = vpop.permute.xlu0 %2401  ;;  %v2646_v8 = vld [vmem:[#allocation12 + $0x38] sm:$0xff] }
 0x322   :  { %1808 = vmatprep.subr.mxu0 %v1695_v12  ;;  %1880 = vmatpush1.msra.mxu1 %v1696_v44 }
 0x323   :  { %1809 = vmatpush1.msra.mxu0 %v1694_v7  ;;  %2032 = vmatprep.subr.mxu1 %v8227_v0 }
 0x324   :  { %6987 = vmatmul.mubr.msk.f32.vlgmr.msra.gmra.mxu0 %vm241_vm0, %v1669_v30  ;;  %6988 = vmatmul.mubr.msk.f32.vlgmr.msra.gmra.mxu1 %vm241_vm0, %v1669_v30  ;;  %v2157_v5 = vpop.permute.xlu1 %2156 }
 0x325   :  { %1961 = vmatprep.subr.mxu0 %v8219_v27  ;;  %2033 = vmatpush1.msra.mxu1 %v8224_v10  ;;  %v2165_v47 = vsel %vm355_vm1, %v2155_v39, %v2157_v5  ;;  %v2406_v20 = vpop.permute.xlu0 %2405  ;;  %v2164_v27 = vsel %vm355_vm1, %v2153_v13, %v2155_v39 }
 0x326   :  { %1962 = vmatpush1.msra.mxu0 %v8216_v26  ;;  %2208 = vmatprep.subr.mxu1 %v2165_v47  ;;  %v2151_v26 = vld [vmem:[#allocation12 + $0x28] sm:$0xff] }
 0x327   :  { %2103 = vmatprep.subr.mxu0 %v8239_v51  ;;  %1995 = vmatprep.mubr.f32.mxu0 %v8339_v29 }
 0x328   :  { %2066 = vmatprep.mubr.f32.mxu1 %v8339_v29  ;;  %6989 = vmatmul.mubr.msk.f32.vlgmr.msra.gmra.mxu0 %vm241_vm0, %v1927_v50  ;;  %v2159_v0 = vpop.permute.xlu1 %2158 }
 0x329   :  { %6990 = vmatmul.mubr.msk.f32.vlgmr.msra.gmra.mxu1 %vm241_vm0, %v1927_v50  ;;  %2104 = vmatpush1.msra.mxu0 %v8232_v22  ;;  %v2167_v10 = vsel %vm355_vm1, %v2159_v0, %v2161_v28  ;;  %v2400_v53 = vpop.permute.xlu0 %2399  ;;  %v2166_v51 = vsel %vm355_vm1, %v2157_v5, %v2159_v0  ;;  %v2168_v22 = vsel %vm355_vm1, %v2161_v28, %v8324_v55 }
 0x32a   :  { %2209 = vmatpush1.msra.mxu1 %v2164_v27  ;;  %2279 = vmatprep.subr.mxu0 %v2167_v10  ;;  %v2412_v58 = vsel %vm2411_vm13, %v2400_v53, %v2402_v38 }
 0x32b   :  { %2350 = vmatprep.subr.mxu1 %v8324_v55  ;;  %2137 = vmatprep.mubr.f32.mxu0 %v8339_v29  ;;  %v2398_v55 = vld [vmem:[#allocation12 + $0x30] sm:$0xff] }
 0x32c   :  { %2242 = vmatprep.mubr.f32.mxu1 %v8339_v29  ;;  %6991 = vmatmul.mubr.msk.f32.vlgmr.msra.gmra.mxu0 %vm241_vm0, %v1927_v50  ;;  %v2404_v11 = vpop.permute.xlu1 %2403 }
 0x32d   :  { %6992 = vmatmul.mubr.msk.f32.vlgmr.msra.gmra.mxu1 %vm241_vm0, %v2151_v26  ;;  %2280 = vmatpush1.msra.mxu0 %v2166_v51  ;;  %v2413_v43 = vsel %vm2411_vm13, %v2402_v38, %v2404_v11  ;;  %v2652_v57 = vpop.permute.xlu0 %2651  ;;  %v2414_v16 = vsel %vm2411_vm13, %v2404_v11, %v2406_v20 }
 0x32e   :  { %2351 = vmatpush1.msra.mxu1 %v2168_v22  ;;  %2456 = vmatprep.subr.mxu0 %v2413_v43 }
 0x32f   :  { %2313 = vmatprep.mubr.f32.mxu0 %v8339_v29  ;;  %2384 = vmatprep.mubr.f32.mxu1 %v8339_v29 }
 0x330   :  { %6993 = vmatmul.mubr.msk.f32.vlgmr.msra.gmra.mxu0 %vm241_vm0, %v2151_v26  ;;  %v2408_v61 = vpop.permute.xlu1 %2407 }
 0x331   :  { %6994 = vmatmul.mubr.msk.f32.vlgmr.msra.gmra.mxu1 %vm241_vm0, %v2151_v26  ;;  %v2415_v63 = vsel %vm2411_vm13, %v2406_v20, %v2408_v61  ;;  %2457 = vmatpush1.msra.mxu0 %v2412_v58  ;;  %v2648_v21 = vpop.permute.xlu0 %2647  ;;  %v2416_v46 = vsel %vm2411_vm13, %v2408_v61, %v8326_v52 }
 0x332   :  { %2527 = vmatprep.subr.mxu1 %v2415_v63  ;;  %2490 = vmatprep.mubr.f32.mxu0 %v8339_v29 }
 0x333   :  { %2528 = vmatpush1.msra.mxu1 %v2414_v16  ;;  %2561 = vmatprep.mubr.f32.mxu1 %v8339_v29 }
 0x334   :  { %6995 = vmatmul.mubr.msk.f32.vlgmr.msra.gmra.mxu0 %vm241_vm0, %v2398_v55  ;;  %2598 = vmatprep.subr.mxu0 %v8326_v52  ;;  %v2650_v33 = vpop.permute.xlu1 %2649 }
 0x335   :  { %6996 = vmatmul.mubr.msk.f32.vlgmr.msra.gmra.mxu1 %vm241_vm0, %v2398_v55  ;;  %2599 = vmatpush1.msra.mxu0 %v2416_v46  ;;  %v2660_v54 = vsel %vm494_vm3, %v2650_v33, %v2652_v57  ;;  %v2659_v49 = vsel %vm494_vm3, %v2648_v21, %v2650_v33  ;;  %v2656_v25 = vpop.permute.xlu0 %2655 }
 0x336   :  { %2632 = vmatprep.mubr.f32.mxu0 %v8339_v29  ;;  %2703 = vmatprep.subr.mxu1 %v2660_v54  ;;  %v2663_v56 = vsel %vm494_vm3, %v2656_v25, %v8330_v45 }
 0x337   :  { %2704 = vmatpush1.msra.mxu1 %v2659_v49  ;;  %2737 = vmatprep.mubr.f32.mxu1 %v8339_v29 }
 0x338   :  { %6997 = vmatmul.mubr.msk.f32.vlgmr.msra.gmra.mxu0 %vm241_vm0, %v2398_v55  ;;  %v2654_v31 = vpop.permute.xlu1 %2653  ;;  %2845 = vmatprep.subr.mxu1 %v8330_v45 }
 0x339   :  { %6998 = vmatmul.mubr.msk.f32.vlgmr.msra.gmra.mxu1 %vm241_vm0, %v2646_v8  ;;  %v2662_v52 = vsel %vm494_vm3, %v2654_v31, %v2656_v25  ;;  %v2661_v9 = vsel %vm494_vm3, %v2652_v57, %v2654_v31  ;;  %2808 = vmatprep.mubr.f32.mxu0 %v8339_v29  ;;  %v2897_v32 = vpop.permute.xlu0 %2896 }
 0x33a   :  { %2774 = vmatprep.subr.mxu0 %v2662_v52  ;;  %2846 = vmatpush1.msra.mxu1 %v2663_v56 }
 0x33b   :  { %2879 = vmatprep.mubr.f32.mxu1 %v8339_v29  ;;  %2775 = vmatpush1.msra.mxu0 %v2661_v9 }
 0x33c   :  { %v2899_v40 = vpop.permute.xlu1 %2898  ;;  %6999 = vmatmul.mubr.msk.f32.vlgmr.msra.gmra.mxu0 %vm241_vm0, %v2646_v8 }
 0x33d   :  { %7000 = vmatmul.mubr.msk.f32.vlgmr.msra.gmra.mxu1 %vm241_vm0, %v2646_v8  ;;  %v2907_v2 = vsel %vm576_vm4, %v2897_v32, %v2899_v40  ;;  %v2901_v4 = vpop.permute.xlu0 %2900  ;;  %2984 = vmatprep.mubr.f32.mxu0 %v8339_v29 }
 0x33e   :  { %2950 = vmatprep.subr.mxu0 %v2907_v2  ;;  %3055 = vmatprep.mubr.f32.mxu1 %v8339_v29  ;;  %v2908_v39 = vsel %vm576_vm4, %v2899_v40, %v2901_v4 }
 0x340   :  { %v2903_v45 = vpop.permute.xlu1 %2902 }
 0x341   :  { %v2909_v3 = vsel %vm576_vm4, %v2901_v4, %v2903_v45  ;;  %v2895_v6 = vpop.permute.xlu0 %2894 }
 0x342   :  { %3021 = vmatprep.subr.mxu1 %v2909_v3  ;;  %v2906_v59 = vsel %vm576_vm4, %v2895_v6, %v2897_v32 }
 0x343   :  { %3022 = vmatpush1.msra.mxu1 %v2908_v39  ;;  %2951 = vmatpush1.msra.mxu0 %v2906_v59 }
 0x344   :  { %v2905_v62 = vpop.permute.xlu1 %2904  ;;  %7002 = vmatmul.mubr.msk.f32.vlgmr.msra.gmra.mxu1 %vm241_vm0, %v2893_v14  ;;  %7001 = vmatmul.mubr.msk.f32.vlgmr.msra.gmra.mxu0 %vm241_vm0, %v2893_v14 }
 0x345   :  { %3092 = vmatprep.subr.mxu0 %v2905_v62  ;;  %v2910_v60 = vsel %vm576_vm4, %v2903_v45, %v2905_v62  ;;  %3126 = vmatprep.mubr.f32.mxu0 %v8339_v29  ;;  %vm4271_vm4 = vcmask 973824  }
 0x346   :  { %3093 = vmatpush1.msra.mxu0 %v2910_v60 }
 0x348   :  { %7003 = vmatmul.mubr.msk.f32.vlgmr.msra.gmra.mxu0 %vm241_vm0, %v2893_v14 }
 0x3c8   :  { %v1027_v18 = vpop.f32.mrf.mxu1 }
 0x3ca   :  { %v1029_v13 = vpop.f32.mrf.mxu1 }
 0x3cb   :  { %v1169_v42 = vpop.f32.mrf.mxu0 }
 0x3cc   :  { %v1098_v41 = vpop.f32.mrf.mxu1 }
 0x3cd   :  { %v1171_v28 = vpop.f32.mrf.mxu0 }
 0x3ce   :  { %v1100_v30 = vpop.f32.mrf.mxu1 }
 0x3d0   :  { %v1266_v48 = vpop.f32.mrf.mxu1 }
 0x3d1   :  { %v1267_v8 = vadd.f32 %v1266_v48, %v1027_v18 }
 0x3d2   :  { %v1268_v34 = vpop.f32.mrf.mxu1 }
 0x3d3   :  { %v1269_v9 = vadd.f32 %v1268_v34, %v1029_v13 }
 0x3d4   :  { %v1337_v37 = vpop.f32.mrf.mxu0  ;;  %v1408_v44 = vpop.f32.mrf.mxu1 }
 0x3d5   :  { %v1338_v31 = vadd.f32 %v1337_v37, %v1098_v41  ;;  %v1409_v62 = vadd.f32 %v1408_v44, %v1169_v42 }
 0x3d6   :  { %v1339_v12 = vpop.f32.mrf.mxu0  ;;  %v1410_v7 = vpop.f32.mrf.mxu1 }
 0x3d7   :  { %v1340_v32 = vadd.f32 %v1339_v12, %v1100_v30  ;;  %v1411_v18 = vadd.f32 %v1410_v7, %v1171_v28 }
 0x3d8   :  { %v1508_v38 = vpop.f32.mrf.mxu0 }
 0x3d9   :  { %v1655_v40 = vadd.f32 %v1508_v38, %v1267_v8 }
 0x3da   :  { %v1510_v5 = vpop.f32.mrf.mxu0 }
 0x3db   :  { %v1656_v3 = vadd.f32 %v1510_v5, %v1269_v9 }
 0x3dc   :  { %v1579_v47 = vpop.f32.mrf.mxu1  ;;  %v1650_v29 = vpop.f32.mrf.mxu0 }
 0x3dd   :  { %v1657_v2 = vadd.f32 %v1579_v47, %v1338_v31  ;;  %v1659_v41 = vadd.f32 %v1650_v29, %v1409_v62  ;;  %v3159_v31 = vpop.permute.xlu1 %3158 }
 0x3de   :  { %v1581_v50 = vpop.f32.mrf.mxu1  ;;  %v1652_v0 = vpop.f32.mrf.mxu0 }
 0x3df   :  { %v1658_v6 = vadd.f32 %v1581_v50, %v1340_v32  ;;  %v1660_v38 = vadd.f32 %v1652_v0, %v1411_v18 }
 0x3e0   :  { %v1773_v20 = vpop.f32.mrf.mxu1 }
 0x3e1   :  { %v1920_v14 = vadd.f32 %v1773_v20, %v1655_v40 }
 0x3e2   :  { %v1775_v27 = vpop.f32.mrf.mxu1 }
 0x3e3   :  { %v1921_v60 = vadd.f32 %v1775_v27, %v1656_v3 }
 0x3e4   :  { %v1844_v10 = vpop.f32.mrf.mxu0  ;;  %v1915_v53 = vpop.f32.mrf.mxu1 }
 0x3e5   :  { %v1922_v39 = vadd.f32 %v1844_v10, %v1657_v2  ;;  %v1924_v47 = vadd.f32 %v1915_v53, %v1659_v41 }
 0x3e6   :  { %v1846_v26 = vpop.f32.mrf.mxu0  ;;  %v1917_v51 = vpop.f32.mrf.mxu1 }
 0x3e7   :  { %v1923_v17 = vadd.f32 %v1846_v26, %v1658_v6  ;;  %v1925_v8 = vadd.f32 %v1917_v51, %v1660_v38 }
 0x3e8   :  { %v1997_v11 = vpop.f32.mrf.mxu0 }
 0x3e9   :  { %v2068_v22 = vpop.f32.mrf.mxu1  ;;  %v2144_v1 = vadd.f32 %v1997_v11, %v1920_v14 }
 0x3ea   :  { %v1999_v43 = vpop.f32.mrf.mxu0  ;;  %v2146_v35 = vadd.f32 %v2068_v22, %v1922_v39 }
 0x3eb   :  { %v2070_v57 = vpop.f32.mrf.mxu1  ;;  %v2145_v13 = vadd.f32 %v1999_v43, %v1921_v60 }
 0x3ec   :  { %v2139_v61 = vpop.f32.mrf.mxu0  ;;  %v2147_v30 = vadd.f32 %v2070_v57, %v1923_v17 }
 0x3ed   :  { %v2244_v58 = vpop.f32.mrf.mxu1  ;;  %v2148_v42 = vadd.f32 %v2139_v61, %v1924_v47 }
 0x3ee   :  { %v2141_v63 = vpop.f32.mrf.mxu0  ;;  %v2391_v34 = vadd.f32 %v2244_v58, %v2144_v1  ;;  %v3143_v1 = vpop.permute.xlu0 %3142 }
 0x3ef   :  { %v2246_v55 = vpop.f32.mrf.mxu1  ;;  %v2149_v29 = vadd.f32 %v2141_v63, %v1925_v8  ;;  %v3177_v63 = vld [vmem:[%s9025_s13] sm:$0x3f]  ;;  %s7635_s13 = smov 10  }
 0x3f0   :  { %v2315_v21 = vpop.f32.mrf.mxu0  ;;  %v2392_v5 = vadd.f32 %v2246_v55, %v2145_v13  ;;  %v3190_v3 = vrot.slane %v3177_v63, %v7863_v24  ;;  %v3186_v18 = vrot.slane %v3177_v63, %v7848_v19  ;;  %v3194_v41 = vrot.slane %v3177_v63, %v7860_v23 }
 0x3f1   :  { %v2386_v16 = vpop.f32.mrf.mxu1  ;;  %v2393_v12 = vadd.f32 %v2315_v21, %v2146_v35 }
 0x3f2   :  { %v2317_v33 = vpop.f32.mrf.mxu0  ;;  %v2395_v22 = vadd.f32 %v2386_v16, %v2148_v42  ;;  %v3169_v6 = vpop.permute.xlu0 %3168 }
 0x3f3   :  { %v2388_v46 = vpop.f32.mrf.mxu1  ;;  %v2394_v50 = vadd.f32 %v2317_v33, %v2147_v30 }
 0x3f4   :  { %v2492_v54 = vpop.f32.mrf.mxu0  ;;  %v2396_v58 = vadd.f32 %v2388_v46, %v2149_v29 }
 0x3f5   :  { %v2563_v49 = vpop.f32.mrf.mxu1  ;;  %v2639_v20 = vadd.f32 %v2492_v54, %v2391_v34 }
 0x3f6   :  { %v2494_v25 = vpop.f32.mrf.mxu0  ;;  %v2641_v10 = vadd.f32 %v2563_v49, %v2393_v12 }
 0x3f7   :  { %v2565_v52 = vpop.f32.mrf.mxu1  ;;  %v2640_v26 = vadd.f32 %v2494_v25, %v2392_v5 }
 0x3f8   :  { %v2634_v56 = vpop.f32.mrf.mxu0  ;;  %v2642_v11 = vadd.f32 %v2565_v52, %v2394_v50 }
 0x3f9   :  { %v2739_v4 = vpop.f32.mrf.mxu1  ;;  %v2643_v55 = vadd.f32 %v2634_v56, %v2395_v22 }
 0x3fa   :  { %v2636_v45 = vpop.f32.mrf.mxu0  ;;  %v2886_v28 = vadd.f32 %v2739_v4, %v2639_v20  ;;  %v3182_v4 = vrot.slane %v3177_v63, %v7835_v15 }
 0x3fb   :  { %v2741_v59 = vpop.f32.mrf.mxu1  ;;  %v2644_v16 = vadd.f32 %v2636_v45, %v2396_v58  ;;  %v3323_v58 = vld [vmem:[#allocation24 + $0xd0] sm:$0xff] }
 0x3fc   :  { %v2810_v37 = vpop.f32.mrf.mxu0  ;;  %v2887_v35 = vadd.f32 %v2741_v59, %v2640_v26  ;;  %v9049_v26 = vld [vmem:[#allocation35_spill] sm:$0xff] }
 0x3fd   :  { %v2881_v48 = vpop.f32.mrf.mxu1  ;;  %v2888_v7 = vadd.f32 %v2810_v37, %v2641_v10  ;;  %v3198_v10 = vrot.slane %v3177_v63, %v7885_v36 }
 0x3fe   :  { %v2812_v27 = vpop.f32.mrf.mxu0  ;;  %v2890_v25 = vadd.f32 %v2881_v48, %v2643_v55  ;;  %v3390_v55 = vld [vmem:[#allocation24 + $0x2e8] sm:$0xff] }
 0x3ff   :  { %v2883_v44 = vpop.f32.mrf.mxu1  ;;  %v2889_v0 = vadd.f32 %v2812_v27, %v2642_v11  ;;  %v3202_v11 = vrot.slane %v3177_v63, %v9049_v26  ;;  %v3369_v26 = vld [vmem:[#allocation24 + $0x240] sm:$0xff] }
 0x400   :  { %v2891_v46 = vadd.f32 %v2883_v44, %v2644_v16  ;;  %v3319_v16 = vld [vmem:[#allocation24 + $0xb0] sm:$0xff] }
 0x404   :  { %v3057_v43 = vpop.f32.mrf.mxu1  ;;  %v2986_v17 = vpop.f32.mrf.mxu0 }
 0x405   :  { %v3135_v53 = vadd.f32 %v3057_v43, %v2888_v7  ;;  %v3133_v57 = vadd.f32 %v2986_v17, %v2886_v28  ;;  %v3328_v43 = vld [vmem:[#allocation24 + $0xf8] sm:$0xff]  ;;  %v3327_v17 = vld [vmem:[#allocation24 + $0xf0] sm:$0xff] }
 0x406   :  { %v3059_v21 = vpop.f32.mrf.mxu1  ;;  %v2988_v51 = vpop.f32.mrf.mxu0  ;;  %3462 = vmatprep.subr.mxu1 %v3328_v43  ;;  %v3366_v43 = vld [vmem:[#allocation24 + $0x228] sm:$0xff] }
 0x407   :  { %v3147_v61 = vadd.f32 %v3143_v1, %v3135_v53  ;;  %v3136_v33 = vadd.f32 %v3059_v21, %v2889_v0  ;;  %v3145_v54 = vadd.f32 %v3143_v1, %v3133_v57  ;;  %v3134_v49 = vadd.f32 %v2988_v51, %v2887_v35  ;;  %v3325_v35 = vld [vmem:[#allocation24 + $0xe0] sm:$0xff]  ;;  %3463 = vmatpush1.msra.mxu1 %v3327_v17  ;;  %v3324_v0 = vld [vmem:[#allocation24 + $0xd8] sm:$0xff]  ;;  %v3391_v57 = vld [vmem:[#allocation24 + $0x2f0] sm:$0xff] }
 0x408   :  { %v3128_v52 = vpop.f32.mrf.mxu0  ;;  %v3392_v53 = vld [vmem:[#allocation24 + $0x2f8] sm:$0xff]  ;;  %v3322_v21 = vld [vmem:[#allocation24 + $0xc8] sm:$0xff]  ;;  %v3389_v51 = vld [vmem:[#allocation24 + $0x2e0] sm:$0xff] }
 0x409   :  { %v3153_v9 = vmax.f32 %v3147_v61, 0.0  ;;  %v3148_v32 = vadd.f32 %v3143_v1, %v3136_v33  ;;  %v3151_v40 = vmax.f32 %v3145_v54, 0.0  ;;  %v3146_v2 = vadd.f32 %v3143_v1, %v3134_v49  ;;  %3533 = vmatprep.subr.mxu0 %v3392_v53  ;;  %v3388_v61 = vld [vmem:[#allocation24 + $0x2d8] sm:$0xff]  ;;  %v3321_v33 = vld [vmem:[#allocation24 + $0xc0] sm:$0xff]  ;;  %v3387_v49 = vld [vmem:[#allocation24 + $0x2d0] sm:$0xff] }
 0x40a   :  { %v3137_v56 = vadd.f32 %v3128_v52, %v2890_v25  ;;  %v3130_v14 = vpop.f32.mrf.mxu0  ;;  %3534 = vmatpush1.msra.mxu0 %v3391_v57  ;;  %v3320_v54 = vld [vmem:[#allocation24 + $0xb8] sm:$0xff]  ;;  %v3386_v25 = vld [vmem:[#allocation24 + $0x2c8] sm:$0xff]  ;;  %v3385_v52 = vld [vmem:[#allocation24 + $0x2c0] sm:$0xff] }
 0x40b   :  { %v3154_v39 = vmax.f32 %v3148_v32, 0.0  ;;  %v3152_v59 = vmax.f32 %v3146_v2, 0.0  ;;  %v3161_v62 = vmul.f32 %v3159_v31, %v3151_v40  ;;  %v3163_v60 = vmul.f32 %v3159_v31, %v3153_v9  ;;  %3535 = vmatprep.subr.mxu0 %v3390_v55  ;;  %v3317_v9 = vld [vmem:[#allocation24 + $0xa0] sm:$0xff]  ;;  %v3384_v32 = vld [vmem:[#allocation24 + $0x2b8] sm:$0xff]  ;;  %v3383_v2 = vld [vmem:[#allocation24 + $0x2b0] sm:$0xff] }
 0x40c   :  { %v3149_v45 = vadd.f32 %v3143_v1, %v3137_v56  ;;  %v3138_v48 = vadd.f32 %v3130_v14, %v2891_v46  ;;  %3536 = vmatpush1.msra.mxu0 %v3389_v51  ;;  %v3316_v40 = vld [vmem:[#allocation24 + $0x98] sm:$0xff]  ;;  %v3315_v46 = vld [vmem:[#allocation24 + $0x90] sm:$0xff]  ;;  %v3382_v56 = vld [vmem:[#allocation24 + $0x2a8] sm:$0xff] }
 0x40d   :  { %v3162_v37 = vmul.f32 %v3159_v31, %v3152_v59  ;;  %v3164_v13 = vmul.f32 %v3159_v31, %v3154_v39  ;;  %v3171_v30 = vadd.f32 %v3169_v6, %v3161_v62  ;;  %v3173_v34 = vadd.f32 %v3169_v6, %v3163_v60  ;;  %3537 = vmatprep.subr.mxu0 %v3388_v61  ;;  %v3380_v14 = vld [vmem:[#allocation24 + $0x298] sm:$0xff]  ;;  %v3379_v59 = vld [vmem:[#allocation24 + $0x290] sm:$0xff]  ;;  %v3378_v60 = vld [vmem:[#allocation24 + $0x288] sm:$0xff] }
 0x40e   :  { %v3155_v12 = vmax.f32 %v3149_v45, 0.0  ;;  %v3150_v38 = vadd.f32 %v3143_v1, %v3138_v48  ;;  %v3326_v1 = vld [vmem:[#allocation24 + $0xe8] sm:$0xff]  ;;  %3538 = vmatpush1.msra.mxu0 %v3387_v49  ;;  %v3312_v39 = vld [vmem:[#allocation24 + $0x78] sm:$0xff]  ;;  %v3311_v62 = vld [vmem:[#allocation24 + $0x70] sm:$0xff] }
 0x40f   :  { %v3172_v47 = vadd.f32 %v3169_v6, %v3162_v37  ;;  %v3174_v24 = vadd.f32 %v3169_v6, %v3164_v13  ;;  %v8454_v5 = vmul.f32 %v3182_v4, %v3171_v30  ;;  %v8456_v50 = vmul.f32 %v3190_v3, %v3173_v34  ;;  %3464 = vmatprep.subr.mxu1 %v3326_v1  ;;  %v3314_v4 = vld [vmem:[#allocation24 + $0x88] sm:$0xff]  ;;  %v3381_v3 = vld [vmem:[#allocation24 + $0x2a0] sm:$0xff]  ;;  %v3376_v48 = vld [vmem:[#allocation24 + $0x278] sm:$0xff] }
 0x410   :  { %v3165_v20 = vmul.f32 %v3159_v31, %v3155_v12  ;;  %v3156_v8 = vmax.f32 %v3150_v38, 0.0  ;;  %3465 = vmatpush1.msra.mxu1 %v3325_v35  ;;  %3539 = vmatprep.subr.mxu0 %v3386_v25  ;;  %v3310_v45 = vld [vmem:[#allocation24 + $0x68] sm:$0xff]  ;;  %v3308_v37 = vld [vmem:[#allocation24 + $0x58] sm:$0xff]  ;;  %v3375_v13 = vld [vmem:[#allocation24 + $0x270] sm:$0xff] }
 0x411   :  { %v8459_v42 = vmul.f32 %v3186_v18, %v3172_v47  ;;  %v8461_v23 = vmul.f32 %v3194_v41, %v3174_v24  ;;  %3466 = vmatprep.subr.mxu1 %v3324_v0  ;;  %3540 = vmatpush1.msra.mxu0 %v3385_v52  ;;  %v3377_v18 = vld [vmem:[#allocation24 + $0x280] sm:$0xff]  ;;  %v3307_v30 = vld [vmem:[#allocation24 + $0x50] sm:$0xff]  ;;  %v3374_v34 = vld [vmem:[#allocation24 + $0x268] sm:$0xff] }
 0x412   :  { %v3175_v44 = vadd.f32 %v3169_v6, %v3165_v20  ;;  %v3166_v27 = vmul.f32 %v3159_v31, %v3156_v8  ;;  %3467 = vmatpush1.msra.mxu1 %v3323_v58  ;;  %v3318_v31 = vld [vmem:[#allocation24 + $0xa8] sm:$0xff]  ;;  %3541 = vmatprep.subr.mxu0 %v3384_v32  ;;  %v3309_v41 = vld [vmem:[#allocation24 + $0x60] sm:$0xff]  ;;  %v3372_v24 = vld [vmem:[#allocation24 + $0x258] sm:$0xff] }
 0x413   :  { %v7277_v28 = vpack.i.bf16 %v8456_v50, %v8459_v42  ;;  %v7282_v36 = vpack.i.bf16 %v8454_v5, %v8461_v23  ;;  %3468 = vmatprep.subr.mxu1 %v3322_v21  ;;  %3542 = vmatpush1.msra.mxu0 %v3383_v2  ;;  %v3306_v12 = vld [vmem:[#allocation24 + $0x48] sm:$0xff]  ;;  %v3373_v38 = vld [vmem:[#allocation24 + $0x260] sm:$0xff]  ;;  %v3304_v20 = vld [vmem:[#allocation24 + $0x38] sm:$0xff] }
 0x414   :  { %v8466_v7 = vmul.f32 %v3198_v10, %v3175_v44  ;;  %v3176_v29 = vadd.f32 %v3169_v6, %v3166_v27  ;;  %3469 = vmatpush1.msra.mxu1 %v3321_v33  ;;  %v3313_v6 = vld [vmem:[#allocation24 + $0x80] sm:$0xff]  ;;  %3543 = vmatprep.subr.mxu0 %v3382_v56  ;;  %v3371_v10 = vld [vmem:[#allocation24 + $0x250] sm:$0xff]  ;;  %v3370_v44 = vld [vmem:[#allocation24 + $0x248] sm:$0xff] }
 0x415   :  { %7278 = vrot.lane.b32.xlu1 %v7277_v28, %s7623_s4  ;;  %3470 = vmatprep.subr.mxu1 %v3320_v54  ;;  %v3305_v47 = vld [vmem:[#allocation24 + $0x40] sm:$0xff]  ;;  %v3303_v8 = vld [vmem:[#allocation24 + $0x30] sm:$0xff]  ;;  %v3302_v27 = vld [vmem:[#allocation24 + $0x28] sm:$0xff] }
 0x416   :  { %v3214_v22 = vmul.f32 %v3202_v11, %v3176_v29  ;;  %3241 = vrot.lane.b32.xlu0 %v8466_v7, %s7623_s4  ;;  %3471 = vmatpush1.msra.mxu1 %v3319_v16  ;;  %v3301_v11 = vld [vmem:[#allocation24 + $0x20] sm:$0xff]  ;;  %v3368_v28 = vld [vmem:[#allocation24 + $0x238] sm:$0xff]  ;;  %v3298_v17 = vld [vmem:[#allocation24 + $0x8] sm:$0xff] }
 0x417   :  { %3472 = vmatprep.subr.mxu1 %v3318_v31  ;;  %3544 = vmatpush1.msra.mxu0 %v3381_v3  ;;  %v3300_v29 = vld [vmem:[#allocation24 + $0x18] sm:$0xff]  ;;  %v3365_v1 = vld [vmem:[#allocation24 + $0x220] sm:$0xff]  ;;  %v3363_v57 = vld [vmem:[#allocation24 + $0x210] sm:$0xff] }
 0x418   :  { %3220 = vst.msk [vmem:[#allocation3 + $0x30] sm:$0xff] %vm241_vm0, %v3214_v22  ;;  %3473 = vmatpush1.msra.mxu1 %v3317_v9  ;;  %3545 = vmatprep.subr.mxu0 %v3380_v14  ;;  %v3367_v22 = vld [vmem:[#allocation24 + $0x230] sm:$0xff]  ;;  %v3297_v35 = vld [vmem:[#allocation24] sm:$0xff]  ;;  %v3364_v0 = vld [vmem:[#allocation24 + $0x218] sm:$0xff] }
 0x419   :  { %7283 = vrot.lane.b32.xlu1 %v7282_v36, %s7623_s4  ;;  %3474 = vmatprep.subr.mxu1 %v3316_v40  ;;  %v3299_v36 = vld [vmem:[#allocation24 + $0x10] sm:$0xff]  ;;  %v3360_v53 = vld [vmem:[#allocation24 + $0x1f8] sm:$0xff]  ;;  %v3362_v55 = vld [vmem:[#allocation24 + $0x208] sm:$0xff] }
 0x41a   :  { %3475 = vmatpush1.msra.mxu1 %v3315_v46  ;;  %3546 = vmatpush1.msra.mxu0 %v3379_v59  ;;  %v3359_v58 = vld [vmem:[#allocation24 + $0x1f0] sm:$0xff]  ;;  %v3358_v21 = vld [vmem:[#allocation24 + $0x1e8] sm:$0xff]  ;;  %v3361_v51 = vld [vmem:[#allocation24 + $0x200] sm:$0xff] }
 0x41b   :  { %3476 = vmatprep.subr.mxu1 %v3314_v4  ;;  %3547 = vmatprep.subr.mxu0 %v3378_v60  ;;  %v3357_v61 = vld [vmem:[#allocation24 + $0x1e0] sm:$0xff]  ;;  %v3424_v33 = vld [vmem:[#allocation24 + $0x3f8] sm:$0xff]  ;;  %v3423_v49 = vld [vmem:[#allocation24 + $0x3f0] sm:$0xff] }
 0x41c   :  { %3477 = vmatpush1.msra.mxu1 %v3313_v6  ;;  %3548 = vmatpush1.msra.mxu0 %v3377_v18  ;;  %v3356_v54 = vld [vmem:[#allocation24 + $0x1d8] sm:$0xff]  ;;  %v3355_v16 = vld [vmem:[#allocation24 + $0x1d0] sm:$0xff]  ;;  %v3422_v25 = vld [vmem:[#allocation24 + $0x3e8] sm:$0xff] }
 0x41d   :  { %3478 = vmatprep.subr.mxu1 %v3312_v39  ;;  %3549 = vmatprep.subr.mxu0 %v3376_v48  ;;  %v3354_v31 = vld [vmem:[#allocation24 + $0x1c8] sm:$0xff]  ;;  %v3421_v52 = vld [vmem:[#allocation24 + $0x3e0] sm:$0xff]  ;;  %v3420_v32 = vld [vmem:[#allocation24 + $0x3d8] sm:$0xff] }
 0x41e   :  { %3479 = vmatpush1.msra.mxu1 %v3311_v62  ;;  %3550 = vmatpush1.msra.mxu0 %v3375_v13  ;;  %v3353_v9 = vld [vmem:[#allocation24 + $0x1c0] sm:$0xff]  ;;  %v3352_v40 = vld [vmem:[#allocation24 + $0x1b8] sm:$0xff]  ;;  %v3419_v2 = vld [vmem:[#allocation24 + $0x3d0] sm:$0xff] }
 0x41f   :  { %v8475_v63 = vld [vmem:[#allocation3 + $0x30] sm:$0xff]  ;;  %3480 = vmatprep.subr.mxu1 %v3310_v45  ;;  %3551 = vmatprep.subr.mxu0 %v3374_v34  ;;  %v3418_v56 = vld [vmem:[#allocation24 + $0x3c8] sm:$0xff]  ;;  %v3417_v3 = vld [vmem:[#allocation24 + $0x3c0] sm:$0xff] }
 0x420   :  { %3243 = vrot.lane.b32.xlu1 %v8475_v63, %s7623_s4  ;;  %3481 = vmatpush1.msra.mxu1 %v3309_v41  ;;  %v3351_v46 = vld [vmem:[#allocation24 + $0x1b0] sm:$0xff]  ;;  %v3350_v4 = vld [vmem:[#allocation24 + $0x1a8] sm:$0xff]  ;;  %v3349_v6 = vld [vmem:[#allocation24 + $0x1a0] sm:$0xff] }
 0x421   :  { %3482 = vmatprep.subr.mxu1 %v3308_v37  ;;  %3552 = vmatpush1.msra.mxu0 %v3373_v38  ;;  %v3416_v14 = vld [vmem:[#allocation24 + $0x3b8] sm:$0xff]  ;;  %v3415_v59 = vld [vmem:[#allocation24 + $0x3b0] sm:$0xff]  ;;  %v3414_v60 = vld [vmem:[#allocation24 + $0x3a8] sm:$0xff] }
 0x422   :  { %3483 = vmatpush1.msra.mxu1 %v3307_v30  ;;  %3553 = vmatprep.subr.mxu0 %v3372_v24  ;;  %v3348_v39 = vld [vmem:[#allocation24 + $0x198] sm:$0xff]  ;;  %v3347_v62 = vld [vmem:[#allocation24 + $0x190] sm:$0xff]  ;;  %v3346_v45 = vld [vmem:[#allocation24 + $0x188] sm:$0xff] }
 0x423   :  { %3484 = vmatprep.subr.mxu1 %v3306_v12  ;;  %3554 = vmatpush1.msra.mxu0 %v3371_v10  ;;  %v3413_v18 = vld [vmem:[#allocation24 + $0x3a0] sm:$0xff]  ;;  %v3412_v48 = vld [vmem:[#allocation24 + $0x398] sm:$0xff]  ;;  %v3411_v13 = vld [vmem:[#allocation24 + $0x390] sm:$0xff] }
 0x424   :  { %3485 = vmatpush1.msra.mxu1 %v3305_v47  ;;  %3555 = vmatprep.subr.mxu0 %v3370_v44  ;;  %v3345_v41 = vld [vmem:[#allocation24 + $0x180] sm:$0xff]  ;;  %v3344_v37 = vld [vmem:[#allocation24 + $0x178] sm:$0xff]  ;;  %v3343_v30 = vld [vmem:[#allocation24 + $0x170] sm:$0xff] }
 0x425   :  { %3486 = vmatprep.subr.mxu1 %v3304_v20  ;;  %3556 = vmatpush1.msra.mxu0 %v3369_v26  ;;  %v3410_v34 = vld [vmem:[#allocation24 + $0x388] sm:$0xff]  ;;  %v3409_v38 = vld [vmem:[#allocation24 + $0x380] sm:$0xff]  ;;  %v3408_v24 = vld [vmem:[#allocation24 + $0x378] sm:$0xff] }
 0x426   :  { %3487 = vmatpush1.msra.mxu1 %v3303_v8  ;;  %3557 = vmatprep.subr.mxu0 %v3368_v28  ;;  %v3342_v12 = vld [vmem:[#allocation24 + $0x168] sm:$0xff]  ;;  %v3341_v47 = vld [vmem:[#allocation24 + $0x160] sm:$0xff]  ;;  %v3340_v20 = vld [vmem:[#allocation24 + $0x158] sm:$0xff] }
 0x427   :  { %3488 = vmatprep.subr.mxu1 %v3302_v27  ;;  %3558 = vmatpush1.msra.mxu0 %v3367_v22  ;;  %v3407_v10 = vld [vmem:[#allocation24 + $0x370] sm:$0xff]  ;;  %v3406_v44 = vld [vmem:[#allocation24 + $0x368] sm:$0xff]  ;;  %v3405_v26 = vld [vmem:[#allocation24 + $0x360] sm:$0xff] }
 0x428   :  { %3489 = vmatpush1.msra.mxu1 %v3301_v11  ;;  %3559 = vmatprep.subr.mxu0 %v3366_v43  ;;  %v3339_v8 = vld [vmem:[#allocation24 + $0x150] sm:$0xff]  ;;  %v3338_v27 = vld [vmem:[#allocation24 + $0x148] sm:$0xff]  ;;  %v3337_v11 = vld [vmem:[#allocation24 + $0x140] sm:$0xff] }
 0x429   :  { %3490 = vmatprep.subr.mxu1 %v3300_v29  ;;  %3560 = vmatpush1.msra.mxu0 %v3365_v1  ;;  %v3336_v28 = vld [vmem:[#allocation24 + $0x138] sm:$0xff]  ;;  %v3335_v29 = vld [vmem:[#allocation24 + $0x130] sm:$0xff] }
 0x42a   :  { %3491 = vmatpush1.msra.mxu1 %v3299_v36  ;;  %3561 = vmatprep.subr.mxu0 %v3364_v0  ;;  %v3404_v22 = vld [vmem:[#allocation24 + $0x358] sm:$0xff]  ;;  %v3334_v36 = vld [vmem:[#allocation24 + $0x128] sm:$0xff]  ;;  %v3403_v43 = vld [vmem:[#allocation24 + $0x350] sm:$0xff] }
 0x42b   :  { %3492 = vmatprep.subr.mxu1 %v3298_v17  ;;  %3562 = vmatpush1.msra.mxu0 %v3363_v57  ;;  %v3333_v0 = vld [vmem:[#allocation24 + $0x120] sm:$0xff]  ;;  %v3332_v57 = vld [vmem:[#allocation24 + $0x118] sm:$0xff] }
 0x42c   :  { %3493 = vmatpush1.msra.mxu1 %v3297_v35  ;;  %3563 = vmatprep.subr.mxu0 %v3362_v55  ;;  %v3331_v55 = vld [vmem:[#allocation24 + $0x110] sm:$0xff] }
 0x42d   :  { %3494 = vmatprep.subr.mxu1 %v3360_v53  ;;  %3564 = vmatpush1.msra.mxu0 %v3361_v51  ;;  %v3402_v53 = vld [vmem:[#allocation24 + $0x348] sm:$0xff] }
 0x42e   :  { %3495 = vmatpush2.msra.mxu1 %v3359_v58  ;;  %3565 = vmatprep.subr.mxu0 %v3424_v33  ;;  %v3401_v58 = vld [vmem:[#allocation24 + $0x340] sm:$0xff]  ;;  %v3330_v51 = vld [vmem:[#allocation24 + $0x108] sm:$0xff] }
 0x42f   :  { %3496 = vmatprep.subr.mxu1 %v3358_v21  ;;  %3566 = vmatpush2.msra.mxu0 %v3423_v49  ;;  %v3400_v21 = vld [vmem:[#allocation24 + $0x338] sm:$0xff] }
 0x430   :  { %3497 = vmatpush2.msra.mxu1 %v3357_v61  ;;  %3567 = vmatprep.subr.mxu0 %v3422_v25  ;;  %v3399_v61 = vld [vmem:[#allocation24 + $0x330] sm:$0xff]  ;;  %v3329_v25 = vld [vmem:[#allocation24 + $0x100] sm:$0xff] }
 0x431   :  { %3498 = vmatprep.subr.mxu1 %v3356_v54  ;;  %3568 = vmatpush2.msra.mxu0 %v3421_v52  ;;  %v3397_v52 = vld [vmem:[#allocation24 + $0x320] sm:$0xff] }
 0x432   :  { %3499 = vmatpush2.msra.mxu1 %v3355_v16  ;;  %3569 = vmatprep.subr.mxu0 %v3420_v32  ;;  %v3396_v32 = vld [vmem:[#allocation24 + $0x318] sm:$0xff] }
 0x433   :  { %3500 = vmatprep.subr.mxu1 %v3354_v31  ;;  %3570 = vmatpush2.msra.mxu0 %v3419_v2  ;;  %v3398_v31 = vld [vmem:[#allocation24 + $0x328] sm:$0xff] }
 0x434   :  { %3501 = vmatpush2.msra.mxu1 %v3353_v9  ;;  %3571 = vmatprep.subr.mxu0 %v3418_v56  ;;  %v3456_v9 = vld [vmem:[#allocation24 + $0x4f8] sm:$0xff] }
 0x435   :  { %3502 = vmatprep.subr.mxu1 %v3352_v40  ;;  %3572 = vmatpush2.msra.mxu0 %v3417_v3 }
 0x436   :  { %3503 = vmatpush2.msra.mxu1 %v3351_v46  ;;  %3573 = vmatprep.subr.mxu0 %v3416_v14  ;;  %v3395_v46 = vld [vmem:[#allocation24 + $0x310] sm:$0xff]  ;;  %v3393_v14 = vld [vmem:[#allocation24 + $0x300] sm:$0xff] }
 0x437   :  { %3504 = vmatprep.subr.mxu1 %v3350_v4  ;;  %3574 = vmatpush2.msra.mxu0 %v3415_v59 }
 0x438   :  { %3505 = vmatpush2.msra.mxu1 %v3349_v6  ;;  %3575 = vmatprep.subr.mxu0 %v3414_v60  ;;  %v3394_v6 = vld [vmem:[#allocation24 + $0x308] sm:$0xff] }
 0x439   :  { %3506 = vmatprep.subr.mxu1 %v3348_v39  ;;  %3576 = vmatpush2.msra.mxu0 %v3413_v18 }
 0x43a   :  { %3507 = vmatpush2.msra.mxu1 %v3347_v62  ;;  %3577 = vmatprep.subr.mxu0 %v3412_v48 }
 0x43b   :  { %3508 = vmatprep.subr.mxu1 %v3346_v45  ;;  %3578 = vmatpush2.msra.mxu0 %v3411_v13 }
 0x43c   :  { %3509 = vmatpush2.msra.mxu1 %v3345_v41  ;;  %3579 = vmatprep.subr.mxu0 %v3410_v34 }
 0x43d   :  { %3510 = vmatprep.subr.mxu1 %v3344_v37  ;;  %3580 = vmatpush2.msra.mxu0 %v3409_v38  ;;  %v3455_v38 = vld [vmem:[#allocation24 + $0x4f0] sm:$0xff] }
 0x43e   :  { %3511 = vmatpush2.msra.mxu1 %v3343_v30  ;;  %3581 = vmatprep.subr.mxu0 %v3408_v24 }
 0x43f   :  { %3512 = vmatprep.subr.mxu1 %v3342_v12  ;;  %3582 = vmatpush2.msra.mxu0 %v3407_v10  ;;  %v3454_v10 = vld [vmem:[#allocation24 + $0x4e8] sm:$0xff] }
 0x440   :  { %3513 = vmatpush2.msra.mxu1 %v3341_v47  ;;  %3583 = vmatprep.subr.mxu0 %v3406_v44 }
 0x441   :  { %3514 = vmatprep.subr.mxu1 %v3340_v20  ;;  %3584 = vmatpush2.msra.mxu0 %v3405_v26  ;;  %v3452_v26 = vld [vmem:[#allocation24 + $0x4d8] sm:$0xff] }
 0x442   :  { %3515 = vmatpush2.msra.mxu1 %v3339_v8  ;;  %3585 = vmatprep.subr.mxu0 %v3404_v22  ;;  %v3453_v8 = vld [vmem:[#allocation24 + $0x4e0] sm:$0xff]  ;;  %v3450_v22 = vld [vmem:[#allocation24 + $0x4c8] sm:$0xff] }
 0x443   :  { %3516 = vmatprep.subr.mxu1 %v3338_v27  ;;  %3586 = vmatpush2.msra.mxu0 %v3403_v43  ;;  %v3448_v43 = vld [vmem:[#allocation24 + $0x4b8] sm:$0xff] }
 0x444   :  { %3517 = vmatpush2.msra.mxu1 %v3337_v11  ;;  %3587 = vmatprep.subr.mxu0 %v3402_v53  ;;  %v3444_v53 = vld [vmem:[#allocation24 + $0x498] sm:$0xff] }
 0x445   :  { %3518 = vmatprep.subr.mxu1 %v3336_v28  ;;  %3588 = vmatpush2.msra.mxu0 %v3401_v58  ;;  %v3442_v58 = vld [vmem:[#allocation24 + $0x488] sm:$0xff] }
 0x446   :  { %3519 = vmatpush2.msra.mxu1 %v3335_v29  ;;  %3589 = vmatprep.subr.mxu0 %v3400_v21  ;;  %v3451_v29 = vld [vmem:[#allocation24 + $0x4d0] sm:$0xff]  ;;  %v3440_v21 = vld [vmem:[#allocation24 + $0x478] sm:$0xff] }
 0x447   :  { %3520 = vmatprep.subr.mxu1 %v3334_v36  ;;  %3590 = vmatpush2.msra.mxu0 %v3399_v61  ;;  %v3449_v36 = vld [vmem:[#allocation24 + $0x4c0] sm:$0xff]  ;;  %v3438_v61 = vld [vmem:[#allocation24 + $0x468] sm:$0xff] }
 0x448   :  { %3521 = vmatpush2.msra.mxu1 %v3333_v0  ;;  %3591 = vmatprep.subr.mxu0 %v3398_v31  ;;  %v3445_v0 = vld [vmem:[#allocation24 + $0x4a0] sm:$0xff]  ;;  %v3432_v31 = vld [vmem:[#allocation24 + $0x438] sm:$0xff] }
 0x449   :  { %3522 = vmatprep.subr.mxu1 %v3332_v57  ;;  %3592 = vmatpush2.msra.mxu0 %v3397_v52  ;;  %v3443_v57 = vld [vmem:[#allocation24 + $0x490] sm:$0xff] }
 0x44a   :  { %3523 = vmatpush2.msra.mxu1 %v3331_v55  ;;  %3593 = vmatprep.subr.mxu0 %v3396_v32  ;;  %v3441_v55 = vld [vmem:[#allocation24 + $0x480] sm:$0xff]  ;;  %v3431_v52 = vld [vmem:[#allocation24 + $0x430] sm:$0xff] }
 0x44b   :  { %3524 = vmatprep.subr.mxu1 %v3330_v51  ;;  %3594 = vmatpush2.msra.mxu0 %v3395_v46  ;;  %v3439_v51 = vld [vmem:[#allocation24 + $0x470] sm:$0xff]  ;;  %v3429_v32 = vld [vmem:[#allocation24 + $0x420] sm:$0xff]  ;;  %v3426_v46 = vld [vmem:[#allocation24 + $0x408] sm:$0xff] }
 0x44c   :  { %3525 = vmatpush2.msra.mxu1 %v3329_v25  ;;  %3595 = vmatprep.subr.mxu0 %v3394_v6  ;;  %v3433_v25 = vld [vmem:[#allocation24 + $0x440] sm:$0xff] }
 0x44d   :  { %3604 = vmatprep.subr.mxu1 %v3456_v9  ;;  %3596 = vmatpush2.msra.mxu0 %v3393_v14  ;;  %v3430_v9 = vld [vmem:[#allocation24 + $0x428] sm:$0xff]  ;;  %v3457_v6 = vld [vmem:[#allocation24 + $0x500] sm:$0xff] }
 0x487   :  { %v7279_v17 = vpop.permute.xlu1 %7278 }
 0x488   :  { %v7281_v1 = vunpack.i.h.bf16 %v7279_v17  ;;  %v7280_v35 = vunpack.i.l.bf16 %v7279_v17  ;;  %v3242_v39 = vpop.permute.xlu0 %3241  ;;  %v3447_v17 = vld [vmem:[#allocation24 + $0x4b0] sm:$0xff] }
 0x48a   :  { %v3246_v54 = vsel %vm355_vm1, %v7280_v35, %v7281_v1 }
 0x48b   :  { %v7284_v33 = vpop.permute.xlu1 %7283  ;;  %v3257_v56 = vmax.f32 %v8459_v42, %v3246_v54  ;;  %v3436_v54 = vld [vmem:[#allocation24 + $0x458] sm:$0xff] }
 0x48c   :  { %v7286_v49 = vunpack.i.h.bf16 %v7284_v33  ;;  %v7285_v16 = vunpack.i.l.bf16 %v7284_v33  ;;  %v3437_v33 = vld [vmem:[#allocation24 + $0x460] sm:$0xff] }
 0x48e   :  { %v3245_v40 = vsel %vm355_vm1, %v7286_v49, %v7280_v35  ;;  %v3247_v2 = vsel %vm355_vm1, %v7281_v1, %v7285_v16  ;;  %v3248_v59 = vsel %vm355_vm1, %v7285_v16, %v3242_v39  ;;  %v8511_v1 = vld [vmem:[#allocation3] sm:$0xff]  ;;  %v3446_v35 = vld [vmem:[#allocation24 + $0x4a8] sm:$0xff]  ;;  %v3435_v49 = vld [vmem:[#allocation24 + $0x450] sm:$0xff] }
 0x48f   :  { %v3258_v4 = vmax.f32 %v8456_v50, %v3247_v2  ;;  %v3256_v3 = vmax.f32 %v8454_v5, %v3245_v40  ;;  %v3259_v5 = vmax.f32 %v8461_v23, %v3248_v59  ;;  %v3434_v16 = vld [vmem:[#allocation24 + $0x448] sm:$0xff]  ;;  %v3428_v40 = vld [vmem:[#allocation24 + $0x418] sm:$0xff]  ;;  %v3427_v2 = vld [vmem:[#allocation24 + $0x410] sm:$0xff] }
 0x491   :  { %3268 = vrot.lane.b32.xlu1 %v3256_v3, %s7625_s2  ;;  %v7287_v62 = vpack.i.bf16 %v3258_v4, %v3257_v56 }
 0x492   :  { %v3244_v60 = vpop.permute.xlu1 %3243 }
 0x493   :  { %v3249_v45 = vsel %vm355_vm1, %v3242_v39, %v3244_v60  ;;  %v3261_v42 = vmax.f32 %v8475_v63, %v3244_v60  ;;  %7288 = vrot.lane.b32.xlu0 %v7287_v62, %s7625_s2 }
 0x494   :  { %v8492_v50 = vmax.f32 %v8466_v7, %v3249_v45 }
 0x495   :  { %3278 = vrot.lane.b32.xlu1 %v3261_v42, %s7625_s2 }
 0x496   :  { %v7292_v18 = vpack.i.bf16 %v8492_v50, %v3259_v5 }
 0x498   :  { %7293 = vrot.lane.b32.xlu0 %v7292_v18, %s7625_s2  ;;  %s7643_s2 = smov 5  }
 0x503   :  { %v3269_v41 = vpop.permute.xlu1 %3268 }
 0x505   :  { %v7289_v48 = vpop.permute.xlu0 %7288 }
 0x506   :  { %v7291_v37 = vunpack.i.h.bf16 %v7289_v48  ;;  %v7290_v13 = vunpack.i.l.bf16 %v7289_v48 }
 0x507   :  { %v8498_v63 = vpop.permute.xlu1 %3278 }
 0x508   :  { %v3280_v30 = vsel %vm494_vm3, %v3269_v41, %v7290_v13  ;;  %v3281_v34 = vsel %vm494_vm3, %v7290_v13, %v7291_v37  ;;  %v3296_v47 = vmax.f32 %v3261_v42, %v8498_v63  ;;  %v4079_v13 = vld [vmem:[#allocation15 + $0x48] sm:$0xff] }
 0x509   :  { %v3292_v23 = vmax.f32 %v3257_v56, %v3281_v34  ;;  %v3291_v12 = vmax.f32 %v3256_v3, %v3280_v30  ;;  %v3425_v56 = vld [vmem:[#allocation24 + $0x400] sm:$0xff]  ;;  %v3458_v3 = vld [vmem:[#allocation24 + $0x508] sm:$0xff]  ;;  %v4559_v30 = vld [vmem:[#allocation16 + $0x8] sm:$0xff]  ;;  %v9050_v34 = vmov 1  }
 0x50a   :  { %v8501_v7 = vpop.permute.xlu0 %7293 }
 0x50b   :  { %v7296_v24 = vunpack.i.h.bf16 %v8501_v7  ;;  %v7295_v20 = vunpack.i.l.bf16 %v8501_v7  ;;  %3526 = vmatprep.mubr.f32.mxu1 %v3292_v23  ;;  %v9051_v23 = vmov 0  }
 0x50c   :  { %3527 = vmatmul.mubr.f32.vlgmr.msra.gmra.mxu1 %v3291_v12  ;;  %v9052_v12 = vmov 2  }
 0x50d   :  { %v3282_v44 = vsel %vm494_vm3, %v7291_v37, %v7295_v20  ;;  %3605 = vmatpush1.msra.mxu1 %v3455_v38  ;;  %7004 = vmatprep.mubr.msk.f32.mxu1 %vm241_vm0, %v3296_v47  ;;  %v3283_v27 = vsel %vm494_vm3, %v7295_v20, %v7296_v24  ;;  %v4078_v37 = vld [vmem:[#allocation15 + $0x40] sm:$0xff]  ;;  %v3683_v20 = vld [vmem:[#allocation15 + $0x10] sm:$0xff] }
 0x50e   :  { %3606 = vmatprep.subr.mxu1 %v3454_v10  ;;  %v3294_v11 = vmax.f32 %v3259_v5, %v3283_v27  ;;  %v3293_v28 = vmax.f32 %v3258_v4, %v3282_v44  ;;  %v3284_v4 = vsel %vm494_vm3, %v7296_v24, %v8498_v63  ;;  %v4558_v63 = vld [vmem:[#allocation16] sm:$0xff]  ;;  %vm3885_vm3 = vcmask 72704  }
 0x50f   :  { %3607 = vmatpush1.msra.mxu1 %v3453_v8  ;;  %v3295_v14 = vmax.f32 %v8492_v50, %v3284_v4 }
 0x510   :  { %3597 = vmatprep.mubr.f32.mxu0 %v3294_v11  ;;  %3608 = vmatprep.subr.mxu1 %v3452_v26  ;;  %v3684_v26 = vld [vmem:[#allocation15 + $0x18] sm:$0xff] }
 0x511   :  { %3598 = vmatmul.mubr.f32.vlgmr.msra.gmra.mxu0 %v3293_v28  ;;  %3609 = vmatpush1.msra.mxu1 %v3451_v29 }
 0x512   :  { %3610 = vmatprep.subr.mxu1 %v3450_v22  ;;  %3769 = vmatprep.mubr.f32.mxu0 %v8511_v1  ;;  %v3680_v22 = vld [vmem:[#allocation15] sm:$0xff] }
 0x513   :  { %3611 = vmatpush1.msra.mxu1 %v3449_v36 }
 0x514   :  { %3612 = vmatprep.subr.mxu1 %v3448_v43 }
 0x515   :  { %3613 = vmatpush1.msra.mxu1 %v3447_v17 }
 0x516   :  { %3614 = vmatprep.subr.mxu1 %v3446_v35  ;;  %v3681_v35 = vld [vmem:[#allocation15 + $0x8] sm:$0xff] }
 0x517   :  { %3615 = vmatpush1.msra.mxu1 %v3445_v0 }
 0x518   :  { %3616 = vmatprep.subr.mxu1 %v3444_v53 }
 0x519   :  { %3617 = vmatpush1.msra.mxu1 %v3443_v57 }
 0x51a   :  { %3618 = vmatprep.subr.mxu1 %v3442_v58 }
 0x51b   :  { %3619 = vmatpush1.msra.mxu1 %v3441_v55  ;;  %v3877_v55 = vld [vmem:[#allocation15 + $0x20] sm:$0xff] }
 0x51c   :  { %3620 = vmatprep.subr.mxu1 %v3440_v21 }
 0x51d   :  { %3621 = vmatpush1.msra.mxu1 %v3439_v51 }
 0x51e   :  { %3622 = vmatprep.subr.mxu1 %v3438_v61 }
 0x51f   :  { %3623 = vmatpush1.msra.mxu1 %v3437_v33  ;;  %v3878_v33 = vld [vmem:[#allocation15 + $0x28] sm:$0xff] }
 0x520   :  { %3624 = vmatprep.subr.mxu1 %v3436_v54 }
 0x521   :  { %3625 = vmatpush1.msra.mxu1 %v3435_v49 }
 0x522   :  { %3626 = vmatprep.subr.mxu1 %v3434_v16  ;;  %v3978_v16 = vld [vmem:[#allocation15 + $0x30] sm:$0xff] }
 0x523   :  { %3627 = vmatpush1.msra.mxu1 %v3433_v25 }
 0x524   :  { %3628 = vmatprep.subr.mxu1 %v3432_v31 }
 0x525   :  { %3629 = vmatpush1.msra.mxu1 %v3431_v52  ;;  %v4265_v52 = vld [vmem:[#allocation15 + $0x60] sm:$0xff] }
 0x526   :  { %3630 = vmatprep.subr.mxu1 %v3430_v9 }
 0x527   :  { %3631 = vmatpush1.msra.mxu1 %v3429_v32  ;;  %v3979_v32 = vld [vmem:[#allocation15 + $0x38] sm:$0xff] }
 0x528   :  { %3632 = vmatprep.subr.mxu1 %v3428_v40 }
 0x529   :  { %3633 = vmatpush1.msra.mxu1 %v3427_v2 }
 0x52a   :  { %3634 = vmatprep.subr.mxu1 %v3426_v46  ;;  %v4266_v46 = vld [vmem:[#allocation15 + $0x68] sm:$0xff] }
 0x52b   :  { %3635 = vmatpush1.msra.mxu1 %v3425_v56  ;;  %v4168_v56 = vld [vmem:[#allocation15 + $0x50] sm:$0xff] }
 0x52c   :  { %3666 = vmatprep.subr.mxu1 %v3458_v3 }
 0x52d   :  { %3667 = vmatpush2.msra.mxu1 %v3457_v6 }
 0x52e   :  { %3669 = vmatmul.mubr.f32.vlgmr.msra.gmra.mxu1 %v3295_v14  ;;  %v4461_v14 = vld [vmem:[#allocation15 + $0x80] sm:$0xff] }
 0x52f   :  { %4150 = vmatprep.mubr.f32.mxu1 %v8511_v1 }
 0x5cc   :  { %v3528_v39 = vpop.f32.mrf.mxu1 }
 0x5ce   :  { %v3530_v62 = vpop.f32.mrf.mxu1 }
 0x5d1   :  { %v3599_v59 = vpop.f32.mrf.mxu0 }
 0x5d2   :  { %v3600_v45 = vadd.f32 %v3599_v59, %v3528_v39  ;;  %v4169_v59 = vld [vmem:[#allocation15 + $0x58] sm:$0xff] }
 0x5d3   :  { %v3601_v60 = vpop.f32.mrf.mxu0 }
 0x5d4   :  { %v3602_v5 = vadd.f32 %v3601_v60, %v3530_v62  ;;  %v4462_v62 = vld [vmem:[#allocation15 + $0x88] sm:$0xff]  ;;  %v4363_v60 = vld [vmem:[#allocation15 + $0x70] sm:$0xff] }
 0x5ee   :  { %v3670_v42 = vpop.f32.mrf.mxu1 }
 0x5ef   :  { %v3671_v18 = vadd.f32 %v3670_v42, %v3600_v45  ;;  %v4364_v45 = vld [vmem:[#allocation15 + $0x78] sm:$0xff] }
 0x5f0   :  { %v3672_v41 = vpop.f32.mrf.mxu1 }
 0x5f1   :  { %v3673_v48 = vadd.f32 %v3672_v41, %v3602_v5  ;;  %3690 = vrot.lane.b32.xlu0 %v3671_v18, %s7635_s13 }
 0x5f3   :  { %3676 = vst.msk [vmem:[#allocation4 + $0x10] sm:$0xff] %vm254_vm14, %v3673_v48 }
 0x5f5   :  { %3688 = vrot.lane.b32.xlu0 %v8511_v1, %s7635_s13 }
 0x5fa   :  { %v3679_v50 = vld [vmem:[#allocation4 + $0x10] sm:$0xff] }
 0x5fb   :  { %3692 = vrot.lane.b32.xlu1 %v3679_v50, %s7635_s13  ;;  %4116 = vmatprep.subr.mxu1 %v3679_v50 }
 0x5fc   :  { %4117 = vmatpush1.msra.mxu1 %v3671_v18  ;;  %3786 = vrot.lane.b32.xlu0 %v3679_v50, %s7636_s29 }
 0x5fd   :  { %7013 = vmatmul.mubr.msk.f32.vlgmr.msra.gmra.mxu1 %vm241_vm0, %v4078_v37 }
 0x5fe   :  { %4156 = vmatprep.mubr.f32.mxu1 %v8511_v1 }
 0x5ff   :  { %3784 = vrot.lane.b32.xlu1 %v3671_v18, %s7636_s29 }
 0x600   :  { %3881 = vrot.lane.b32.xlu0 %v3671_v18, %s7637_s16 }
 0x601   :  { %7014 = vmatmul.mubr.msk.f32.gmra.mxu1 %vm241_vm0, %v4079_v13 }
 0x602   :  { %4345 = vmatprep.mubr.f32.mxu1 %v8511_v1 }
 0x603   :  { %3782 = vrot.lane.b32.xlu1 %v8511_v1, %s7636_s29 }
 0x604   :  { %3879 = vrot.lane.b32.xlu0 %v8511_v1, %s7637_s16 }
 0x607   :  { %3883 = vrot.lane.b32.xlu1 %v3679_v50, %s7637_s16 }
 0x608   :  { %3984 = vrot.lane.b32.xlu0 %v3679_v50, %s7633_s27 }
 0x60b   :  { %3982 = vrot.lane.b32.xlu1 %v3671_v18, %s7633_s27 }
 0x60c   :  { %4170 = vrot.lane.b32.xlu0 %v3671_v18, %s7623_s4 }
 0x60f   :  { %3980 = vrot.lane.b32.xlu1 %v8511_v1, %s7633_s27 }
 0x610   :  { %4267 = vrot.lane.b32.xlu0 %v3671_v18, %s7638_s18 }
 0x613   :  { %4172 = vrot.lane.b32.xlu1 %v3679_v50, %s7623_s4 }
 0x614   :  { %4365 = vrot.lane.b32.xlu0 %v3671_v18, %s7639_s30 }
 0x617   :  { %4269 = vrot.lane.b32.xlu1 %v3679_v50, %s7638_s18 }
 0x618   :  { %4463 = vrot.lane.b32.xlu0 %v3671_v18, %s7640_s20 }
 0x61b   :  { %4367 = vrot.lane.b32.xlu1 %v3679_v50, %s7639_s30 }
 0x61c   :  { %4567 = vperm.xlu0 %7297, %v4559_v30  }
 0x61f   :  { %4465 = vrot.lane.b32.xlu1 %v3679_v50, %s7640_s20 }
 0x620   :  { %7300 = vset.pattern.permute.xlu0 %v9050_v34 }
 0x621   :  { %4579 = vperm.xlu0 %7300, %v4558_v63  }
 0x623   :  { %4562 = vperm.xlu1 %7298, %v4558_v63  }
 0x625   :  { %4645 = vrot.lane.b32.xlu0 %v8511_v1, %s7635_s13 }
 0x626   :  { %7302 = vset.pattern.permute.xlu0 %v9051_v23 }
 0x627   :  { %7299 = vset.pattern.permute.xlu1 %v9050_v34 }
 0x628   :  { %4583 = vperm.xlu1 %7299, %v4559_v30  }
 0x629   :  { %4749 = vrot.lane.b32.xlu0 %v8511_v1, %s7636_s29 }
 0x62c   :  { %7301 = vset.pattern.permute.xlu1 %v9052_v12 }
 0x62d   :  { %4595 = vperm.xlu1 %7301, %v4559_v30   ;;  %4855 = vrot.lane.b32.xlu0 %v8511_v1, %s7637_s16 }
 0x631   :  { %4591 = vperm.xlu1 %7301, %v4558_v63   ;;  %4965 = vrot.lane.b32.xlu0 %v8511_v1, %s7633_s27 }
 0x635   :  { %4639 = vrot.lane.b32.xlu1 %v8511_v1, %s7635_s13 }
 0x636   :  { %7303 = vset.pattern.permute.xlu1 %v9051_v23 }
 0x639   :  { %4743 = vrot.lane.b32.xlu1 %v8511_v1, %s7636_s29 }
 0x63d   :  { %4849 = vrot.lane.b32.xlu1 %v8511_v1, %s7637_s16 }
 0x641   :  { %4959 = vrot.lane.b32.xlu1 %v8511_v1, %s7633_s27 }
 0x663   :  { %v3691_v7 = vpop.permute.xlu0 %3690 }
 0x667   :  { %v3689_v38 = vpop.permute.xlu0 %3688 }
 0x668   :  { %v3695_v8 = vsel %vm3694_vm15, %v3689_v38, %v3691_v7 }
 0x66d   :  { %v3693_v47 = vpop.permute.xlu1 %3692 }
 0x66e   :  { %v3696_v24 = vsel %vm3694_vm15, %v3691_v7, %v3693_v47  ;;  %v3787_v10 = vpop.permute.xlu0 %3786 }
 0x66f   :  { %3735 = vmatprep.subr.mxu0 %v3696_v24 }
 0x670   :  { %3736 = vmatpush1.msra.mxu0 %v3695_v8 }
 0x671   :  { %v3785_v44 = vpop.permute.xlu1 %3784  ;;  %7005 = vmatmul.mubr.msk.f32.vlgmr.msra.gmra.mxu0 %vm241_vm0, %v3683_v20 }
 0x672   :  { %3775 = vmatprep.mubr.f32.mxu0 %v8511_v1  ;;  %v3790_v27 = vsel %vm3788_vm2, %v3785_v44, %v3787_v10  ;;  %v3882_v11 = vpop.permute.xlu0 %3881 }
 0x673   :  { %3829 = vmatprep.subr.mxu0 %v3790_v27 }
 0x675   :  { %v3783_v28 = vpop.permute.xlu1 %3782  ;;  %7006 = vmatmul.mubr.msk.f32.gmra.mxu0 %vm241_vm0, %v3684_v26 }
 0x676   :  { %v3789_v29 = vsel %vm3788_vm2, %v3783_v28, %v3785_v44  ;;  %3863 = vmatprep.mubr.f32.mxu0 %v8511_v1  ;;  %v3880_v36 = vpop.permute.xlu0 %3879 }
 0x677   :  { %3830 = vmatpush1.msra.mxu0 %v3789_v29  ;;  %v3886_v53 = vsel %vm3885_vm3, %v3880_v36, %v3882_v11 }
 0x679   :  { %v3884_v43 = vpop.permute.xlu1 %3883  ;;  %7007 = vmatmul.mubr.msk.f32.vlgmr.msra.gmra.mxu0 %vm241_vm0, %v3680_v22 }
 0x67a   :  { %v3887_v17 = vsel %vm3885_vm3, %v3882_v11, %v3884_v43  ;;  %3869 = vmatprep.mubr.f32.mxu0 %v8511_v1  ;;  %v3985_v0 = vpop.permute.xlu0 %3984 }
 0x67b   :  { %3926 = vmatprep.subr.mxu0 %v3887_v17 }
 0x67c   :  { %3927 = vmatpush1.msra.mxu0 %v3886_v53 }
 0x67d   :  { %v3983_v57 = vpop.permute.xlu1 %3982  ;;  %7008 = vmatmul.mubr.msk.f32.gmra.mxu0 %vm241_vm0, %v3681_v35 }
 0x67e   :  { %3960 = vmatprep.mubr.f32.mxu0 %v8511_v1  ;;  %v3987_v58 = vsel %vm1691_vm12, %v3983_v57, %v3985_v0  ;;  %v4171_v21 = vpop.permute.xlu0 %4170 }
 0x67f   :  { %4026 = vmatprep.subr.mxu0 %v3987_v58 }
 0x681   :  { %v3981_v51 = vpop.permute.xlu1 %3980  ;;  %7009 = vmatmul.mubr.msk.f32.vlgmr.msra.gmra.mxu0 %vm241_vm0, %v3877_v55 }
 0x682   :  { %v3986_v61 = vsel %vm1691_vm12, %v3981_v51, %v3983_v57  ;;  %3966 = vmatprep.mubr.f32.mxu0 %v8511_v1  ;;  %v4268_v49 = vpop.permute.xlu0 %4267 }
 0x683   :  { %4027 = vmatpush1.msra.mxu0 %v3986_v61 }
 0x685   :  { %v4173_v54 = vpop.permute.xlu1 %4172  ;;  %7010 = vmatmul.mubr.msk.f32.gmra.mxu0 %vm241_vm0, %v3878_v33 }
 0x686   :  { %4213 = vmatprep.subr.mxu0 %v4173_v54  ;;  %4060 = vmatprep.mubr.f32.mxu0 %v8511_v1  ;;  %v4174_v31 = vsel %vm355_vm1, %v4171_v21, %v4173_v54  ;;  %v4366_v40 = vpop.permute.xlu0 %4365 }
 0x689   :  { %v4270_v25 = vpop.permute.xlu1 %4269  ;;  %7011 = vmatmul.mubr.msk.f32.vlgmr.msra.gmra.mxu0 %vm241_vm0, %v3978_v16 }
 0x68a   :  { %4214 = vmatpush1.msra.mxu0 %v4174_v31  ;;  %4311 = vmatprep.subr.mxu1 %v4270_v25  ;;  %v4272_v9 = vsel %vm4271_vm4, %v4268_v49, %v4270_v25  ;;  %v4464_v4 = vpop.permute.xlu0 %4463 }
 0x68b   :  { %4312 = vmatpush1.msra.mxu1 %v4272_v9  ;;  %4066 = vmatprep.mubr.f32.mxu0 %v8511_v1 }
 0x68c   :  { %7017 = vmatmul.mubr.msk.f32.vlgmr.msra.gmra.mxu1 %vm241_vm0, %v4265_v52 }
 0x68d   :  { %v4368_v2 = vpop.permute.xlu1 %4367  ;;  %7012 = vmatmul.mubr.msk.f32.gmra.mxu0 %vm241_vm0, %v3979_v32  ;;  %4351 = vmatprep.mubr.f32.mxu1 %v8511_v1 }
 0x68e   :  { %4409 = vmatprep.subr.mxu0 %v4368_v2  ;;  %4247 = vmatprep.mubr.f32.mxu0 %v8511_v1  ;;  %v4370_v6 = vsel %vm4369_vm5, %v4366_v40, %v4368_v2 }
 0x690   :  { %7018 = vmatmul.mubr.msk.f32.gmra.mxu1 %vm241_vm0, %v4266_v46 }
 0x691   :  { %v4466_v3 = vpop.permute.xlu1 %4465  ;;  %7015 = vmatmul.mubr.msk.f32.vlgmr.msra.gmra.mxu0 %vm241_vm0, %v4168_v56  ;;  %4541 = vmatprep.mubr.f32.mxu1 %v8511_v1 }
 0x692   :  { %4410 = vmatpush1.msra.mxu0 %v4370_v6  ;;  %4507 = vmatprep.subr.mxu1 %v4466_v3  ;;  %v4468_v39 = vsel %vm4467_vm6, %v4464_v4, %v4466_v3 }
 0x693   :  { %4508 = vmatpush1.msra.mxu1 %v4468_v39  ;;  %4253 = vmatprep.mubr.f32.mxu0 %v8511_v1 }
 0x694   :  { %7021 = vmatmul.mubr.msk.f32.vlgmr.msra.gmra.mxu1 %vm241_vm0, %v4461_v14 }
 0x695   :  { %7016 = vmatmul.mubr.msk.f32.gmra.mxu0 %vm241_vm0, %v4169_v59  ;;  %4547 = vmatprep.mubr.f32.mxu1 %v8511_v1 }
 0x696   :  { %4443 = vmatprep.mubr.f32.mxu0 %v8511_v1 }
 0x697   :  { %v4568_v6 = vpop.permute.xlu0 %4567 }
 0x698   :  { %7022 = vmatmul.mubr.msk.f32.gmra.mxu1 %vm241_vm0, %v4462_v62 }
 0x699   :  { %7019 = vmatmul.mubr.msk.f32.vlgmr.msra.gmra.mxu0 %vm241_vm0, %v4363_v60  ;;  %4833 = vmatprep.mubr.f32.mxu1 %v8511_v1 }
 0x69a   :  { %4449 = vmatprep.mubr.f32.mxu0 %v8511_v1 }
 0x69d   :  { %7020 = vmatmul.mubr.msk.f32.gmra.mxu0 %vm241_vm0, %v4364_v45  ;;  %vm4659_vm0 = vcmask 130048  }
 0x69e   :  { %4730 = vmatprep.mubr.f32.mxu0 %v8511_v1  ;;  %v4563_v21 = vpop.permute.xlu1 %4562 }
 0x6a3   :  { %v4584_v46 = vpop.permute.xlu1 %4583 }
 0x6bd   :  { %v4152_v37 = vpop.f32.mrf.mxu1 }
 0x6bf   :  { %v4154_v63 = vpop.f32.mrf.mxu1 }
 0x6c1   :  { %v4158_v47 = vpop.f32.mrf.mxu1 }
 0x6c3   :  { %v4160_v10 = vpop.f32.mrf.mxu1 }
 0x731   :  { %v3771_v42 = vpop.f32.mrf.mxu0 }
 0x733   :  { %v3773_v5 = vpop.f32.mrf.mxu0 }
 0x735   :  { %v3777_v18 = vpop.f32.mrf.mxu0 }
 0x737   :  { %v3779_v41 = vpop.f32.mrf.mxu0 }
 0x739   :  { %v3865_v48 = vpop.f32.mrf.mxu0 }
 0x73a   :  { %v3866_v44 = vadd.f32 %v3865_v48, %v3771_v42 }
 0x73b   :  { %v3867_v50 = vpop.f32.mrf.mxu0 }
 0x73c   :  { %v3868_v26 = vadd.f32 %v3867_v50, %v3773_v5  ;;  %v4596_v50 = vpop.permute.xlu1 %4595 }
 0x73d   :  { %v3871_v13 = vpop.f32.mrf.mxu0 }
 0x73e   :  { %v3872_v22 = vadd.f32 %v3871_v13, %v3777_v18 }
 0x73f   :  { %v3873_v30 = vpop.f32.mrf.mxu0 }
 0x740   :  { %v3874_v0 = vadd.f32 %v3873_v30, %v3779_v41 }
 0x741   :  { %v3962_v7 = vpop.f32.mrf.mxu0 }
 0x742   :  { %v3973_v11 = vadd.f32 %v3962_v7, %v3866_v44  ;;  %v4580_v7 = vpop.permute.xlu0 %4579 }
 0x743   :  { %v3964_v38 = vpop.f32.mrf.mxu0 }
 0x744   :  { %v3974_v36 = vadd.f32 %v3964_v38, %v3868_v26  ;;  %v4602_v38 = vld [vmem:[%s9026_s14] sm:$0x3] }
 0x745   :  { %v3968_v24 = vpop.f32.mrf.mxu0 }
 0x746   :  { %v3975_v53 = vadd.f32 %v3968_v24, %v3872_v22  ;;  %v4611_v22 = vrot.slane %v4602_v38, %v7848_v19 }
 0x747   :  { %v3970_v20 = vpop.f32.mrf.mxu0 }
 0x748   :  { %v3976_v51 = vadd.f32 %v3970_v20, %v3874_v0 }
 0x749   :  { %v4062_v8 = vpop.f32.mrf.mxu0 }
 0x74a   :  { %v4073_v43 = vadd.f32 %v4062_v8, %v3973_v11 }
 0x74b   :  { %v4064_v27 = vpop.f32.mrf.mxu0 }
 0x74c   :  { %v4347_v28 = vpop.f32.mrf.mxu1  ;;  %v4074_v57 = vadd.f32 %v4064_v27, %v3974_v36  ;;  %v4163_v61 = vadd.f32 %v4152_v37, %v4073_v43  ;;  %v4607_v27 = vrot.slane %v4602_v38, %v7835_v15  ;;  %v4592_v36 = vpop.permute.xlu1 %4591 }
 0x74d   :  { %v4068_v29 = vpop.f32.mrf.mxu0 }
 0x74e   :  { %v4349_v17 = vpop.f32.mrf.mxu1  ;;  %v4075_v33 = vadd.f32 %v4068_v29, %v3975_v53  ;;  %v4164_v16 = vadd.f32 %v4154_v63, %v4074_v57 }
 0x74f   :  { %v4070_v35 = vpop.f32.mrf.mxu0 }
 0x750   :  { %v4353_v58 = vpop.f32.mrf.mxu1  ;;  %v4076_v25 = vadd.f32 %v4070_v35, %v3976_v51  ;;  %v4165_v32 = vadd.f32 %v4158_v47, %v4075_v33 }
 0x751   :  { %v4249_v55 = vpop.f32.mrf.mxu0 }
 0x752   :  { %v4355_v54 = vpop.f32.mrf.mxu1  ;;  %v4260_v31 = vadd.f32 %v4249_v55, %v4163_v61  ;;  %v4166_v56 = vadd.f32 %v4160_v10, %v4076_v25 }
 0x753   :  { %v4251_v49 = vpop.f32.mrf.mxu0 }
 0x754   :  { %v4543_v9 = vpop.f32.mrf.mxu1  ;;  %v4261_v40 = vadd.f32 %v4251_v49, %v4164_v16  ;;  %v4358_v4 = vadd.f32 %v4347_v28, %v4260_v31  ;;  %v5573_v31 = vld [vmem:[#allocation19 + $0x8] sm:$0xff] }
 0x755   :  { %v4255_v52 = vpop.f32.mrf.mxu0 }
 0x756   :  { %v4262_v3 = vadd.f32 %v4255_v52, %v4165_v32  ;;  %v4545_v39 = vpop.f32.mrf.mxu1  ;;  %v4359_v59 = vadd.f32 %v4349_v17, %v4261_v40  ;;  %v5572_v52 = vld [vmem:[#allocation19] sm:$0xff]  ;;  %v4646_v40 = vpop.permute.xlu0 %4645 }
 0x757   :  { %v4257_v2 = vpop.f32.mrf.mxu0 }
 0x758   :  { %v4263_v62 = vadd.f32 %v4257_v2, %v4166_v56  ;;  %v4549_v42 = vpop.f32.mrf.mxu1  ;;  %v4360_v5 = vadd.f32 %v4353_v58, %v4262_v3 }
 0x759   :  { %v4445_v14 = vpop.f32.mrf.mxu0 }
 0x75a   :  { %v4456_v60 = vadd.f32 %v4445_v14, %v4358_v4  ;;  %v4361_v37 = vadd.f32 %v4355_v54, %v4263_v62  ;;  %v4551_v24 = vpop.f32.mrf.mxu1 }
 0x75b   :  { %v4447_v45 = vpop.f32.mrf.mxu0 }
 0x75c   :  { %v4554_v18 = vadd.f32 %v4543_v9, %v4456_v60  ;;  %v4457_v41 = vadd.f32 %v4447_v45, %v4359_v59  ;;  %v4640_v9 = vpop.permute.xlu1 %4639 }
 0x75d   :  { %v4451_v48 = vpop.f32.mrf.mxu0 }
 0x75e   :  { %v4570_v13 = vadd.f32 %v4563_v21, %v4554_v18  ;;  %v4555_v30 = vadd.f32 %v4545_v39, %v4457_v41  ;;  %v4458_v63 = vadd.f32 %v4451_v48, %v4360_v5 }
 0x75f   :  { %v4453_v47 = vpop.f32.mrf.mxu0 }
 0x760   :  { %v4574_v20 = vmax.f32 %v4570_v13, 0.0  ;;  %v4571_v10 = vadd.f32 %v4563_v21, %v4555_v30  ;;  %v4459_v8 = vadd.f32 %v4453_v47, %v4361_v37  ;;  %v4556_v44 = vadd.f32 %v4549_v42, %v4458_v63  ;;  %v4744_v32 = vpop.permute.xlu1 %4743  ;;  %v4631_v63 = vld [vmem:[#allocation18 + $0x10] sm:$0xff] }
 0x762   :  { %v4575_v26 = vmax.f32 %v4571_v10, 0.0  ;;  %v4572_v11 = vadd.f32 %v4568_v6, %v4556_v44  ;;  %v4586_v28 = vmul.f32 %v4580_v7, %v4574_v20  ;;  %v4557_v29 = vadd.f32 %v4551_v24, %v4459_v8  ;;  %v4628_v8 = vld [vmem:[#allocation18] sm:$0xff]  ;;  %v4632_v44 = vld [vmem:[#allocation18 + $0x18] sm:$0xff] }
 0x764   :  { %v4576_v43 = vmax.f32 %v4572_v11, 0.0  ;;  %v4587_v17 = vmul.f32 %v4580_v7, %v4575_v26  ;;  %v4573_v35 = vadd.f32 %v4568_v6, %v4557_v29  ;;  %v4598_v0 = vadd.f32 %v4592_v36, %v4586_v28  ;;  %v8698_v2 = vpop.permute.xlu1 %4849  ;;  %v4629_v28 = vld [vmem:[#allocation18 + $0x8] sm:$0xff] }
 0x766   :  { %v4588_v53 = vmul.f32 %v4584_v46, %v4576_v43  ;;  %v4577_v57 = vmax.f32 %v4573_v35, 0.0  ;;  %v4599_v58 = vadd.f32 %v4592_v36, %v4587_v17  ;;  %v8619_v55 = vmul.f32 %v4607_v27, %v4598_v0  ;;  %v4957_v0 = vld [vmem:[#allocation18 + $0x30] sm:$0xff] }
 0x768   :  { %v4600_v21 = vadd.f32 %v4596_v50, %v4588_v53  ;;  %v4589_v51 = vmul.f32 %v4584_v46, %v4577_v57  ;;  %v4615_v61 = vmul.f32 %v4611_v22, %v4599_v58  ;;  %4641 = vrot.lane.b32.xlu1 %v8619_v55, %s7635_s13  ;;  %v4750_v46 = vpop.permute.xlu0 %4749  ;;  %v4960_v56 = vpop.permute.xlu1 %4959 }
 0x76a   :  { %v4601_v33 = vadd.f32 %v4596_v50, %v4589_v51  ;;  %v8623_v54 = vmul.f32 %v4607_v27, %v4600_v21  ;;  %4619 = vst.msk [vmem:[#allocation5 + $0x10] sm:$0xff] %vm254_vm14, %v4615_v61  ;;  %v4847_v61 = vld [vmem:[#allocation18 + $0x20] sm:$0xff] }
 0x76c   :  { %v4617_v49 = vmul.f32 %v4611_v22, %v4601_v33  ;;  %4745 = vrot.lane.b32.xlu1 %v8619_v55, %s7636_s29  ;;  %v4856_v4 = vpop.permute.xlu0 %4855 }
 0x76e   :  { %4621 = vst.msk [vmem:[#allocation5 + $0x30] sm:$0xff] %vm254_vm14, %v4617_v49 }
 0x770   :  { %4851 = vrot.lane.b32.xlu1 %v8619_v55, %s7637_s16  ;;  %v4966_v6 = vpop.permute.xlu0 %4965 }
 0x771   :  { %v8631_v16 = vld [vmem:[#allocation5 + $0x10] sm:$0xff] }
 0x772   :  { %4643 = vrot.lane.b32.xlu0 %v8631_v16, %s7635_s13 }
 0x774   :  { %4961 = vrot.lane.b32.xlu1 %v8619_v55, %s7633_s27 }
 0x775   :  { %v8643_v25 = vld [vmem:[#allocation5 + $0x30] sm:$0xff] }
 0x776   :  { %4747 = vrot.lane.b32.xlu0 %v8631_v16, %s7636_s29 }
 0x778   :  { %4857 = vrot.lane.b32.xlu1 %v8623_v54, %s7637_s16 }
 0x77a   :  { %4853 = vrot.lane.b32.xlu0 %v8631_v16, %s7637_s16 }
 0x77c   :  { %4649 = vrot.lane.b32.xlu1 %v8643_v25, %s7635_s13 }
 0x77e   :  { %4963 = vrot.lane.b32.xlu0 %v8631_v16, %s7633_s27 }
 0x780   :  { %4753 = vrot.lane.b32.xlu1 %v8643_v25, %s7636_s29 }
 0x782   :  { %4647 = vrot.lane.b32.xlu0 %v8623_v54, %s7635_s13 }
 0x784   :  { %5161 = vrot.lane.b32.xlu1 %v8631_v16, %s7623_s4 }
 0x786   :  { %4751 = vrot.lane.b32.xlu0 %v8623_v54, %s7636_s29 }
 0x788   :  { %5265 = vrot.lane.b32.xlu1 %v8631_v16, %s7638_s18 }
 0x78a   :  { %4967 = vrot.lane.b32.xlu0 %v8623_v54, %s7633_s27 }
 0x78c   :  { %4969 = vrot.lane.b32.xlu1 %v8643_v25, %s7633_s27 }
 0x78e   :  { %5163 = vrot.lane.b32.xlu0 %v8623_v54, %s7623_s4 }
 0x790   :  { %5369 = vrot.lane.b32.xlu1 %v8631_v16, %s7639_s30 }
 0x792   :  { %4859 = vrot.lane.b32.xlu0 %v8643_v25, %s7637_s16 }
 0x794   :  { %5165 = vrot.lane.b32.xlu1 %v8643_v25, %s7623_s4 }
 0x796   :  { %5159 = vrot.lane.b32.xlu0 %v8619_v55, %s7623_s4 }
 0x798   :  { %5269 = vrot.lane.b32.xlu1 %v8643_v25, %s7638_s18 }
 0x79a   :  { %5267 = vrot.lane.b32.xlu0 %v8623_v54, %s7638_s18 }
 0x79c   :  { %5373 = vrot.lane.b32.xlu1 %v8643_v25, %s7639_s30 }
 0x79e   :  { %5263 = vrot.lane.b32.xlu0 %v8619_v55, %s7638_s18 }
 0x7a0   :  { %5477 = vrot.lane.b32.xlu1 %v8643_v25, %s7640_s20 }
 0x7a2   :  { %5371 = vrot.lane.b32.xlu0 %v8623_v54, %s7639_s30 }
 0x7a4   :  { %5473 = vrot.lane.b32.xlu1 %v8631_v16, %s7640_s20 }
 0x7a6   :  { %5367 = vrot.lane.b32.xlu0 %v8619_v55, %s7639_s30 }
 0x7a8   :  { %5581 = vperm.xlu1 %7303, %v5573_v31  }
 0x7aa   :  { %5475 = vrot.lane.b32.xlu0 %v8623_v54, %s7640_s20 }
 0x7ac   :  { %7304 = vset.pattern.permute.xlu1 %v9050_v34 }
 0x7ad   :  { %5593 = vperm.xlu1 %7304, %v5572_v52  }
 0x7ae   :  { %5471 = vrot.lane.b32.xlu0 %v8619_v55, %s7640_s20 }
 0x7b1   :  { %5597 = vperm.xlu1 %7304, %v5573_v31  }
 0x7b2   :  { %5576 = vperm.xlu0 %7302, %v5572_v52  }
 0x7b5   :  { %7306 = vset.pattern.permute.xlu1 %v9052_v12 }
 0x7b6   :  { %7305 = vset.pattern.permute.xlu0 %v9052_v12  ;;  %5609 = vperm.xlu1 %7306, %v5573_v31  }
 0x7b7   :  { %5605 = vperm.xlu0 %7305, %v5572_v52   ;;  %v4958_v52 = vld [vmem:[#allocation18 + $0x38] sm:$0xff] }
 0x7ba   :  { %7308 = vset.pattern.permute.xlu1 %v9051_v23 }
 0x7bb   :  { %7307 = vset.pattern.permute.xlu0 %v9051_v23 }
 0x7da   :  { %v4642_v3 = vpop.permute.xlu1 %4641 }
 0x7db   :  { %v4651_v7 = vsel %vm3694_vm15, %v4640_v9, %v4642_v3 }
 0x7de   :  { %v4746_v14 = vpop.permute.xlu1 %4745 }
 0x7df   :  { %v4755_v27 = vsel %vm3788_vm2, %v4744_v32, %v4746_v14 }
 0x7e2   :  { %v8700_v39 = vpop.permute.xlu1 %4851 }
 0x7e3   :  { %v4861_v49 = vsel %vm3885_vm3, %v8698_v2, %v8700_v39 }
 0x7e4   :  { %v4644_v59 = vpop.permute.xlu0 %4643 }
 0x7e5   :  { %v4652_v30 = vsel %vm3694_vm15, %v4642_v3, %v4644_v59 }
 0x7e6   :  { %v4962_v62 = vpop.permute.xlu1 %4961 }
 0x7e7   :  { %v4971_v17 = vsel %vm1691_vm12, %v4960_v56, %v4962_v62 }
 0x7e8   :  { %v4748_v60 = vpop.permute.xlu0 %4747 }
 0x7e9   :  { %v4756_v10 = vsel %vm3788_vm2, %v4746_v14, %v4748_v60  ;;  %v5365_v60 = vld [vmem:[#allocation18 + $0x70] sm:$0xff] }
 0x7ea   :  { %v4858_v45 = vpop.permute.xlu1 %4857 }
 0x7eb   :  { %v4863_v58 = vsel %vm3885_vm3, %v4856_v4, %v4858_v45  ;;  %v5068_v4 = vld [vmem:[#allocation18 + $0x48] sm:$0xff] }
 0x7ec   :  { %v4854_v42 = vpop.permute.xlu0 %4853 }
 0x7ed   :  { %v4862_v51 = vsel %vm3885_vm3, %v8700_v39, %v4854_v42  ;;  %v5261_v39 = vld [vmem:[#allocation18 + $0x60] sm:$0xff] }
 0x7ee   :  { %v4650_v5 = vpop.permute.xlu1 %4649  ;;  %v8769_v42 = vld [vmem:[#allocation3] sm:$0xff] }
 0x7f0   :  { %v4964_v18 = vpop.permute.xlu0 %4963 }
 0x7f1   :  { %v4972_v43 = vsel %vm1691_vm12, %v4962_v62, %v4964_v18  ;;  %v5366_v18 = vld [vmem:[#allocation18 + $0x78] sm:$0xff] }
 0x7f2   :  { %v4754_v41 = vpop.permute.xlu1 %4753 }
 0x7f4   :  { %v4648_v48 = vpop.permute.xlu0 %4647 }
 0x7f5   :  { %v4653_v50 = vsel %vm3694_vm15, %v4646_v40, %v4648_v48  ;;  %v4654_v37 = vsel %vm3694_vm15, %v4648_v48, %v4650_v5  ;;  %v4848_v40 = vld [vmem:[#allocation18 + $0x28] sm:$0xff] }
 0x7f6   :  { %4694 = vmatprep.subr.mxu0 %v4654_v37  ;;  %v8704_v13 = vpop.permute.xlu1 %5161  ;;  %v5469_v37 = vld [vmem:[#allocation18 + $0x80] sm:$0xff] }
 0x7f7   :  { %4695 = vmatpush1.msra.mxu0 %v4653_v50 }
 0x7f8   :  { %v4752_v38 = vpop.permute.xlu0 %4751  ;;  %4696 = vmatprep.subr.mxu0 %v4652_v30  ;;  %v5470_v30 = vld [vmem:[#allocation18 + $0x88] sm:$0xff] }
 0x7f9   :  { %v4757_v47 = vsel %vm3788_vm2, %v4750_v46, %v4752_v38  ;;  %4697 = vmatpush1.msra.mxu0 %v4651_v7  ;;  %v4758_v24 = vsel %vm3788_vm2, %v4752_v38, %v4754_v41  ;;  %v5157_v46 = vld [vmem:[#allocation18 + $0x50] sm:$0xff] }
 0x7fa   :  { %4797 = vmatprep.subr.mxu1 %v4758_v24  ;;  %7023 = vmatmul.mubr.msk.f32.vlgmr.msra.gmra.mxu0 %vm4659_vm0, %v4631_v63  ;;  %v8711_v20 = vpop.permute.xlu1 %5265 }
 0x7fb   :  { %4798 = vmatpush1.msra.mxu1 %v4757_v47  ;;  %4736 = vmatprep.mubr.f32.mxu0 %v8511_v1 }
 0x7fc   :  { %v4968_v26 = vpop.permute.xlu0 %4967  ;;  %4799 = vmatprep.subr.mxu1 %v4756_v10 }
 0x7fd   :  { %4800 = vmatpush1.msra.mxu1 %v4755_v27  ;;  %v4973_v22 = vsel %vm1691_vm12, %v4966_v6, %v4968_v26 }
 0x7fe   :  { %7025 = vmatmul.mubr.msk.f32.vlgmr.msra.gmra.mxu1 %vm4659_vm0, %v4628_v8  ;;  %7024 = vmatmul.mubr.msk.f32.gmra.mxu0 %vm4659_vm0, %v4632_v44  ;;  %v4970_v11 = vpop.permute.xlu1 %4969 }
 0x7ff   :  { %4839 = vmatprep.mubr.f32.mxu1 %v8511_v1  ;;  %v4974_v29 = vsel %vm1691_vm12, %v4968_v26, %v4970_v11  ;;  %4939 = vmatprep.mubr.f32.mxu0 %v8511_v1 }
 0x800   :  { %v5164_v36 = vpop.permute.xlu0 %5163  ;;  %5013 = vmatprep.subr.mxu1 %v4974_v29 }
 0x801   :  { %5014 = vmatpush1.msra.mxu1 %v4973_v22 }
 0x802   :  { %7026 = vmatmul.mubr.msk.f32.gmra.mxu1 %vm4659_vm0, %v4629_v28  ;;  %5015 = vmatprep.subr.mxu1 %v4972_v43  ;;  %v8725_v35 = vpop.permute.xlu1 %5369 }
 0x803   :  { %5016 = vmatpush1.msra.mxu1 %v4971_v17  ;;  %5049 = vmatprep.mubr.f32.mxu1 %v8511_v1 }
 0x804   :  { %v4860_v53 = vpop.permute.xlu0 %4859 }
 0x805   :  { %v4864_v57 = vsel %vm3885_vm3, %v4858_v45, %v4860_v53 }
 0x806   :  { %4903 = vmatprep.subr.mxu0 %v4864_v57  ;;  %7029 = vmatmul.mubr.msk.f32.vlgmr.msra.gmra.mxu1 %vm4659_vm0, %v4957_v0  ;;  %v5166_v21 = vpop.permute.xlu1 %5165 }
 0x807   :  { %4904 = vmatpush1.msra.mxu0 %v4863_v58  ;;  %v5168_v33 = vsel %vm355_vm1, %v5164_v36, %v5166_v21  ;;  %5055 = vmatprep.mubr.f32.mxu1 %v8511_v1 }
 0x808   :  { %v5160_v31 = vpop.permute.xlu0 %5159  ;;  %4905 = vmatprep.subr.mxu0 %v4862_v51  ;;  %5207 = vmatprep.subr.mxu1 %v5166_v21 }
 0x809   :  { %4906 = vmatpush1.msra.mxu0 %v4861_v49  ;;  %5208 = vmatpush1.msra.mxu1 %v5168_v33  ;;  %v5167_v32 = vsel %vm355_vm1, %v5160_v31, %v8704_v13 }
 0x80a   :  { %7027 = vmatmul.mubr.msk.f32.vlgmr.msra.gmra.mxu0 %vm4659_vm0, %v4847_v61  ;;  %5103 = vmatprep.subr.mxu0 %v8643_v25  ;;  %v5270_v9 = vpop.permute.xlu1 %5269 }
 0x80b   :  { %5104 = vmatpush1.msra.mxu0 %v8623_v54  ;;  %4945 = vmatprep.mubr.f32.mxu0 %v8511_v1  ;;  %v5067_v54 = vld [vmem:[#allocation18 + $0x40] sm:$0xff] }
 0x80c   :  { %v5268_v2 = vpop.permute.xlu0 %5267  ;;  %5105 = vmatprep.subr.mxu0 %v8631_v16  ;;  %7030 = vmatmul.mubr.msk.f32.gmra.mxu1 %vm4659_vm0, %v4958_v52 }
 0x80d   :  { %5106 = vmatpush1.msra.mxu0 %v8619_v55  ;;  %5209 = vmatprep.subr.mxu1 %v8704_v13  ;;  %v5158_v55 = vld [vmem:[#allocation18 + $0x58] sm:$0xff]  ;;  %v5272_v16 = vsel %vm4271_vm4, %v5268_v2, %v5270_v9 }
 0x80e   :  { %7028 = vmatmul.mubr.msk.f32.gmra.mxu0 %vm4659_vm0, %v4848_v40  ;;  %5210 = vmatpush1.msra.mxu1 %v5167_v32  ;;  %v5374_v25 = vpop.permute.xlu1 %5373 }
 0x80f   :  { %5139 = vmatprep.mubr.f32.mxu0 %v8511_v1  ;;  %5243 = vmatprep.mubr.f32.mxu1 %v8511_v1 }
 0x810   :  { %v5264_v56 = vpop.permute.xlu0 %5263  ;;  %5311 = vmatprep.subr.mxu0 %v5270_v9  ;;  %7033 = vmatmul.mubr.msk.f32.vlgmr.msra.gmra.mxu1 %vm4659_vm0, %v5157_v46 }
 0x811   :  { %5249 = vmatprep.mubr.f32.mxu1 %v8511_v1  ;;  %5415 = vmatprep.subr.mxu1 %v5374_v25  ;;  %v5271_v3 = vsel %vm4271_vm4, %v5264_v56, %v8711_v20 }
 0x812   :  { %7031 = vmatmul.mubr.msk.f32.vlgmr.msra.gmra.mxu0 %vm4659_vm0, %v5067_v54  ;;  %v5478_v59 = vpop.permute.xlu1 %5477 }
 0x813   :  { %5312 = vmatpush1.msra.mxu0 %v5272_v16  ;;  %5145 = vmatprep.mubr.f32.mxu0 %v8511_v1 }
 0x814   :  { %v5372_v6 = vpop.permute.xlu0 %5371  ;;  %5313 = vmatprep.subr.mxu0 %v8711_v20  ;;  %7034 = vmatmul.mubr.msk.f32.gmra.mxu1 %vm4659_vm0, %v5158_v55 }
 0x815   :  { %5314 = vmatpush1.msra.mxu0 %v5271_v3  ;;  %v5376_v14 = vsel %vm4369_vm5, %v5372_v6, %v5374_v25  ;;  %5451 = vmatprep.mubr.f32.mxu1 %v8511_v1 }
 0x816   :  { %7032 = vmatmul.mubr.msk.f32.gmra.mxu0 %vm4659_vm0, %v5068_v4  ;;  %5416 = vmatpush1.msra.mxu1 %v5376_v14  ;;  %v5474_v48 = vpop.permute.xlu1 %5473 }
 0x817   :  { %5347 = vmatprep.mubr.f32.mxu0 %v8511_v1  ;;  %5417 = vmatprep.subr.mxu1 %v8725_v35  ;;  %v5262_v1 = vld [vmem:[#allocation18 + $0x68] sm:$0xff] }
 0x818   :  { %v5368_v62 = vpop.permute.xlu0 %5367  ;;  %5519 = vmatprep.subr.mxu0 %v5478_v59 }
 0x819   :  { %v5375_v45 = vsel %vm4369_vm5, %v5368_v62, %v8725_v35 }
 0x81a   :  { %7035 = vmatmul.mubr.msk.f32.vlgmr.msra.gmra.mxu0 %vm4659_vm0, %v5261_v39  ;;  %5418 = vmatpush1.msra.mxu1 %v5375_v45 }
 0x81b   :  { %7037 = vmatmul.mubr.msk.f32.vlgmr.msra.gmra.mxu1 %vm4659_vm0, %v5365_v60  ;;  %5353 = vmatprep.mubr.f32.mxu0 %v8769_v42 }
 0x81c   :  { %v5476_v5 = vpop.permute.xlu0 %5475  ;;  %5457 = vmatprep.mubr.f32.mxu1 %v8769_v42  ;;  %5715 = vmatprep.subr.mxu1 %v8769_v42 }
 0x81d   :  { %v5480_v41 = vsel %vm4467_vm6, %v5476_v5, %v5478_v59 }
 0x81e   :  { %7036 = vmatmul.mubr.msk.f32.gmra.mxu0 %vm4659_vm0, %v5262_v1 }
 0x81f   :  { %5520 = vmatpush1.msra.mxu0 %v5480_v41  ;;  %7038 = vmatmul.mubr.msk.f32.gmra.mxu1 %vm4659_vm0, %v5366_v18 }
 0x820   :  { %5521 = vmatprep.subr.mxu0 %v5474_v48  ;;  %v5472_v50 = vpop.permute.xlu0 %5471  ;;  %5555 = vmatprep.mubr.f32.mxu0 %v8769_v42 }
 0x821   :  { %v5479_v13 = vsel %vm4467_vm6, %v5472_v50, %v5474_v48 }
 0x822   :  { %5522 = vmatpush1.msra.mxu0 %v5479_v13 }
 0x823   :  { %7039 = vmatmul.mubr.msk.f32.vlgmr.msra.gmra.mxu0 %vm4659_vm0, %v5469_v37  ;;  %v5582_v16 = vpop.permute.xlu1 %5581 }
 0x824   :  { %5561 = vmatprep.mubr.f32.mxu0 %v8769_v42 }
 0x827   :  { %7040 = vmatmul.mubr.msk.f32.gmra.mxu0 %vm4659_vm0, %v5470_v30 }
 0x828   :  { %v5594_v48 = vpop.permute.xlu1 %5593 }
 0x8ba   :  { %v4732_v63 = vpop.f32.mrf.mxu0 }
 0x8bc   :  { %v4734_v38 = vpop.f32.mrf.mxu0 }
 0x8be   :  { %v4835_v7 = vpop.f32.mrf.mxu1  ;;  %v4738_v24 = vpop.f32.mrf.mxu0 }
 0x8bf   :  { %v4836_v36 = vadd.f32 %v4835_v7, %v4732_v63  ;;  %v5577_v63 = vpop.permute.xlu0 %5576 }
 0x8c0   :  { %v4837_v47 = vpop.f32.mrf.mxu1  ;;  %v4740_v8 = vpop.f32.mrf.mxu0 }
 0x8c1   :  { %v4838_v35 = vadd.f32 %v4837_v47, %v4734_v38 }
 0x8c2   :  { %v4841_v20 = vpop.f32.mrf.mxu1 }
 0x8c3   :  { %v4842_v58 = vadd.f32 %v4841_v20, %v4738_v24 }
 0x8c4   :  { %v4843_v10 = vpop.f32.mrf.mxu1 }
 0x8c5   :  { %v4844_v33 = vadd.f32 %v4843_v10, %v4740_v8 }
 0x8c6   :  { %v5051_v44 = vpop.f32.mrf.mxu1 }
 0x8c8   :  { %v5053_v27 = vpop.f32.mrf.mxu1 }
 0x8ca   :  { %v4941_v26 = vpop.f32.mrf.mxu0 }
 0x8cb   :  { %v4952_v0 = vadd.f32 %v4941_v26, %v4836_v36 }
 0x8cc   :  { %v4943_v11 = vpop.f32.mrf.mxu0  ;;  %v5057_v28 = vpop.f32.mrf.mxu1 }
 0x8cd   :  { %v4953_v21 = vadd.f32 %v4943_v11, %v4838_v35  ;;  %v5062_v49 = vadd.f32 %v5051_v44, %v4952_v0  ;;  %v5598_v11 = vpop.permute.xlu1 %5597  ;;  %v5606_v35 = vpop.permute.xlu0 %5605 }
 0x8ce   :  { %v4947_v29 = vpop.f32.mrf.mxu0  ;;  %v5059_v22 = vpop.f32.mrf.mxu1 }
 0x8cf   :  { %v4954_v31 = vadd.f32 %v4947_v29, %v4842_v58  ;;  %v5063_v32 = vadd.f32 %v5053_v27, %v4953_v21  ;;  %v5616_v27 = vld [vmem:[%s9026_s14] sm:$0x3]  ;;  %s7641_s14 = smov 6  }
 0x8d0   :  { %v4949_v43 = vpop.f32.mrf.mxu0  ;;  %v5245_v17 = vpop.f32.mrf.mxu1  ;;  %v5625_v21 = vrot.slane %v5616_v27, %v7848_v19 }
 0x8d1   :  { %v4955_v40 = vadd.f32 %v4949_v43, %v4844_v33  ;;  %v5064_v25 = vadd.f32 %v5057_v28, %v4954_v31  ;;  %v5610_v31 = vpop.permute.xlu1 %5609 }
 0x8d2   :  { %v5141_v53 = vpop.f32.mrf.mxu0  ;;  %v5247_v57 = vpop.f32.mrf.mxu1 }
 0x8d3   :  { %v5152_v2 = vadd.f32 %v5141_v53, %v5062_v49  ;;  %v5065_v4 = vadd.f32 %v5059_v22, %v4955_v40 }
 0x8d4   :  { %v5143_v51 = vpop.f32.mrf.mxu0  ;;  %v5251_v61 = vpop.f32.mrf.mxu1 }
 0x8d5   :  { %v5153_v54 = vadd.f32 %v5143_v51, %v5063_v32  ;;  %v5256_v3 = vadd.f32 %v5245_v17, %v5152_v2  ;;  %v5621_v17 = vrot.slane %v5616_v27, %v7835_v15 }
 0x8d6   :  { %v5147_v52 = vpop.f32.mrf.mxu0  ;;  %v5253_v9 = vpop.f32.mrf.mxu1 }
 0x8d7   :  { %v5154_v6 = vadd.f32 %v5147_v52, %v5064_v25  ;;  %v5257_v59 = vadd.f32 %v5247_v57, %v5153_v54 }
 0x8d8   :  { %v5149_v46 = vpop.f32.mrf.mxu0 }
 0x8d9   :  { %v5155_v62 = vadd.f32 %v5149_v46, %v5065_v4  ;;  %v5258_v1 = vadd.f32 %v5251_v61, %v5154_v6  ;;  %v5696_v4 = vld [vmem:[#allocation25 + $0x60] sm:$0xff]  ;;  %v5695_v6 = vld [vmem:[#allocation25 + $0x58] sm:$0xff] }
 0x8da   :  { %v5349_v56 = vpop.f32.mrf.mxu0 }
 0x8db   :  { %v5453_v55 = vpop.f32.mrf.mxu1  ;;  %v5360_v60 = vadd.f32 %v5349_v56, %v5256_v3  ;;  %v5259_v50 = vadd.f32 %v5253_v9, %v5155_v62  ;;  %v5699_v56 = vld [vmem:[#allocation25 + $0x78] sm:$0xff]  ;;  %v5692_v62 = vld [vmem:[#allocation25 + $0x40] sm:$0xff] }
 0x8dc   :  { %v5351_v14 = vpop.f32.mrf.mxu0  ;;  %5716 = vmatpush1.msra.mxu1 %v5699_v56 }
 0x8dd   :  { %v5455_v39 = vpop.f32.mrf.mxu1  ;;  %v5361_v5 = vadd.f32 %v5351_v14, %v5257_v59  ;;  %v5464_v37 = vadd.f32 %v5453_v55, %v5360_v60  ;;  %v5698_v55 = vld [vmem:[#allocation25 + $0x70] sm:$0xff]  ;;  %5717 = vmatprep.subr.mxu1 %v8769_v42  ;;  %v5693_v59 = vld [vmem:[#allocation25 + $0x48] sm:$0xff]  ;;  %v5691_v60 = vld [vmem:[#allocation25 + $0x38] sm:$0xff] }
 0x8de   :  { %v5355_v45 = vpop.f32.mrf.mxu0  ;;  %5718 = vmatpush1.msra.mxu1 %v5698_v55  ;;  %v5694_v14 = vld [vmem:[#allocation25 + $0x50] sm:$0xff] }
 0x8df   :  { %v5459_v41 = vpop.f32.mrf.mxu1  ;;  %v5362_v13 = vadd.f32 %v5355_v45, %v5258_v1  ;;  %v5465_v7 = vadd.f32 %v5455_v39, %v5361_v5  ;;  %5719 = vmatprep.subr.mxu1 %v8769_v42  ;;  %v5690_v45 = vld [vmem:[#allocation25 + $0x30] sm:$0xff]  ;;  %v5689_v1 = vld [vmem:[#allocation25 + $0x28] sm:$0xff]  ;;  %v5688_v5 = vld [vmem:[#allocation25 + $0x20] sm:$0xff] }
 0x8e0   :  { %v5357_v18 = vpop.f32.mrf.mxu0 }
 0x8e1   :  { %v5363_v38 = vadd.f32 %v5357_v18, %v5259_v50  ;;  %v5461_v24 = vpop.f32.mrf.mxu1  ;;  %v5466_v10 = vadd.f32 %v5459_v41, %v5362_v13  ;;  %v5687_v18 = vld [vmem:[#allocation25 + $0x18] sm:$0xff]  ;;  %v5686_v41 = vld [vmem:[#allocation25 + $0x10] sm:$0xff]  ;;  %v5684_v50 = vld [vmem:[#allocation25] sm:$0xff] }
 0x8e2   :  { %v5707_v13 = vld [vmem:[#allocation25 + $0xb8] sm:$0xff] }
 0x8e3   :  { %v5557_v30 = vpop.f32.mrf.mxu0  ;;  %v5467_v28 = vadd.f32 %v5461_v24, %v5363_v38  ;;  %v5703_v38 = vld [vmem:[#allocation25 + $0x98] sm:$0xff]  ;;  %v5701_v24 = vld [vmem:[#allocation25 + $0x88] sm:$0xff] }
 0x8e4   :  { %v5568_v47 = vadd.f32 %v5557_v30, %v5464_v37  ;;  %v5708_v37 = vld [vmem:[#allocation25 + $0xc0] sm:$0xff]  ;;  %v5706_v30 = vld [vmem:[#allocation25 + $0xb0] sm:$0xff] }
 0x8e5   :  { %v5559_v20 = vpop.f32.mrf.mxu0 }
 0x8e6   :  { %v5584_v8 = vadd.f32 %v5577_v63, %v5568_v47  ;;  %v5569_v44 = vadd.f32 %v5559_v20, %v5465_v7  ;;  %v5704_v7 = vld [vmem:[#allocation25 + $0xa0] sm:$0xff]  ;;  %v5702_v47 = vld [vmem:[#allocation25 + $0x90] sm:$0xff] }
 0x8e7   :  { %v5563_v26 = vpop.f32.mrf.mxu0  ;;  %v5700_v20 = vld [vmem:[#allocation25 + $0x80] sm:$0xff] }
 0x8e8   :  { %v5588_v29 = vmax.f32 %v5584_v8, 0.0  ;;  %v5585_v22 = vadd.f32 %v5577_v63, %v5569_v44  ;;  %v5570_v36 = vadd.f32 %v5563_v26, %v5466_v10  ;;  %v5705_v63 = vld [vmem:[#allocation25 + $0xa8] sm:$0xff] }
 0x8e9   :  { %v5565_v43 = vpop.f32.mrf.mxu0 }
 0x8ea   :  { %v5589_v0 = vmax.f32 %v5585_v22, 0.0  ;;  %v5586_v53 = vadd.f32 %v5582_v16, %v5570_v36  ;;  %v5600_v57 = vmul.f32 %v5594_v48, %v5588_v29  ;;  %v5571_v58 = vadd.f32 %v5565_v43, %v5467_v28 }
 0x8ec   :  { %v5590_v51 = vmax.f32 %v5586_v53, 0.0  ;;  %v5601_v61 = vmul.f32 %v5594_v48, %v5589_v0  ;;  %v5587_v33 = vadd.f32 %v5582_v16, %v5571_v58  ;;  %v5612_v49 = vadd.f32 %v5606_v35, %v5600_v57  ;;  %v5697_v16 = vld [vmem:[#allocation25 + $0x68] sm:$0xff] }
 0x8ed   :  { %5720 = vmatpush1.msra.mxu1 %v5697_v16  ;;  %v5685_v48 = vld [vmem:[#allocation25 + $0x8] sm:$0xff] }
 0x8ee   :  { %v5591_v52 = vmax.f32 %v5587_v33, 0.0  ;;  %v5613_v9 = vadd.f32 %v5606_v35, %v5601_v61  ;;  %v8787_v32 = vmul.f32 %v5621_v17, %v5612_v49  ;;  %v5602_v40 = vmul.f32 %v5598_v11, %v5590_v51  ;;  %5721 = vmatprep.subr.mxu1 %v8769_v42 }
 0x8ef   :  { %5722 = vmatpush1.msra.mxu1 %v5696_v4 }
 0x8f0   :  { %v5629_v2 = vmul.f32 %v5625_v21, %v5613_v9  ;;  %v5603_v46 = vmul.f32 %v5598_v11, %v5591_v52  ;;  %v5614_v15 = vadd.f32 %v5610_v31, %v5602_v40  ;;  %5644 = vrot.lane.b32.xlu0 %v8787_v32, %s7623_s4  ;;  %5723 = vmatprep.subr.mxu1 %v8769_v42  ;;  %v6645_v40 = vld [vmem:[#allocation21 + $0x8] sm:$0xff] }
 0x8f1   :  { %5724 = vmatpush1.msra.mxu1 %v5695_v6 }
 0x8f2   :  { %5633 = vst.msk [vmem:[#allocation4 + $0x10] sm:$0xff] %vm254_vm14, %v5629_v2  ;;  %v5615_v25 = vadd.f32 %v5610_v31, %v5603_v46  ;;  %v8792_v19 = vmul.f32 %v5621_v17, %v5614_v15  ;;  %5725 = vmatprep.subr.mxu1 %v8769_v42  ;;  %v6644_v2 = vld [vmem:[#allocation21] sm:$0xff] }
 0x8f3   :  { %5726 = vmatpush1.msra.mxu1 %v5694_v14 }
 0x8f4   :  { %v5631_v54 = vmul.f32 %v5625_v21, %v5615_v25  ;;  %5648 = vrot.lane.b32.xlu0 %v8792_v19, %s7623_s4  ;;  %5727 = vmatprep.subr.mxu1 %v8769_v42 }
 0x8f5   :  { %5728 = vmatpush1.msra.mxu1 %v5693_v59  ;;  %v5796_v59 = vld [vmem:[%s9021_s9] sm:$0xff] }
 0x8f6   :  { %5635 = vst.msk [vmem:[#allocation4 + $0x30] sm:$0xff] %vm254_vm14, %v5631_v54  ;;  %5729 = vmatprep.subr.mxu1 %v8769_v42 }
 0x8f7   :  { %5730 = vmatpush1.msra.mxu1 %v5692_v62 }
 0x8f8   :  { %5731 = vmatprep.subr.mxu1 %v8769_v42 }
 0x8f9   :  { %v8799_v3 = vld [vmem:[#allocation4 + $0x10] sm:$0xff]  ;;  %5732 = vmatpush1.msra.mxu1 %v5691_v60 }
 0x8fa   :  { %5646 = vrot.lane.b32.xlu1 %v8799_v3, %s7623_s4  ;;  %5733 = vmatprep.subr.mxu1 %v8769_v42 }
 0x8fb   :  { %5734 = vmatpush1.msra.mxu1 %v5690_v45 }
 0x8fc   :  { %5735 = vmatprep.subr.mxu1 %v8769_v42 }
 0x8fd   :  { %v8805_v39 = vld [vmem:[#allocation4 + $0x30] sm:$0xff]  ;;  %5736 = vmatpush1.msra.mxu1 %v5689_v1  ;;  %v5797_v1 = vld [vmem:[%s9021_s9 + $0x8] sm:$0xff] }
 0x8fe   :  { %5650 = vrot.lane.b32.xlu1 %v8805_v39, %s7623_s4  ;;  %5737 = vmatprep.subr.mxu1 %v8769_v42 }
 0x8ff   :  { %5738 = vmatpush1.msra.mxu1 %v5688_v5 }
 0x900   :  { %5739 = vmatprep.subr.mxu1 %v8769_v42 }
 0x901   :  { %5740 = vmatpush1.msra.mxu1 %v5687_v18  ;;  %v7049_v18 = vld [vmem:[%s9021_s9 + $0x20] sm:$0xff] }
 0x902   :  { %5741 = vmatprep.subr.mxu1 %v8769_v42 }
 0x903   :  { %5742 = vmatpush1.msra.mxu1 %v5686_v41 }
 0x904   :  { %5743 = vmatprep.subr.mxu1 %v8769_v42 }
 0x905   :  { %5744 = vmatpush1.msra.mxu1 %v5685_v48 }
 0x906   :  { %5745 = vmatprep.subr.mxu1 %v8769_v42 }
 0x907   :  { %5746 = vmatpush1.msra.mxu1 %v5684_v50 }
 0x908   :  { %5761 = vmatprep.subr.mxu1 %v8769_v42 }
 0x909   :  { %5762 = vmatpush2.msra.mxu1 %v5708_v37  ;;  %v7050_v37 = vld [vmem:[%s9021_s9 + $0x28] sm:$0xff] }
 0x90a   :  { %5763 = vmatprep.subr.mxu1 %v8769_v42 }
 0x90b   :  { %5764 = vmatpush2.msra.mxu1 %v5707_v13 }
 0x90c   :  { %5765 = vmatprep.subr.mxu1 %v8769_v42 }
 0x90d   :  { %5766 = vmatpush2.msra.mxu1 %v5706_v30  ;;  %v7053_v30 = vld [vmem:[%s9021_s9 + $0x30] sm:$0xff] }
 0x90e   :  { %5767 = vmatprep.subr.mxu1 %v8769_v42 }
 0x90f   :  { %5768 = vmatpush2.msra.mxu1 %v5705_v63 }
 0x910   :  { %5769 = vmatprep.subr.mxu1 %v8769_v42 }
 0x911   :  { %5770 = vmatpush2.msra.mxu1 %v5704_v7 }
 0x912   :  { %5771 = vmatprep.subr.mxu1 %v8769_v42 }
 0x913   :  { %5772 = vmatpush2.msra.mxu1 %v5703_v38 }
 0x914   :  { %5773 = vmatprep.subr.mxu1 %v8769_v42 }
 0x915   :  { %5774 = vmatpush2.msra.mxu1 %v5702_v47 }
 0x916   :  { %5775 = vmatprep.subr.mxu1 %v8769_v42 }
 0x917   :  { %5776 = vmatpush2.msra.mxu1 %v5701_v24  ;;  %v7054_v24 = vld [vmem:[%s9021_s9 + $0x38] sm:$0xff] }
 0x918   :  { %5777 = vmatprep.subr.mxu1 %v8769_v42 }
 0x919   :  { %5778 = vmatpush2.msra.mxu1 %v5700_v20  ;;  %v7057_v20 = vld [vmem:[%s9021_s9 + $0x40] sm:$0xff] }
 0x962   :  { %v5645_v10 = vpop.permute.xlu0 %5644 }
 0x966   :  { %v5649_v11 = vpop.permute.xlu0 %5648 }
 0x96c   :  { %v5647_v8 = vpop.permute.xlu1 %5646 }
 0x96d   :  { %v5652_v44 = vsel %vm355_vm1, %v5645_v10, %v5647_v8  ;;  %v5659_v27 = vmax.f32 %v8799_v3, %v5647_v8  ;;  %v7058_v8 = vld [vmem:[%s9021_s9 + $0x48] sm:$0xff] }
 0x96e   :  { %v5658_v26 = vmax.f32 %v8787_v32, %v5652_v44  ;;  %v7043_v32 = vld [vmem:[%s9021_s9 + $0x10] sm:$0xff] }
 0x96f   :  { %5668 = vrot.lane.b32.xlu1 %v5659_v27, %s7639_s30  ;;  %7138 = vmatprep.mubr.msk.f32.mxu0 %vm4659_vm0, %v7043_v32  ;;  %v7061_v44 = vld [vmem:[%s9021_s9 + $0x50] sm:$0xff] }
 0x970   :  { %5666 = vrot.lane.b32.xlu0 %v5658_v26, %s7639_s30  ;;  %v5651_v28 = vpop.permute.xlu1 %5650 }
 0x971   :  { %v5653_v29 = vsel %vm355_vm1, %v5649_v11, %v5651_v28  ;;  %v5661_v22 = vmax.f32 %v8805_v39, %v5651_v28  ;;  %vm5813_vm1 = vcmask 48128   ;;  %v7044_v39 = vld [vmem:[%s9021_s9 + $0x18] sm:$0xff]  ;;  %v7065_v28 = vld [vmem:[%s9021_s9 + $0x60] sm:$0xff] }
 0x972   :  { %v5660_v36 = vmax.f32 %v8792_v19, %v5653_v29  ;;  %v7062_v11 = vld [vmem:[%s9021_s9 + $0x58] sm:$0xff] }
 0x973   :  { %5672 = vrot.lane.b32.xlu1 %v5661_v22, %s7639_s30 }
 0x974   :  { %5670 = vrot.lane.b32.xlu0 %v5660_v36, %s7639_s30 }
 0x978   :  { %5809 = vrot.lane.b32.xlu0 %v8769_v42, %s7641_s14 }
 0x97c   :  { %5805 = vrot.lane.b32.xlu0 %v8769_v42, %s7641_s14 }
 0x980   :  { %5903 = vrot.lane.b32.xlu0 %v8769_v42, %s7642_s22 }
 0x984   :  { %5899 = vrot.lane.b32.xlu0 %v8769_v42, %s7642_s22 }
 0x988   :  { %6000 = vrot.lane.b32.xlu0 %v8769_v42, %s7643_s2 }
 0x98c   :  { %5996 = vrot.lane.b32.xlu0 %v8769_v42, %s7643_s2 }
 0x990   :  { %6099 = vrot.lane.b32.xlu0 %v8769_v42, %s7633_s27 }
 0x994   :  { %6095 = vrot.lane.b32.xlu0 %v8769_v42, %s7633_s27 }
 0x9e1   :  { %v5669_v43 = vpop.permute.xlu1 %5668 }
 0x9e2   :  { %v5681_v17 = vmax.f32 %v5659_v27, %v5669_v43  ;;  %v5667_v35 = vpop.permute.xlu0 %5666 }
 0x9e3   :  { %v5674_v0 = vsel %vm4369_vm5, %v5667_v35, %v5669_v43  ;;  %v7073_v35 = vld [vmem:[%s9021_s9 + $0x80] sm:$0xff] }
 0x9e4   :  { %v5680_v53 = vmax.f32 %v5658_v26, %v5674_v0  ;;  %7041 = vmatprep.mubr.msk.f32.mxu1 %vm254_vm14, %v5681_v17  ;;  %v7070_v17 = vld [vmem:[%s9021_s9 + $0x78] sm:$0xff] }
 0x9e5   :  { %v5673_v57 = vpop.permute.xlu1 %5672 }
 0x9e6   :  { %v5683_v58 = vmax.f32 %v5661_v22, %v5673_v57  ;;  %v5671_v21 = vpop.permute.xlu0 %5670  ;;  %5780 = vmatmul.mubr.f32.vlgmr.msra.gmra.mxu1 %v5680_v53  ;;  %v7066_v22 = vld [vmem:[%s9021_s9 + $0x68] sm:$0xff] }
 0x9e7   :  { %v5675_v51 = vsel %vm4369_vm5, %v5671_v21, %v5673_v57  ;;  %v7074_v57 = vld [vmem:[%s9021_s9 + $0x88] sm:$0xff] }
 0x9e8   :  { %v5682_v61 = vmax.f32 %v5660_v36, %v5675_v51  ;;  %7042 = vmatprep.mubr.msk.f32.mxu1 %vm254_vm14, %v5683_v58  ;;  %v7069_v36 = vld [vmem:[%s9021_s9 + $0x70] sm:$0xff]  ;;  %v6696_v21 = vld [vmem:[%s9024_s12 + $0x8] sm:$0x3]  ;;  %v6695_v51 = vld [vmem:[%s9024_s12] sm:$0xff] }
 0x9e9   :  { %v6693_v58 = vld [vmem:[#allocation22] sm:$0xff] }
 0x9ea   :  { %5785 = vmatmul.mubr.f32.gmra.mxu1 %v5682_v61  ;;  %v5810_v46 = vpop.permute.xlu0 %5809 }
 0x9ee   :  { %v5806_v15 = vpop.permute.xlu0 %5805 }
 0x9f2   :  { %v5904_v25 = vpop.permute.xlu0 %5903 }
 0x9f6   :  { %v5900_v19 = vpop.permute.xlu0 %5899 }
 0x9fa   :  { %v6001_v55 = vpop.permute.xlu0 %6000 }
 0x9fe   :  { %v5997_v4 = vpop.permute.xlu0 %5996 }
 0xa02   :  { %v6100_v62 = vpop.permute.xlu0 %6099 }
 0xa06   :  { %v6096_v48 = vpop.permute.xlu0 %6095 }
 0xaa6   :  { %v5781_v33 = vpop.f32.mrf.mxu1 }
 0xaa7   :  { %5790 = vst.msk [vmem:[#allocation6 + $0x8] sm:$0xff] %vm254_vm14, %v5781_v33 }
 0xaa8   :  { %v5783_v42 = vpop.f32.mrf.mxu1 }
 0xaaa   :  { %v5786_v49 = vpop.f32.mrf.mxu1 }
 0xaab   :  { %5791 = vst.msk [vmem:[#allocation6 + $0x20] sm:$0xff] %vm254_vm14, %v5786_v49 }
 0xaac   :  { %v5788_v31 = vpop.f32.mrf.mxu1 }
 0xaae   :  { %v8861_v52 = vld [vmem:[#allocation6 + $0x8] sm:$0xff] }
 0xaaf   :  { %5807 = vrot.lane.b32.xlu1 %v8861_v52, %s7641_s14 }
 0xab2   :  { %v8865_v9 = vld [vmem:[#allocation6 + $0x20] sm:$0xff] }
 0xab3   :  { %5901 = vrot.lane.b32.xlu1 %v8861_v52, %s7642_s22  ;;  %6281 = vrot.lane.b32.xlu0 %v8865_v9, %s7623_s4 }
 0xab7   :  { %5998 = vrot.lane.b32.xlu1 %v8861_v52, %s7643_s2  ;;  %6373 = vrot.lane.b32.xlu0 %v8865_v9, %s7644_s17 }
 0xabb   :  { %6465 = vrot.lane.b32.xlu0 %v8865_v9, %s7645_s24  ;;  %5811 = vrot.lane.b32.xlu1 %v8865_v9, %s7641_s14 }
 0xabf   :  { %6557 = vrot.lane.b32.xlu0 %v8865_v9, %s7646_s7  ;;  %5905 = vrot.lane.b32.xlu1 %v8865_v9, %s7642_s22 }
 0xac3   :  { %6002 = vrot.lane.b32.xlu1 %v8865_v9, %s7643_s2  ;;  %6653 = vperm.xlu0 %7307, %v6645_v40  }
 0xac7   :  { %6101 = vrot.lane.b32.xlu1 %v8865_v9, %s7633_s27  ;;  %7310 = vset.pattern.permute.xlu0 %v9050_v34 }
 0xac8   :  { %6661 = vperm.xlu0 %7310, %v6644_v2  }
 0xacb   :  { %6097 = vrot.lane.b32.xlu1 %v8861_v52, %s7633_s27 }
 0xacc   :  { %7312 = vset.pattern.permute.xlu0 %v9051_v23 }
 0xacd   :  { %6699 = vperm.xlu0 %7312, %v6695_v51  }
 0xacf   :  { %6279 = vrot.lane.b32.xlu1 %v8861_v52, %s7623_s4 }
 0xad1   :  { %7315 = vset.pattern.permute.xlu0 %v9050_v34 }
 0xad2   :  { %6795 = vperm.xlu0 %7315, %v6696_v21  }
 0xad3   :  { %6371 = vrot.lane.b32.xlu1 %v8861_v52, %s7644_s17 }
 0xad6   :  { %7317 = vset.pattern.permute.xlu0 %v9052_v12 }
 0xad7   :  { %6463 = vrot.lane.b32.xlu1 %v8861_v52, %s7645_s24 }
 0xadb   :  { %6555 = vrot.lane.b32.xlu1 %v8861_v52, %s7646_s7 }
 0xadf   :  { %6648 = vperm.xlu1 %7308, %v6644_v2  }
 0xae3   :  { %7309 = vset.pattern.permute.xlu1 %v9050_v34 }
 0xae4   :  { %6665 = vperm.xlu1 %7309, %v6645_v40  }
 0xae8   :  { %7311 = vset.pattern.permute.xlu1 %v9052_v12 }
 0xae9   :  { %6675 = vperm.xlu1 %7311, %v6645_v40  }
 0xaed   :  { %6671 = vperm.xlu1 %7311, %v6644_v2  }
 0xaf1   :  { %7313 = vset.pattern.permute.xlu1 %v9051_v23 }
 0xaf2   :  { %6704 = vperm.xlu1 %7313, %v6696_v21  }
 0xaf6   :  { %7314 = vset.pattern.permute.xlu1 %v9050_v34 }
 0xaf7   :  { %6791 = vperm.xlu1 %7314, %v6695_v51  }
 0xafb   :  { %7316 = vset.pattern.permute.xlu1 %v9052_v12 }
 0xafc   :  { %6801 = vperm.xlu1 %7316, %v6695_v51  }
 0xb00   :  { %6805 = vperm.xlu1 %7316, %v6696_v21  }
 0xb21   :  { %v5808_v54 = vpop.permute.xlu1 %5807 }
 0xb22   :  { %v5814_v14 = vsel %vm5813_vm1, %v5806_v15, %v5808_v54 }
 0xb25   :  { %v5902_v56 = vpop.permute.xlu1 %5901  ;;  %v6282_v38 = vpop.permute.xlu0 %6281 }
 0xb26   :  { %v5908_v45 = vsel %vm5907_vm7, %v5900_v19, %v5902_v56 }
 0xb29   :  { %v5999_v16 = vpop.permute.xlu1 %5998  ;;  %v6374_v27 = vpop.permute.xlu0 %6373 }
 0xb2a   :  { %v6005_v50 = vsel %vm6004_vm8, %v5997_v4, %v5999_v16 }
 0xb2d   :  { %v5812_v3 = vpop.permute.xlu1 %5811  ;;  %v6466_v29 = vpop.permute.xlu0 %6465 }
 0xb2e   :  { %v5815_v6 = vsel %vm5813_vm1, %v5810_v46, %v5812_v3 }
 0xb2f   :  { %7134 = vmatprep.subr.mxu0 %v5815_v6 }
 0xb30   :  { %7135 = vmatpush3.msra.mxu0 %v5815_v6 }
 0xb31   :  { %7136 = vmatprep.subr.mxu0 %v5814_v14  ;;  %v5906_v23 = vpop.permute.xlu1 %5905  ;;  %v6558_v0 = vpop.permute.xlu0 %6557 }
 0xb32   :  { %7137 = vmatpush3.msra.mxu0 %v5814_v14  ;;  %v5909_v60 = vsel %vm5907_vm7, %v5904_v25, %v5906_v23 }
 0xb33   :  { %7139 = vmatmul.mubr.msk.f32.vlgmr.msra.gmra.mxu0 %vm4659_vm0, %v7044_v39  ;;  %7141 = vmatprep.subr.mxu0 %v5909_v60 }
 0xb34   :  { %7142 = vmatpush3.msra.mxu0 %v5909_v60  ;;  %7145 = vmatprep.mubr.msk.f32.mxu0 %vm4659_vm0, %v5796_v59 }
 0xb35   :  { %7143 = vmatprep.subr.mxu0 %v5908_v45  ;;  %v6003_v5 = vpop.permute.xlu1 %6002 }
 0xb36   :  { %7144 = vmatpush3.msra.mxu0 %v5908_v45  ;;  %v6006_v41 = vsel %vm6004_vm8, %v6001_v55, %v6003_v5 }
 0xb37   :  { %7146 = vmatmul.mubr.msk.f32.vlgmr.msra.gmra.mxu0 %vm4659_vm0, %v5797_v1  ;;  %7148 = vmatprep.subr.mxu0 %v6006_v41 }
 0xb38   :  { %7149 = vmatpush3.msra.mxu0 %v6006_v41  ;;  %7152 = vmatprep.mubr.msk.f32.mxu0 %vm4659_vm0, %v7049_v18 }
 0xb39   :  { %7150 = vmatprep.subr.mxu0 %v6005_v50  ;;  %v6102_v13 = vpop.permute.xlu1 %6101 }
 0xb3a   :  { %7151 = vmatpush3.msra.mxu0 %v6005_v50  ;;  %v6104_v63 = vsel %vm1691_vm12, %v6100_v62, %v6102_v13 }
 0xb3b   :  { %7153 = vmatmul.mubr.msk.f32.vlgmr.msra.gmra.mxu0 %vm4659_vm0, %v7050_v37  ;;  %7155 = vmatprep.subr.mxu0 %v6104_v63 }
 0xb3c   :  { %7156 = vmatpush3.msra.mxu0 %v6104_v63  ;;  %7159 = vmatprep.mubr.msk.f32.mxu0 %vm4659_vm0, %v7053_v30 }
 0xb3d   :  { %v6098_v7 = vpop.permute.xlu1 %6097 }
 0xb3e   :  { %v6103_v47 = vsel %vm1691_vm12, %v6096_v48, %v6098_v7  ;;  %v6654_v18 = vpop.permute.xlu0 %6653 }
 0xb3f   :  { %7157 = vmatprep.subr.mxu0 %v6103_v47 }
 0xb40   :  { %7158 = vmatpush3.msra.mxu0 %v6103_v47 }
 0xb41   :  { %7160 = vmatmul.mubr.msk.f32.vlgmr.msra.gmra.mxu0 %vm4659_vm0, %v7054_v24  ;;  %7162 = vmatprep.subr.mxu0 %v8865_v9  ;;  %v6280_v10 = vpop.permute.xlu1 %6279 }
 0xb42   :  { %7163 = vmatpush3.msra.mxu0 %v8865_v9  ;;  %7166 = vmatprep.mubr.msk.f32.mxu0 %vm4659_vm0, %v7057_v20  ;;  %v7077_v20 = vld [vmem:[%s9027_s15] ss:$0 sm:$0xff] }
 0xb43   :  { %7164 = vmatprep.subr.mxu0 %v8861_v52 }
 0xb44   :  { %7165 = vmatpush3.msra.mxu0 %v8861_v52 }
 0xb45   :  { %7167 = vmatmul.mubr.msk.f32.vlgmr.msra.gmra.mxu0 %vm4659_vm0, %v7058_v8  ;;  %7169 = vmatprep.subr.mxu0 %v6282_v38  ;;  %v6372_v26 = vpop.permute.xlu1 %6371 }
 0xb46   :  { %7170 = vmatpush3.msra.mxu0 %v6282_v38  ;;  %7173 = vmatprep.mubr.msk.f32.mxu0 %vm4659_vm0, %v7061_v44  ;;  %v6662_v38 = vpop.permute.xlu0 %6661 }
 0xb47   :  { %7171 = vmatprep.subr.mxu0 %v6280_v10 }
 0xb48   :  { %7172 = vmatpush3.msra.mxu0 %v6280_v10 }
 0xb49   :  { %7174 = vmatmul.mubr.msk.f32.vlgmr.msra.gmra.mxu0 %vm4659_vm0, %v7062_v11  ;;  %7176 = vmatprep.subr.mxu0 %v6374_v27  ;;  %v6464_v43 = vpop.permute.xlu1 %6463 }
 0xb4a   :  { %7177 = vmatpush3.msra.mxu0 %v6374_v27  ;;  %7180 = vmatprep.mubr.msk.f32.mxu0 %vm4659_vm0, %v7065_v28 }
 0xb4b   :  { %7178 = vmatprep.subr.mxu0 %v6372_v26 }
 0xb4c   :  { %7179 = vmatpush3.msra.mxu0 %v6372_v26 }
 0xb4d   :  { %7181 = vmatmul.mubr.msk.f32.vlgmr.msra.gmra.mxu0 %vm4659_vm0, %v7066_v22  ;;  %7183 = vmatprep.subr.mxu0 %v6466_v29  ;;  %v6556_v53 = vpop.permute.xlu1 %6555  ;;  %v6694_v22 = vld [vmem:[#allocation22 + $0x8] sm:$0x3] }
 0xb4e   :  { %7184 = vmatpush3.msra.mxu0 %v6466_v29  ;;  %7187 = vmatprep.mubr.msk.f32.mxu0 %vm4659_vm0, %v7069_v36 }
 0xb4f   :  { %7185 = vmatprep.subr.mxu0 %v6464_v43 }
 0xb50   :  { %7186 = vmatpush3.msra.mxu0 %v6464_v43 }
 0xb51   :  { %7188 = vmatmul.mubr.msk.f32.vlgmr.msra.gmra.mxu0 %vm4659_vm0, %v7070_v17  ;;  %7190 = vmatprep.subr.mxu0 %v6558_v0  ;;  %v6700_v17 = vpop.permute.xlu0 %6699 }
 0xb52   :  { %7191 = vmatpush3.msra.mxu0 %v6558_v0  ;;  %7194 = vmatprep.mubr.msk.f32.mxu0 %vm4659_vm0, %v7073_v35 }
 0xb53   :  { %7192 = vmatprep.subr.mxu0 %v6556_v53 }
 0xb54   :  { %7193 = vmatpush3.msra.mxu0 %v6556_v53 }
 0xb55   :  { %7195 = vmatmul.mubr.msk.f32.vlgmr.msra.gmra.mxu0 %vm4659_vm0, %v7074_v57 }
 0xb56   :  { %7201 = vmatprep.mubr.msk.f32.mxu0 %vm4659_vm0, %v6693_v58  ;;  %v6796_v58 = vpop.permute.xlu0 %6795 }
 0xb5a   :  { %v6649_v55 = vpop.permute.xlu1 %6648 }
 0xb5f   :  { %v6666_v60 = vpop.permute.xlu1 %6665 }
 0xb64   :  { %v6676_v30 = vpop.permute.xlu1 %6675 }
 0xb68   :  { %v6672_v44 = vpop.permute.xlu1 %6671 }
 0xb6d   :  { %v6705_v36 = vpop.permute.xlu1 %6704 }
 0xb72   :  { %v6792_v43 = vpop.permute.xlu1 %6791 }
 0xb77   :  { %v6802_v35 = vpop.permute.xlu1 %6801 }
 0xbf3   :  { %v7140_v61 = vpop.f32.mrf.mxu0 }
 0xbf5   :  { %v5890_v33 = vpop.f32.mrf.mxu0 }
 0xbf7   :  { %v7147_v42 = vpop.f32.mrf.mxu0 }
 0xbf8   :  { %v5990_v46 = vadd.f32 %v7147_v42, %v7140_v61  ;;  %v6806_v61 = vpop.permute.xlu1 %6805 }
 0xbf9   :  { %v5984_v49 = vpop.f32.mrf.mxu0 }
 0xbfa   :  { %v5985_v15 = vadd.f32 %v5984_v49, %v5890_v33 }
 0xbfb   :  { %v7154_v31 = vpop.f32.mrf.mxu0 }
 0xbfc   :  { %v6091_v25 = vadd.f32 %v7154_v31, %v5990_v46  ;;  %v6850_v46 = vld [vmem:[#allocation27 + $0x30] sm:$0xff] }
 0xbfd   :  { %v6081_v52 = vpop.f32.mrf.mxu0 }
 0xbfe   :  { %v6090_v54 = vadd.f32 %v6081_v52, %v5985_v15  ;;  %v6848_v15 = vld [vmem:[#allocation27 + $0x20] sm:$0xff] }
 0xc01   :  { %v7161_v9 = vpop.f32.mrf.mxu0 }
 0xc02   :  { %v6189_v56 = vadd.f32 %v7161_v9, %v6091_v25 }
 0xc03   :  { %v6179_v32 = vpop.f32.mrf.mxu0 }
 0xc04   :  { %v6188_v16 = vadd.f32 %v6179_v32, %v6090_v54  ;;  %v6852_v32 = vld [vmem:[#allocation27 + $0x40] sm:$0xff] }
 0xc05   :  { %v7168_v40 = vpop.f32.mrf.mxu0 }
 0xc06   :  { %v6275_v4 = vadd.f32 %v7168_v40, %v6189_v56  ;;  %v6851_v40 = vld [vmem:[#allocation27 + $0x38] sm:$0xff]  ;;  %v6846_v56 = vld [vmem:[#allocation27 + $0x10] sm:$0xff] }
 0xc07   :  { %v6265_v2 = vpop.f32.mrf.mxu0 }
 0xc08   :  { %v6274_v6 = vadd.f32 %v6265_v2, %v6188_v16 }
 0xc09   :  { %v7175_v34 = vpop.f32.mrf.mxu0 }
 0xc0a   :  { %v6367_v14 = vadd.f32 %v7175_v34, %v6275_v4  ;;  %v6849_v34 = vld [vmem:[#allocation27 + $0x28] sm:$0xff] }
 0xc0b   :  { %v6357_v19 = vpop.f32.mrf.mxu0 }
 0xc0c   :  { %v6366_v23 = vadd.f32 %v6357_v19, %v6274_v6  ;;  %v6847_v19 = vld [vmem:[#allocation27 + $0x18] sm:$0xff] }
 0xc0d   :  { %v7182_v12 = vpop.f32.mrf.mxu0 }
 0xc0e   :  { %v6459_v59 = vadd.f32 %v7182_v12, %v6367_v14  ;;  %v6845_v12 = vld [vmem:[#allocation27 + $0x8] sm:$0xff] }
 0xc0f   :  { %v6449_v3 = vpop.f32.mrf.mxu0 }
 0xc10   :  { %v6458_v45 = vadd.f32 %v6449_v3, %v6366_v23 }
 0xc11   :  { %v7189_v39 = vpop.f32.mrf.mxu0 }
 0xc12   :  { %v6551_v1 = vadd.f32 %v7189_v39, %v6459_v59 }
 0xc13   :  { %v6541_v62 = vpop.f32.mrf.mxu0 }
 0xc14   :  { %v6550_v41 = vadd.f32 %v6541_v62, %v6458_v45 }
 0xc15   :  { %v7196_v5 = vpop.f32.mrf.mxu0 }
 0xc16   :  { %v6643_v48 = vadd.f32 %v7196_v5, %v6551_v1 }
 0xc17   :  { %v6633_v50 = vpop.f32.mrf.mxu0 }
 0xc18   :  { %v6657_v37 = vadd.f32 %v6654_v18, %v6643_v48  ;;  %v6642_v13 = vadd.f32 %v6633_v50, %v6550_v41 }
 0xc1a   :  { %v6659_v63 = vmax.f32 %v6657_v37, 0.0  ;;  %v6656_v7 = vadd.f32 %v6649_v55, %v6642_v13  ;;  %v6844_v55 = vld [vmem:[#allocation27] sm:$0xff] }
 0xc1c   :  { %v6669_v47 = vmul.f32 %v6666_v60, %v6659_v63  ;;  %v6658_v24 = vmax.f32 %v6656_v7, 0.0 }
 0xc1e   :  { %v6679_v10 = vadd.f32 %v6676_v30, %v6669_v47  ;;  %v6668_v8 = vmul.f32 %v6662_v38, %v6658_v24 }
 0xc20   :  { %v6688_v27 = vmul.f32 %v7077_v20, %v6679_v10  ;;  %v6678_v26 = vadd.f32 %v6672_v44, %v6668_v8 }
 0xc22   :  { %6690 = vst.msk [vmem:[#allocation7 + $0x20] sm:$0xff] %vm254_vm14, %v6688_v27  ;;  %v6687_v11 = vmul.f32 %v7077_v20, %v6678_v26 }
 0xc24   :  { %6689 = vst.msk [vmem:[#allocation7 + $0x8] sm:$0xff] %vm254_vm14, %v6687_v11 }
 0xc29   :  { %v6692_v28 = vld [vmem:[#allocation7 + $0x20] sm:$0xff] }
 0xc2a   :  { %7197 = vmatprep.subr.mxu0 %v6692_v28 }
 0xc2b   :  { %7198 = vmatpush3.msra.mxu0 %v6692_v28  ;;  %v6691_v29 = vld [vmem:[#allocation7 + $0x8] sm:$0xff] }
 0xc2c   :  { %7199 = vmatprep.subr.mxu0 %v6691_v29 }
 0xc2d   :  { %7200 = vmatpush3.msra.mxu0 %v6691_v29 }
 0xc2e   :  { %7202 = vmatmul.mubr.msk.f32.vlgmr.msra.gmra.mxu0 %vm4659_vm0, %v6694_v22  ;;  %7204 = vmatprep.subr.mxu0 %v6852_v32 }
 0xc2f   :  { %7205 = vmatpush3.msra.mxu0 %v6852_v32 }
 0xc30   :  { %7206 = vmatprep.subr.mxu0 %v6851_v40 }
 0xc31   :  { %7207 = vmatpush3.msra.mxu0 %v6851_v40 }
 0xc32   :  { %7208 = vmatprep.subr.mxu0 %v6850_v46 }
 0xc33   :  { %7209 = vmatpush3.msra.mxu0 %v6850_v46 }
 0xc34   :  { %7210 = vmatprep.subr.mxu0 %v6849_v34 }
 0xc35   :  { %7211 = vmatpush3.msra.mxu0 %v6849_v34 }
 0xc36   :  { %7212 = vmatprep.subr.mxu0 %v6848_v15 }
 0xc37   :  { %7213 = vmatpush3.msra.mxu0 %v6848_v15 }
 0xc38   :  { %7214 = vmatprep.subr.mxu0 %v6847_v19 }
 0xc39   :  { %7215 = vmatpush3.msra.mxu0 %v6847_v19 }
 0xc3a   :  { %7216 = vmatprep.subr.mxu0 %v6846_v56 }
 0xc3b   :  { %7217 = vmatpush3.msra.mxu0 %v6846_v56 }
 0xc3c   :  { %7218 = vmatprep.subr.mxu0 %v6845_v12 }
 0xc3d   :  { %7219 = vmatpush3.msra.mxu0 %v6845_v12 }
 0xc3e   :  { %7220 = vmatprep.subr.mxu0 %v6844_v55 }
 0xc3f   :  { %7221 = vmatpush3.msra.mxu0 %v6844_v55 }
 0xcee   :  { %v7203_v0 = vpop.f32.mrf.mxu0 }
 0xcef   :  { %v6785_v53 = vadd.f32 %v7203_v0, %v6705_v36 }
 0xcf0   :  { %v6779_v57 = vpop.f32.mrf.mxu0 }
 0xcf1   :  { %v6789_v21 = vmax.f32 %v6785_v53, 0.0  ;;  %v6780_v51 = vadd.f32 %v6779_v57, %v6700_v17 }
 0xcf3   :  { %v6788_v33 = vmax.f32 %v6780_v51, 0.0  ;;  %v6799_v42 = vmul.f32 %v6796_v58, %v6789_v21 }
 0xcf5   :  { %v6798_v49 = vmul.f32 %v6792_v43, %v6788_v33  ;;  %v6809_v31 = vadd.f32 %v6806_v61, %v6799_v42 }
 0xcf7   :  { %v6808_v52 = vadd.f32 %v6802_v35, %v6798_v49  ;;  %v6818_v9 = vmul.f32 %v7077_v20, %v6809_v31 }
 0xcf9   :  { %v6817_v2 = vmul.f32 %v7077_v20, %v6808_v52  ;;  %6821 = vst.msk [vmem:[#allocation6 + $0x20] sm:$0x3] %vm6820_vm9, %v6818_v9 }
 0xcfb   :  { %6819 = vst.msk [vmem:[#allocation6 + $0x8] sm:$0xff] %vm254_vm14, %v6817_v2 }
 0xd00   :  { %v6823_v25 = vld [vmem:[#allocation6 + $0x20] sm:$0x3] }
 0xd01   :  { %6828 = vrot.lane.b32.xlu1 %v6823_v25, %s7623_s4 }
 0xd02   :  { %v6822_v54 = vld [vmem:[#allocation6 + $0x8] sm:$0xff] }
 0xd03   :  { %6826 = vrot.lane.b32.xlu0 %v6822_v54, %s7623_s4 }
 0xd73   :  { %v6829_v16 = vpop.permute.xlu1 %6828 }
 0xd74   :  { %v6833_v4 = vmax.f32 %v6823_v25, %v6829_v16 }
 0xd75   :  { %v6827_v3 = vpop.permute.xlu0 %6826 }
 0xd76   :  { %v6832_v6 = vmax.f32 %v6822_v54, %v6827_v3  ;;  %6838 = vrot.lane.b32.xlu1 %v6833_v4, %s7645_s24 }
 0xd78   :  { %6836 = vrot.lane.b32.xlu0 %v6832_v6, %s7645_s24 }
 0xde8   :  { %v6839_v14 = vpop.permute.xlu1 %6838 }
 0xde9   :  { %v6843_v59 = vmax.f32 %v6833_v4, %v6839_v14 }
 0xdea   :  { %v6837_v39 = vpop.permute.xlu0 %6836 }
 0xdeb   :  { %v6842_v23 = vmax.f32 %v6832_v6, %v6837_v39 }
 0xded   :  { %7222 = vmatprep.mubr.msk.f32.mxu0 %vm254_vm14, %v6842_v23 }
 0xdee   :  { %7223 = vmatmul.mubr.msk.f32.vlgmr.msra.gmra.mxu0 %vm254_vm14, %v6843_v59 }
 0xeae   :  { %v7224_v62 = vpop.f32.mrf.mxu0 }
 0xeaf   :  { %v6937_v45 = vsel %vm6936_vm10, %v7224_v62, -inf }
 0xeb0   :  { %v6925_v60 = vpop.f32.mrf.mxu0 }
 0xeb1   :  { %v6935_v1 = vsel %vm6934_vm11, %v6925_v60, -inf }
 0xeb2   :  { %v6938_v5 = vmax.f32 %v6935_v1, %v6937_v45 }
 0xeb4   :  { %v6939_v18 = vrot.slane %v6938_v5, 4 }
 0xeb6   :  { %v6940_v41 = vmax.f32 %v6938_v5, %v6939_v18 }
 0xeb8   :  { %v6941_v48 = vrot.slane %v6940_v41, 2 }
 0xeba   :  { %v6942_v50 = vmax.f32 %v6940_v41, %v6941_v48 }
 0xebc   :  { %v6943_v37 = vrot.slane %v6942_v50, 1 }
 0xebe   :  { %v6944_v13 = vmax.f32 %v6942_v50, %v6943_v37 }
 0xec0   :  { %v6945_v30 = vsub.f32 %v6925_v60, %v6944_v13  ;;  %v6946_v63 = vsub.f32 %v7224_v62, %v6944_v13 }
 0xec2   :  { %v6947_v7 = vmul.f32 1.442695, %v6945_v30  ;;  %v6949_v38 = vmul.f32 1.442695, %v6946_v63 }
 0xec4   :  { %7318 = vpow2.f32 %v6947_v7 }
 0xec5   :  { %7320 = vpow2.f32 %v6949_v38 }
 0xed1   :  { %v7319_v47 = vpop.eup %7318 }
 0xed2   :  { %v7321_v24 = vpop.eup %7320  ;;  %v6951_v20 = vsel %vm6934_vm11, %v7319_v47, 0.0 }
 0xed3   :  { %v6952_v10 = vsel %vm6936_vm10, %v7321_v24, 0.0 }
 0xed4   :  { %v6953_v8 = vadd.f32 %v6952_v10, %v6951_v20 }
 0xed6   :  { %v6954_v44 = vrot.slane %v6953_v8, 4 }
 0xed8   :  { %v6955_v27 = vadd.f32 %v6954_v44, %v6953_v8 }
 0xeda   :  { %v6956_v26 = vrot.slane %v6955_v27, 2 }
 0xedc   :  { %v6957_v11 = vadd.f32 %v6956_v26, %v6955_v27 }
 0xede   :  { %v6958_v28 = vrot.slane %v6957_v11, 1 }
 0xee0   :  { %v6959_v29 = vadd.f32 %v6958_v28, %v6957_v11 }
 0xee2   :  { %7322 = vlog2.f32 %v6959_v29 }
 0xeef   :  { %v7323_v22 = vpop.eup %7322 }
 0xef0   :  { %v6961_v36 = vmul.f32 0.6931472, %v7323_v22 }
 0xef2   :  { %v6962_v43 = vsub.f32 %v6945_v30, %v6961_v36  ;;  %v6963_v17 = vsub.f32 %v6946_v63, %v6961_v36 }
 0xef4   :  { %6964 = vst.msk [vmem:[%s9031_s19] sm:$0xff] %vm6934_vm11, %v6962_v43 }
 0xef5   :  { %6965 = vst.msk [vmem:[%s9031_s19 + $0x8] sm:$0x3] %vm6936_vm10, %v6963_v17 }
 0xef6   :  { %6970 = vsyncpa [#allocation9], 1 }
 0xef7   :  { %6971 = vsyncpa [#allocation11], 1 }
 0xef8   :  { %6972 = vsyncpa [#allocation14], 1 }
 0xef9   :  { %6973 = vsyncpa [#allocation17], 1 }
 0xefa   :  { %6974 = vsyncpa [#allocation20], 1 }
 0xefb   :  { %6975 = vsyncpa [#allocation23], 1 }
 0xefc   :  { %6976 = vsyncpa [#allocation26], 1 }

</bundles_post_ra>
